<compile_context>
chip_gen: v6e
topology: v6e:2x2x1
jax: 0.10.0
libtpu: 0.0.40
codegen_flags: <defaults>
</compile_context>

<pallas_src>
import functools

import jax
import jax.numpy as jnp
from jax import lax
from jax.experimental import pallas as pl
from jax.experimental.pallas import tpu as pltpu


def _fnn1_kernel(x_ref, w_ref, b_ref, o_ref):
    # x_ref: (TILE_B, 11) VMEM  -- natural layout, streamed tile of x
    # w_ref: (11, 1)      VMEM  -- weight column (constant block)
    # b_ref: (1, 1)       SMEM  -- scalar bias
    # o_ref: (TILE_B, 1)  VMEM  -- output tile
    y = jnp.dot(
        x_ref[...],
        w_ref[...],
        preferred_element_type=jnp.float32,
        precision=lax.Precision.HIGHEST,
    )                                                  # (TILE_B, 1) f32 via MXU
    o_ref[...] = (y + b_ref[0, 0]).astype(o_ref.dtype)


def _round_up(n, m):
    return ((n + m - 1) // m) * m


def _auto_tile_b():
    """VMEM-capacity aware default batch tile.

    VMEM cost per row (double-buffered input + output, lane-padded 11->128
    and 1->128): ~2 KiB.  v5e/v6e (128 MiB VMEM) -> 48K rows (~96 MiB),
    v7x (64 MiB VMEM) -> 24K rows (~48 MiB)."""
    try:
        vmem_bytes = pltpu.get_tpu_info().vmem_capacity_bytes
    except Exception:  # be conservative if the query is unavailable
        vmem_bytes = 64 * 1024 * 1024
    if vmem_bytes >= 96 * 1024 * 1024:
        return 48 * 1024
    return 24 * 1024


@functools.partial(jax.jit, static_argnames=("tile_b",))
def fnn1_forward_pallas(x, weight, bias, *, tile_b=None):
    """Pallas implementation of FNN_1.forward.

    x:      [B, 11] float32
    weight: [1, 11] float32   (out_features, in_features)
    bias:   [1]     float32
    returns (y, y) with y: [B, 1] float32
    """
    B, F = x.shape
    out_f, in_f = weight.shape
    assert F == in_f and out_f == 1

    if tile_b is None:
        tile_b = _auto_tile_b()
    # Hard cap 48K rows (v5e/v6e); clamp to the batch; keep a multiple of 128
    # (sublane axis only needs 8, but 128 keeps DMAs nicely aligned).
    tile_b = max(256, min(int(tile_b), 48 * 1024))
    tile_b = _round_up(tile_b, 128)
    tile_b = min(tile_b, _round_up(B, 128))

    grid = (pl.cdiv(B, tile_b),)   # ragged last block is masked by Pallas

    w_col = weight.T                # (11, 1)
    b_smem = bias.reshape(1, 1)     # scalar for SMEM

    # Pipeline VMEM: ~2 KiB per tile row (input + output double buffers).
    vmem_limit = tile_b * 2048 + (8 << 20)
    vmem_limit = min(max(vmem_limit, 32 * 1024 * 1024), 100 * 1024 * 1024)

    cost = pl.CostEstimate(
        flops=2 * B * in_f,
        transcendentals=0,
        bytes_accessed=B * in_f * 4 + B * 4 + (in_f + 1) * 4,
    )

    y = pl.pallas_call(
        _fnn1_kernel,
        out_shape=jax.ShapeDtypeStruct((B, out_f), x.dtype),
        grid_spec=pl.GridSpec(
            grid=grid,
            in_specs=[
                pl.BlockSpec((tile_b, in_f), lambda i: (i, 0)),          # x tile (streamed)
                pl.BlockSpec((in_f, out_f), lambda i: (0, 0)),           # weight (constant block)
                pl.BlockSpec(memory_space=pltpu.MemorySpace.SMEM),       # bias scalar
            ],
            out_specs=pl.BlockSpec((tile_b, out_f), lambda i: (i, 0)),
        ),
        compiler_params=pltpu.CompilerParams(
            dimension_semantics=("parallel",),   # v7x: shard tiles over both TCs
            vmem_limit_bytes=vmem_limit,
        ),
        cost_estimate=cost,
    )(x, w_col, b_smem)

    # forward returns the same tensor twice
    return (y, y)


def fnn1_forward(x, weight, bias, *, tile_b=None, min_pallas_batch=64 * 1024):
    """Dispatching wrapper: small/medium batches go straight to XLA (kernel
    dispatch + pipeline prologue dwarf ~2*B*11 FLOPs); large batches use the
    Pallas kernel."""
    B = x.shape[0]
    if B < min_pallas_batch:
        y = x @ weight.T + bias.reshape(1, -1)
        return (y, y)
    return fnn1_forward_pallas(x, weight, bias, tile_b=tile_b)


if __name__ == "__main__":
    key = jax.random.PRNGKey(0)
    kx, kw, kb = jax.random.split(key, 3)

    B, IN, OUT = 2000, 11, 1   # small; 2000 exercises a 4-step grid with a ragged last tile
    x = jax.random.normal(kx, (B, IN), dtype=jnp.float32)

    # Deterministic parameter init mimicking PyTorch Linear default:
    # uniform(-1/sqrt(in_features), 1/sqrt(in_features))
    bound = 1.0 / jnp.sqrt(jnp.float32(IN))
    weight = jax.random.uniform(kw, (OUT, IN), dtype=jnp.float32,
                                minval=-bound, maxval=bound)
    bias = jax.random.uniform(kb, (OUT,), dtype=jnp.float32,
                              minval=-bound, maxval=bound)

    # Exact f32 reference (elementwise mul + reduce; no low-precision matmul).
    ref = jnp.sum(x * weight[0][None, :], axis=1, keepdims=True) + bias

    # Exercise the Pallas kernel explicitly: multi-tile grid + ragged tail.
    y1, y2 = fnn1_forward_pallas(x, weight, bias, tile_b=512)
    jax.block_until_ready((y1, y2))
    assert y1.shape == (B, OUT)
    assert jnp.allclose(y1, ref, atol=1e-4), "pallas path (tile_b=512) mismatch vs reference"
    assert jnp.allclose(y2, ref, atol=1e-4), "pallas path (tile_b=512) mismatch vs reference"

    # Default (VMEM-aware) tile path: single grid step here.
    z1, z2 = fnn1_forward_pallas(x, weight, bias)
    jax.block_until_ready((z1, z2))
    assert jnp.allclose(z1, ref, atol=1e-4), "pallas path (auto tile) mismatch vs reference"

    # Auto-dispatch wrapper (small-batch XLA fallback) also checked.
    w1, w2 = fnn1_forward(x, weight, bias)
    jax.block_until_ready((w1, w2))
    assert jnp.allclose(w1, ref, atol=1e-4), "fallback path mismatch vs reference"
    assert jnp.allclose(w2, ref, atol=1e-4), "fallback path mismatch vs reference"

    print("KERNEL_OK")
</pallas_src>

<mosaic_0001>
module attributes {stable_mosaic.version = 11 : i64} {
  func.func @_fnn1_kernel(%arg0: i32, %arg1: memref<512x11xf32, #tpu.memory_space<vmem>>, %arg2: memref<11x1xf32, #tpu.memory_space<vmem>>, %arg3: memref<1x1xf32, #tpu.memory_space<smem>>, %arg4: memref<512x1xf32, #tpu.memory_space<vmem>>) attributes {dimension_semantics = [#tpu.dimension_semantics<parallel>], iteration_bounds = array<i64: 4>, scalar_prefetch = 0 : i64, scratch_operands = 0 : i64, tpu.core_type = #tpu.core_type<tc>, window_params = [{transform_indices = @transform_0, window_bounds = array<i64: 512, 11>}, {pipeline_mode = #tpu.pipeline_mode<synchronous>, transform_indices = @transform_1, window_bounds = array<i64: 11, 1>}, {transform_indices = @transform_2, window_bounds = array<i64: 1, 1>}, {transform_indices = @transform_3, window_bounds = array<i64: 512, 1>}]} {
    %c0 = arith.constant 0 : index
    %c0_0 = arith.constant 0 : index
    %0 = vector.load %arg1[%c0, %c0_0] : memref<512x11xf32, #tpu.memory_space<vmem>>, vector<512x11xf32>
    %c0_1 = arith.constant 0 : index
    %c0_2 = arith.constant 0 : index
    %1 = vector.load %arg2[%c0_1, %c0_2] : memref<11x1xf32, #tpu.memory_space<vmem>>, vector<11x1xf32>
    %cst = arith.constant dense<0.000000e+00> : vector<512x1xf32>
    %2 = tpu.matmul %0, %1, %cst {dimension_numbers = #tpu.dot_dimension_numbers<[1], [0], [0], [1], [0, 0, 1, 1], [], []>, precision = #tpu.contract_precision<fp32>} : vector<512x11xf32>, vector<11x1xf32>, vector<512x1xf32> -> vector<512x1xf32>
    %c0_3 = arith.constant 0 : index
    %c0_4 = arith.constant 0 : index
    %3 = memref.load %arg3[%c0_3, %c0_4] : memref<1x1xf32, #tpu.memory_space<smem>>
    %4 = vector.broadcast %3 : f32 to vector<512x1xf32>
    %5 = arith.addf %2, %4 : vector<512x1xf32>
    %c0_5 = arith.constant 0 : index
    %c0_6 = arith.constant 0 : index
    %6 = vector.load %arg4[%c0_5, %c0_6] : memref<512x1xf32, #tpu.memory_space<vmem>>, vector<512x1xf32>
    tpu.vector_store %arg4[%c0_5, %c0_6], %5 {strides = array<i32>} : memref<512x1xf32, #tpu.memory_space<vmem>>, vector<512x1xf32>,
    return
  }
  func.func @transform_0(%arg0: i32) -> (i32, i32) {
    %c0_i32 = arith.constant 0 : i32
    %c0_i32_0 = arith.constant 0 : i32
    return %arg0, %c0_i32 : i32, i32
  }
  func.func @transform_1(%arg0: i32) -> (i32, i32) {
    %c0_i32 = arith.constant 0 : i32
    %c0_i32_0 = arith.constant 0 : i32
    %c0_i32_1 = arith.constant 0 : i32
    return %c0_i32, %c0_i32_0 : i32, i32
  }
  func.func @transform_2(%arg0: i32) -> (i32, i32) {
    %c0_i32 = arith.constant 0 : i32
    %c0_i32_0 = arith.constant 0 : i32
    %c0_i32_1 = arith.constant 0 : i32
    return %c0_i32, %c0_i32_0 : i32, i32
  }
  func.func @transform_3(%arg0: i32) -> (i32, i32) {
    %c0_i32 = arith.constant 0 : i32
    %c0_i32_0 = arith.constant 0 : i32
    return %arg0, %c0_i32 : i32, i32
  }
}

</mosaic_0001>

<bundles_post_ra>
// kernel: fnn1_forward_pallas.1
= control target key start
LH: loop header
LB: loop body
LE: loop exit
PB: predicated region body
PF: predicated region fallthrough
CT: control target
= control target key end

     0   :  { %s7341_s0 = inlined_call_operand.vmem [shape: f32[2000,11], index: 0, kind: input, shape index: {}]   ;;  %s7342_s1 = inlined_call_operand.vmem [shape: f32[11,1], index: 1, kind: input, shape index: {}]   ;;  %s7343_s2 = inlined_call_operand.<no memory space> [shape: f32[1,1], index: 2, kind: input, shape index: {}]   ;;  %s7344_s3 = inlined_call_operand.vmem [shape: f32[2000,1], index: 3, kind: output, shape index: {}]  }
   0x1   :  { %8 = sst [smem:[#allocation2]] %s7343_s2 }
   0x2   :  { %s5381_s14 = smov 0   ;;  %s5383_s15 = smov 0  }
   0x3   :  { %s5385_s16 = smov 0  }
   0x4 LB: > { %s5394_s2 = sadd.s32 4294967295, %s5324_s16   ;;  %s5396_s17 = sadd.s32 1, %s5324_s16   ;;  %s5324_s16 = sphi %s5385_s16, %s7885_s16   ;;  %s5320_s15 = sphi %s5383_s15, %s7884_s15   ;;  %s5316_s14 = sphi %s5381_s14, %s7883_s14  }
   0x5   : > { %s86_s18 = ssub.s32 %s5324_s16, %s5396_s17  ;;  %s89_s19 = sadd.s32 1, %s5320_s15 }
   0x6   : > { %p87_p0 = scmp.eq.s32.totalorder %s86_s18, 0  ;;  %p99_p1 = scmp.ne.s32.totalorder %s5320_s15, %s5316_s14 }
   0x7   : > { %p100_p2 = scmp.eq.s32.totalorder %s5394_s2, 3  ;;  %p4162_p3 = scmp.ge.s32.totalorder %s5324_s16, 1 }
   0x8   : > { %s5404_s20 = scalar_select %p87_p0, %s5320_s15, %s89_s19  }
   0x9   : > { %p5406_p4 = por %p100_p2, %p99_p1  ;;  %p147_p5 = scmp.lt.s32.totalorder %s5324_s16, 5 }
   0xb   : > { %p148_p6 = pnand %p4162_p3, %p147_p5 }
   0xd   : > { %151 = sbr.rel (%p148_p6) target bundleno = 683 (0x2ab), region = 32 }
  0x12   : > { %v258_v0 = vld [vmem:[%s7342_s1 + $0x8] sm:$0x7]  ;;  %vm454_vm0 = vcmask 1042432   ;;  %v257_v1 = vld [vmem:[%s7342_s1] sm:$0xff]  ;;  %s5417_s26 = sshll.u32 %s5394_s2, 6  ;;  %vm261_vm1 = vcmask 89088  }
  0x13   : > { %v456_v2 = vsel %vm454_vm0, %v258_v0, 0  ;;  %v5419_v3 = vand.u32 4294901760, %v257_v1  ;;  %p179_p7 = scmp.lt.s32.totalorder %s5417_s26, 249  ;;  %s259_s5 = sld [smem:[#allocation2]]  ;;  %vm3626_vm2 = vcmask 7168  }
  0x14   : > { %v5422_v4 = vand.u32 4294901760, %v456_v2  ;;  %s171_s6 = sand.u32 1, %s5316_s14   ;;  %s3699_s9 = ssub.s32 (%p5406_p4), 250, %s5417_s26 }
  0x15   : > { %v5425_v5 = vsub.f32 %v257_v1, %v5419_v3  ;;  %s180_s27 = scalar_select %p179_p7, %s5417_s26, 249 }
  0x16   : > { %4582 = vmatprep.subr.mxu0 %v5422_v4  ;;  %v5430_v6 = vsub.f32 %v456_v2, %v5422_v4  ;;  %s4163_s7 = sshll.u32 %s171_s6, 9  ;;  %s4183_s10 = sshll.u32 (%p5406_p4), %s5394_s2, 9 }
  0x17   : > { %4583 = vmatpush3.msra.mxu0 %v5422_v4  ;;  %v5434_v7 = vand.u32 4294901760, %v5425_v5  ;;  %s4165_s28 = sshll.u32 %s180_s27, 3  ;;  %s6943_s8 = scalar_lea.vmem [#allocation3], %s4163_s7  }
  0x18   : > { %v5437_v8 = vand.u32 4294901760, %v5430_v6  ;;  %4584 = vmatprep.subr.mxu0 %v5419_v3  ;;  %s5443_s4 = scalar_lea.vmem %s7341_s0, %s4165_s28  ;;  %p3700_p8 = scmp.lt.s32.totalorder (%p5406_p4), %s3699_s9, 64 }
  0x19   : > { %4585 = vmatpush3.msra.mxu0 %v5419_v3  ;;  %v1204_v9 = vsub.f32 %v5425_v5, %v5434_v7  ;;  %v193_v10 = vld [vmem:[%s5443_s4] sm:$0xff]  ;;  %v194_v11 = vld [vmem:[%s5443_s4 + $0x8] sm:$0xff]  ;;  %v195_v12 = vld [vmem:[%s5443_s4 + $0x10] sm:$0xff]  ;;  %s7142_s13 = scalar_lea.vmem (%p5406_p4), %s7344_s3, %s4183_s10  }
  0x1a   : > { %v1197_v13 = vsub.f32 %v5430_v6, %v5437_v8  ;;  %v263_v14 = vsel %vm261_vm1, %v193_v10, 0  ;;  %4782 = vmatprep.subr.mxu0 %v5430_v6  ;;  %v266_v15 = vsel %vm261_vm1, %v194_v11, 0  ;;  %v269_v16 = vsel %vm261_vm1, %v195_v12, 0  ;;  %v196_v17 = vld [vmem:[%s5443_s4 + $0x18] sm:$0xff]  ;;  %v197_v18 = vld [vmem:[%s5443_s4 + $0x20] sm:$0xff]  ;;  %v198_v19 = vld [vmem:[%s5443_s4 + $0x28] sm:$0xff] }
  0x1b   : > { %v1205_v20 = vand.u32 4294901760, %v1204_v9  ;;  %v5460_v21 = vand.u32 4294901760, %v263_v14  ;;  %v5462_v22 = vand.u32 4294901760, %v266_v15  ;;  %v5464_v23 = vand.u32 4294901760, %v269_v16  ;;  %v199_v24 = vld [vmem:[%s5443_s4 + $0x30] sm:$0xff]  ;;  %v200_v25 = vld [vmem:[%s5443_s4 + $0x38] sm:$0xff] }
  0x1c   : > { %v1198_v26 = vand.u32 4294901760, %v1197_v13  ;;  %v272_v27 = vsel %vm261_vm1, %v196_v17, 0  ;;  %v275_v28 = vsel %vm261_vm1, %v197_v18, 0  ;;  %v278_v29 = vsel %vm261_vm1, %v198_v19, 0  ;;  %v201_v54 = vld [vmem:[%s5443_s4 + $0x40] sm:$0xff]  ;;  %v202_v55 = vld [vmem:[%s5443_s4 + $0x48] sm:$0xff] }
  0x1d   : > { %7530 = vst [vmem:[#allocation4_spill] sm:$0xff] %v5460_v21  ;;  %7531 = vst [vmem:[#allocation5_spill] sm:$0xff] %v5462_v22  ;;  %v5472_v30 = vsub.f32 %v263_v14, %v5460_v21  ;;  %4686 = vmatprep.mubr.f32.mxu1 %v5460_v21  ;;  %v5476_v31 = vsub.f32 %v266_v15, %v5462_v22  ;;  %v5479_v32 = vsub.f32 %v269_v16, %v5464_v23  ;;  %v203_v56 = vld [vmem:[%s5443_s4 + $0x50] sm:$0xff]  ;;  %v204_v1 = vld [vmem:[%s5443_s4 + $0x58] sm:$0xff] }
  0x1e   : > { %7532 = vst [vmem:[#allocation6_spill] sm:$0xff] %v5464_v23  ;;  %v5481_v33 = vand.u32 4294901760, %v272_v27  ;;  %4682 = vmatprep.subr.mxu1 %v1198_v26  ;;  %v5483_v34 = vand.u32 4294901760, %v275_v28  ;;  %v5485_v35 = vand.u32 4294901760, %v278_v29  ;;  %v281_v36 = vsel %vm261_vm1, %v199_v24, 0  ;;  %v205_v11 = vld [vmem:[%s5443_s4 + $0x60] sm:$0xff] }
  0x1f   : > { %v284_v37 = vsel %vm261_vm1, %v200_v25, 0  ;;  %4683 = vmatpush3.msra.mxu1 %v1198_v26  ;;  %v7359_v38 = vand.u32 4294901760, %v5472_v30  ;;  %v7357_v39 = vand.u32 4294901760, %v5476_v31  ;;  %v7356_v40 = vand.u32 4294901760, %v5479_v32  ;;  %v206_v16 = vld [vmem:[%s5443_s4 + $0x68] sm:$0xff]  ;;  %v207_v24 = vld [vmem:[%s5443_s4 + $0x70] sm:$0xff] }
  0x20   : > { %7533 = vst [vmem:[#allocation7_spill] sm:$0xff] %v5481_v33  ;;  %7534 = vst [vmem:[#allocation8_spill] sm:$0xff] %v5483_v34  ;;  %v5493_v41 = vsub.f32 %v272_v27, %v5481_v33  ;;  %4684 = vmatprep.subr.mxu1 %v1205_v20  ;;  %v5496_v42 = vsub.f32 %v275_v28, %v5483_v34  ;;  %v5499_v43 = vsub.f32 %v278_v29, %v5485_v35  ;;  %v208_v25 = vld [vmem:[%s5443_s4 + $0x78] sm:$0xff] }
  0x21   : > { %7535 = vst [vmem:[#allocation9_spill] sm:$0xff] %v5485_v35  ;;  %v5501_v44 = vand.u32 4294901760, %v281_v36  ;;  %v5503_v45 = vand.u32 4294901760, %v284_v37  ;;  %v528_v46 = vsub.f32 %v5472_v30, %v7359_v38  ;;  %4685 = vmatpush3.msra.mxu1 %v1205_v20  ;;  %v538_v47 = vsub.f32 %v5476_v31, %v7357_v39 }
  0x22   : > { %v548_v48 = vsub.f32 %v5479_v32, %v7356_v40  ;;  %v7355_v49 = vand.u32 4294901760, %v5493_v41  ;;  %4687 = vmatmul.mubr.f32.vlgmr.msra.gmra.mxu1 %v5462_v22  ;;  %4882 = vmatprep.subr.mxu1 %v5422_v4  ;;  %v7354_v50 = vand.u32 4294901760, %v5496_v42  ;;  %v7352_v51 = vand.u32 4294901760, %v5499_v43  ;;  %v217_v40 = vld [vmem:[%s5443_s4 + $0xc0] sm:$0xff] }
  0x23   : > { %7536 = vst [vmem:[#allocation10_spill] sm:$0xff] %v5501_v44  ;;  %7537 = vst [vmem:[#allocation11_spill] sm:$0xff] %v5503_v45  ;;  %v5520_v52 = vsub.f32 %v281_v36, %v5501_v44  ;;  %v5523_v53 = vsub.f32 %v284_v37, %v5503_v45  ;;  %v529_v57 = vand.u32 4294901760, %v528_v46  ;;  %v539_v58 = vand.u32 4294901760, %v538_v47  ;;  %4883 = vmatpush3.msra.mxu1 %v5422_v4 }
  0x24   : > { %v549_v59 = vand.u32 4294901760, %v548_v48  ;;  %4689 = vmatprep.mubr.f32.mxu1 %v5464_v23  ;;  %v558_v60 = vsub.f32 %v5493_v41, %v7355_v49  ;;  %v568_v61 = vsub.f32 %v5496_v42, %v7354_v50  ;;  %v578_v62 = vsub.f32 %v5499_v43, %v7352_v51  ;;  %4884 = vmatprep.subr.mxu1 %v5419_v3  ;;  %v216_v50 = vld [vmem:[%s5443_s4 + $0xb8] sm:$0xff] }
  0x25   : > { %v7351_v63 = vand.u32 4294901760, %v5520_v52  ;;  %v7349_v0 = vand.u32 4294901760, %v5523_v53  ;;  %4586 = vmatprep.mubr.f32.mxu0 %v529_v57  ;;  %v287_v2 = vsel %vm261_vm1, %v201_v54, 0  ;;  %v290_v9 = vsel %vm261_vm1, %v202_v55, 0  ;;  %4885 = vmatpush3.msra.mxu1 %v5419_v3 }
  0x26   : > { %v293_v10 = vsel %vm261_vm1, %v203_v56, 0  ;;  %4587 = vmatmul.mubr.f32.vlgmr.msra.gmra.mxu0 %v539_v58  ;;  %v559_v12 = vand.u32 4294901760, %v558_v60  ;;  %4690 = vmatmul.mubr.f32.gmra.mxu1 %v5481_v33  ;;  %v569_v13 = vand.u32 4294901760, %v568_v61  ;;  %v579_v14 = vand.u32 4294901760, %v578_v62 }
  0x27   : > { %v588_v15 = vsub.f32 %v5520_v52, %v7351_v63  ;;  %4783 = vmatpush3.msra.mxu0 %v5430_v6  ;;  %4589 = vmatprep.mubr.f32.mxu0 %v549_v59  ;;  %v5554_v17 = vand.u32 4294901760, %v287_v2  ;;  %v5556_v18 = vand.u32 4294901760, %v290_v9  ;;  %v5558_v19 = vand.u32 4294901760, %v293_v10  ;;  %v209_v59 = vld [vmem:[%s5443_s4 + $0x80] sm:$0xff] }
  0x28   : > { %v296_v20 = vsel %vm261_vm1, %v204_v1, 0  ;;  %4692 = vmatprep.mubr.f32.mxu1 %v5483_v34  ;;  %v598_v27 = vsub.f32 %v5523_v53, %v7349_v0  ;;  %v299_v6 = vsel %vm261_vm1, %v205_v11, 0  ;;  %4784 = vmatprep.subr.mxu0 %v5425_v5  ;;  %v302_v48 = vsel %vm261_vm1, %v206_v16, 0  ;;  %v210_v16 = vld [vmem:[%s5443_s4 + $0x88] sm:$0xff] }
  0x29   : > { %7538 = vst [vmem:[#allocation12_spill] sm:$0xff] %v5554_v17  ;;  %7539 = vst [vmem:[#allocation13_spill] sm:$0xff] %v5556_v18  ;;  %v589_v26 = vand.u32 4294901760, %v588_v15  ;;  %v5567_v28 = vand.u32 4294901760, %v296_v20  ;;  %v5572_v29 = vsub.f32 %v287_v2, %v5554_v17  ;;  %v5575_v36 = vsub.f32 %v290_v9, %v5556_v18  ;;  %4785 = vmatpush3.msra.mxu0 %v5425_v5 }
  0x2a   : > { %7540 = vst [vmem:[#allocation14_spill] sm:$0xff] %v5558_v19  ;;  %v5578_v37 = vsub.f32 %v293_v10, %v5558_v19  ;;  %v5580_v46 = vand.u32 4294901760, %v299_v6  ;;  %5082 = vmatprep.subr.mxu1 %v5422_v4  ;;  %4590 = vmatmul.mubr.f32.gmra.mxu0 %v559_v12  ;;  %v305_v54 = vsel %vm261_vm1, %v207_v24, 0  ;;  %v308_v55 = vsel %vm261_vm1, %v208_v25, 0 }
  0x2b   : > { %7541 = vst [vmem:[#allocation15_spill] sm:$0xff] %v5567_v28  ;;  %4693 = vmatmul.mubr.f32.gmra.mxu1 %v5485_v35  ;;  %v5586_v47 = vsub.f32 %v296_v20, %v5567_v28  ;;  %4592 = vmatprep.mubr.f32.mxu0 %v569_v13  ;;  %v7348_v56 = vand.u32 4294901760, %v5572_v29  ;;  %v7347_v5 = vand.u32 4294901760, %v5575_v36  ;;  %v5600_v61 = vand.u32 4294901760, %v302_v48  ;;  %v211_v20 = vld [vmem:[%s5443_s4 + $0x90] sm:$0xff] }
  0x2c   : > { %7542 = vst [vmem:[#allocation16_spill] sm:$0xff] %v5580_v46  ;;  %4695 = vmatprep.mubr.f32.mxu1 %v5501_v44  ;;  %v7345_v57 = vand.u32 4294901760, %v5578_v37  ;;  %v5596_v58 = vsub.f32 %v299_v6, %v5580_v46  ;;  %v5602_v62 = vand.u32 4294901760, %v305_v54  ;;  %4982 = vmatprep.subr.mxu0 %v5437_v8  ;;  %v599_v1 = vand.u32 4294901760, %v598_v27  ;;  %v212_v6 = vld [vmem:[%s5443_s4 + $0x98] sm:$0xff]  ;;  %v227_v44 = vld [vmem:[%s5443_s4 + $0x110] sm:$0xff] }
  0x2d   : > { %v7346_v60 = vand.u32 4294901760, %v5586_v47  ;;  %7543 = vst [vmem:[#allocation17_spill] sm:$0xff] %v5600_v61  ;;  %v608_v2 = vsub.f32 %v5572_v29, %v7348_v56  ;;  %v618_v9 = vsub.f32 %v5575_v36, %v7347_v5  ;;  %v5611_v10 = vand.u32 4294901760, %v308_v55  ;;  %v214_v56 = vld [vmem:[%s5443_s4 + $0xa8] sm:$0xff] }
  0x2e   : > { %7544 = vst [vmem:[#allocation18_spill] sm:$0xff] %v5602_v62  ;;  %4593 = vmatmul.mubr.f32.gmra.mxu0 %v579_v14  ;;  %v628_v11 = vsub.f32 %v5578_v37, %v7345_v57  ;;  %v7350_v12 = vand.u32 4294901760, %v5596_v58  ;;  %v5619_v13 = vsub.f32 %v302_v48, %v5600_v61  ;;  %v311_v15 = vsel %vm261_vm1, %v209_v59, 0  ;;  %v213_v57 = vld [vmem:[%s5443_s4 + $0xa0] sm:$0xff] }
  0x2f   : > { %7545 = vst [vmem:[#allocation19_spill] sm:$0xff] %v5611_v10  ;;  %4696 = vmatmul.mubr.f32.gmra.mxu1 %v5503_v45  ;;  %4595 = vmatprep.mubr.f32.mxu0 %v589_v26  ;;  %v609_v24 = vand.u32 4294901760, %v608_v2  ;;  %v5626_v14 = vsub.f32 %v305_v54, %v5602_v62  ;;  %v638_v25 = vsub.f32 %v5586_v47, %v7346_v60  ;;  %v5636_v59 = vand.u32 4294901760, %v311_v15 }
  0x30   : > { %4698 = vmatprep.mubr.f32.mxu1 %v5554_v17  ;;  %v7353_v27 = vand.u32 4294901760, %v5619_v13  ;;  %v5634_v48 = vsub.f32 %v308_v55, %v5611_v10  ;;  %v314_v26 = vsel %vm261_vm1, %v210_v16, 0  ;;  %v317_v2 = vsel %vm261_vm1, %v211_v20, 0  ;;  %v223_v17 = vld [vmem:[%s5443_s4 + $0xf0] sm:$0xff] }
  0x31   : > { %7546 = vst [vmem:[#allocation20_spill] sm:$0xff] %v5636_v59  ;;  %v619_v54 = vand.u32 4294901760, %v618_v9  ;;  %v629_v60 = vand.u32 4294901760, %v628_v11  ;;  %v648_v5 = vsub.f32 %v5596_v58, %v7350_v12  ;;  %v5645_v55 = vand.u32 4294901760, %v314_v26 }
  0x32   : > { %4596 = vmatmul.mubr.f32.gmra.mxu0 %v599_v1  ;;  %v7358_v16 = vand.u32 4294901760, %v5626_v14  ;;  %v5650_v20 = vsub.f32 %v311_v15, %v5636_v59  ;;  %v5652_v1 = vand.u32 4294901760, %v317_v2  ;;  %v320_v9 = vsel %vm261_vm1, %v212_v6, 0  ;;  %v215_v15 = vld [vmem:[%s5443_s4 + $0xb0] sm:$0xff] }
  0x33   : > { %4699 = vmatmul.mubr.f32.gmra.mxu1 %v5556_v18  ;;  %7547 = vst [vmem:[#allocation21_spill] sm:$0xff] %v5645_v55  ;;  %4598 = vmatprep.mubr.f32.mxu0 %v609_v24  ;;  %v323_v11 = vsel %vm261_vm1, %v213_v57, 0  ;;  %v639_v0 = vand.u32 4294901760, %v638_v25  ;;  %v658_v24 = vsub.f32 %v5619_v13, %v7353_v27  ;;  %v7360_v12 = vand.u32 4294901760, %v5634_v48 }
  0x34   : > { %4701 = vmatprep.mubr.f32.mxu1 %v5558_v19  ;;  %7548 = vst [vmem:[#allocation22_spill] sm:$0xff] %v5652_v1  ;;  %v5662_v63 = vsub.f32 %v314_v26, %v5645_v55  ;;  %v7361_v6 = vand.u32 4294901760, %v5650_v20  ;;  %v5668_v57 = vsub.f32 %v317_v2, %v5652_v1  ;;  %v5670_v25 = vand.u32 4294901760, %v320_v9 }
  0x35   : > { %v326_v51 = vsel %vm261_vm1, %v214_v56, 0  ;;  %v649_v27 = vand.u32 4294901760, %v648_v5  ;;  %v668_v26 = vsub.f32 %v5626_v14, %v7358_v16  ;;  %v329_v2 = vsel %vm261_vm1, %v215_v15, 0  ;;  %v218_v16 = vld [vmem:[%s5443_s4 + $0xc8] sm:$0xff] }
  0x36   : > { %4599 = vmatmul.mubr.f32.gmra.mxu0 %v619_v54  ;;  %7549 = vst [vmem:[#allocation23_spill] sm:$0xff] %v5670_v25  ;;  %v5677_v54 = vand.u32 4294901760, %v323_v11  ;;  %v5680_v49 = vand.u32 4294901760, %v326_v51  ;;  %v659_v39 = vand.u32 4294901760, %v658_v24  ;;  %v678_v56 = vsub.f32 %v5634_v48, %v7360_v12 }
  0x37   : > { %4702 = vmatmul.mubr.f32.gmra.mxu1 %v5567_v28  ;;  %4601 = vmatprep.mubr.f32.mxu0 %v629_v60  ;;  %v688_v60 = vsub.f32 %v5650_v20, %v7361_v6  ;;  %v5694_v15 = vsub.f32 %v320_v9, %v5670_v25  ;;  %v332_v24 = vsel %vm261_vm1, %v216_v50, 0  ;;  %v669_v38 = vand.u32 4294901760, %v668_v26 }
  0x38   : > { %4704 = vmatprep.mubr.f32.mxu1 %v5580_v46  ;;  %7550 = vst [vmem:[#allocation24_spill] sm:$0xff] %v5677_v54  ;;  %7551 = vst [vmem:[#allocation25_spill] sm:$0xff] %v5680_v49  ;;  %v5699_v12 = vsub.f32 %v323_v11, %v5677_v54  ;;  %v335_v5 = vsel %vm261_vm1, %v217_v40, 0  ;;  %v5705_v6 = vsub.f32 %v326_v51, %v5680_v49  ;;  %v7553_v9 = vand.u32 4294901760, %v5662_v63  ;;  %v221_v46 = vld [vmem:[%s5443_s4 + $0xe0] sm:$0xff] }
  0x39   : > { %v5714_v26 = vand.u32 4294901760, %v335_v5  ;;  %v679_v11 = vand.u32 4294901760, %v678_v56  ;;  %v689_v40 = vand.u32 4294901760, %v688_v60  ;;  %v7556_v51 = vand.u32 4294901760, %v5668_v57  ;;  %v220_v60 = vld [vmem:[%s5443_s4 + $0xd8] sm:$0xff] }
  0x3a   : > { %4602 = vmatmul.mubr.f32.gmra.mxu0 %v639_v0  ;;  %v5701_v0 = vand.u32 4294901760, %v329_v2  ;;  %v698_v50 = vsub.f32 %v5662_v63, %v7553_v9  ;;  %v347_v18 = vsel %vm261_vm1, %v221_v46, 0 }
  0x3b   : > { %4705 = vmatmul.mubr.f32.gmra.mxu1 %v5600_v61  ;;  %4604 = vmatprep.mubr.f32.mxu0 %v649_v27  ;;  %v219_v61 = vld [vmem:[%s5443_s4 + $0xd0] sm:$0xff]  ;;  %v5712_v27 = vand.u32 4294901760, %v332_v24  ;;  %7555 = vst [vmem:[#allocation28_spill] sm:$0xff] %v5714_v26 }
  0x3c   : > { %4707 = vmatprep.mubr.f32.mxu1 %v5602_v62  ;;  %7552 = vst [vmem:[#allocation26_spill] sm:$0xff] %v5701_v0  ;;  %v708_v62 = vsub.f32 %v5668_v57, %v7556_v51  ;;  %v5724_v28 = vsub.f32 %v329_v2, %v5701_v0  ;;  %v341_v56 = vsel %vm261_vm1, %v219_v61, 0  ;;  %v699_v19 = vand.u32 4294901760, %v698_v50 }
  0x3d   : > { %7554 = vst [vmem:[#allocation27_spill] sm:$0xff] %v5712_v27  ;;  %v5731_v51 = vsub.f32 %v332_v24, %v5712_v27  ;;  %v7557_v2 = vand.u32 4294901760, %v5694_v15  ;;  %v5743_v9 = vand.u32 4294901760, %v341_v56  ;;  %v344_v50 = vsel %vm261_vm1, %v220_v60, 0  ;;  %v222_v24 = vld [vmem:[%s5443_s4 + $0xe8] sm:$0xff] }
  0x3e   : > { %4605 = vmatmul.mubr.f32.gmra.mxu0 %v659_v39  ;;  %v338_v39 = vsel %vm261_vm1, %v218_v16, 0 }
  0x3f   : > { %4708 = vmatmul.mubr.f32.gmra.mxu1 %v5611_v10  ;;  %4607 = vmatprep.mubr.f32.mxu0 %v669_v38  ;;  %v5734_v38 = vsub.f32 %v335_v5, %v5714_v26  ;;  %v718_v16 = vsub.f32 %v5694_v15, %v7557_v2  ;;  %v5741_v61 = vand.u32 4294901760, %v338_v39  ;;  %7559 = vst [vmem:[#allocation30_spill] sm:$0xff] %v5743_v9  ;;  %v709_v10 = vand.u32 4294901760, %v708_v62 }
  0x40   : > { %4710 = vmatprep.mubr.f32.mxu1 %v5636_v59  ;;  %v7560_v5 = vand.u32 4294901760, %v5699_v12  ;;  %v7561_v2 = vand.u32 4294901760, %v5705_v6  ;;  %v5767_v46 = vsub.f32 %v341_v56, %v5743_v9  ;;  %v7563_v62 = vand.u32 4294901760, %v5724_v28 }
  0x41   : > { %7558 = vst [vmem:[#allocation29_spill] sm:$0xff] %v5741_v61  ;;  %v7566_v56 = vand.u32 4294901760, %v5731_v51 }
  0x42   : > { %4608 = vmatmul.mubr.f32.gmra.mxu0 %v679_v11  ;;  %v728_v11 = vsub.f32 %v5699_v12, %v7560_v5  ;;  %v738_v59 = vsub.f32 %v5705_v6, %v7561_v2  ;;  %v719_v5 = vand.u32 4294901760, %v718_v16  ;;  %v748_v60 = vsub.f32 %v5724_v28, %v7563_v62  ;;  %v225_v16 = vld [vmem:[%s5443_s4 + $0x100] sm:$0xff] }
  0x43   : > { %4711 = vmatmul.mubr.f32.gmra.mxu1 %v5645_v55  ;;  %4610 = vmatprep.mubr.f32.mxu0 %v689_v40  ;;  %v5758_v40 = vand.u32 4294901760, %v344_v50  ;;  %v5764_v55 = vsub.f32 %v338_v39, %v5741_v61  ;;  %v353_v39 = vsel %vm261_vm1, %v223_v17, 0  ;;  %v359_v35 = vsel %vm261_vm1, %v225_v16, 0 }
  0x44   : > { %4713 = vmatprep.mubr.f32.mxu1 %v5652_v1  ;;  %v350_v1 = vsel %vm261_vm1, %v222_v24, 0  ;;  %v729_v2 = vand.u32 4294901760, %v728_v11  ;;  %v5773_v24 = vand.u32 4294901760, %v347_v18  ;;  %v7567_v11 = vand.u32 4294901760, %v5734_v38 }
  0x45   : > { %7562 = vst [vmem:[#allocation31_spill] sm:$0xff] %v5758_v40  ;;  %v5777_v45 = vand.u32 4294901760, %v350_v1  ;;  %v5787_v62 = vsub.f32 %v344_v50, %v5758_v40  ;;  %v5798_v50 = vand.u32 4294901760, %v353_v39  ;;  %v7573_v16 = vand.u32 4294901760, %v5764_v55 }
  0x46   : > { %4611 = vmatmul.mubr.f32.gmra.mxu0 %v699_v19  ;;  %7564 = vst [vmem:[#allocation32_spill] sm:$0xff] %v5773_v24  ;;  %v224_v19 = vld [vmem:[%s5443_s4 + $0xf8] sm:$0xff] }
  0x47   : > { %4714 = vmatmul.mubr.f32.gmra.mxu1 %v5670_v25  ;;  %4613 = vmatprep.mubr.f32.mxu0 %v709_v10  ;;  %7565 = vst [vmem:[#allocation33_spill] sm:$0xff] %v5777_v45  ;;  %v739_v25 = vand.u32 4294901760, %v738_v59  ;;  %v758_v10 = vsub.f32 %v5731_v51, %v7566_v56  ;;  %v356_v59 = vsel %vm261_vm1, %v224_v19, 0  ;;  %v749_v56 = vand.u32 4294901760, %v748_v60  ;;  %7569 = vst [vmem:[#allocation35_spill] sm:$0xff] %v5798_v50 }
  0x48   : > { %4716 = vmatprep.mubr.f32.mxu1 %v5677_v54  ;;  %v768_v54 = vsub.f32 %v5734_v38, %v7567_v11  ;;  %v5796_v11 = vsub.f32 %v347_v18, %v5773_v24  ;;  %v5806_v19 = vand.u32 4294901760, %v356_v59  ;;  %v5820_v33 = vsub.f32 %v353_v39, %v5798_v50 }
  0x49   : > { %v759_v60 = vand.u32 4294901760, %v758_v10  ;;  %v228_v10 = vld [vmem:[%s5443_s4 + $0x118] sm:$0xff]  ;;  %v7576_v23 = vand.u32 4294901760, %v5787_v62 }
  0x4a   : > { %4614 = vmatmul.mubr.f32.gmra.mxu0 %v719_v5  ;;  %7568 = vst [vmem:[#allocation34_spill] sm:$0xff] %v5796_v11  ;;  %v5801_v5 = vsub.f32 %v350_v1, %v5777_v45  ;;  %7571 = vst [vmem:[#allocation37_spill] sm:$0xff] %v5806_v19  ;;  %v769_v18 = vand.u32 4294901760, %v768_v54  ;;  %v778_v1 = vsub.f32 %v5764_v55, %v7573_v16  ;;  %v365_v54 = vsel %vm261_vm1, %v227_v44, 0  ;;  %v229_v16 = vld [vmem:[%s5443_s4 + $0x120] sm:$0xff] }
  0x4b   : > { %4717 = vmatmul.mubr.f32.gmra.mxu1 %v5680_v49  ;;  %4616 = vmatprep.mubr.f32.mxu0 %v729_v2  ;;  %v226_v49 = vld [vmem:[%s5443_s4 + $0x108] sm:$0xff]  ;;  %v5808_v2 = vand.u32 4294901760, %v359_v35  ;;  %7575 = vst [vmem:[#allocation39_spill] sm:$0xff] %v5820_v33 }
  0x4c   : > { %4719 = vmatprep.mubr.f32.mxu1 %v5701_v0  ;;  %7570 = vst [vmem:[#allocation36_spill] sm:$0xff] %v5801_v5  ;;  %v7574_v0 = vand.u32 4294901760, %v5767_v46  ;;  %v779_v39 = vand.u32 4294901760, %v778_v1  ;;  %v230_v1 = vld [vmem:[%s5443_s4 + $0x128] sm:$0xff] }
  0x4d   : > { %7572 = vst [vmem:[#allocation38_spill] sm:$0xff] %v5808_v2  ;;  %v5834_v17 = vsub.f32 %v359_v35, %v5808_v2 }
  0x4e   : > { %4617 = vmatmul.mubr.f32.gmra.mxu0 %v739_v25  ;;  %v788_v34 = vsub.f32 %v5767_v46, %v7574_v0  ;;  %v362_v25 = vsel %vm261_vm1, %v226_v49, 0  ;;  %v798_v0 = vsub.f32 %v5787_v62, %v7576_v23  ;;  %v5839_v49 = vand.u32 4294901760, %v365_v54 }
  0x4f   : > { %4720 = vmatmul.mubr.f32.gmra.mxu1 %v5712_v27  ;;  %4619 = vmatprep.mubr.f32.mxu0 %v749_v56  ;;  %v5831_v56 = vsub.f32 %v356_v59, %v5806_v19  ;;  %7578 = vst [vmem:[#allocation41_spill] sm:$0xff] %v5834_v17  ;;  %v5837_v44 = vand.u32 4294901760, %v362_v25  ;;  %v368_v27 = vsel %vm261_vm1, %v228_v10, 0  ;;  %v7581_v23 = vand.u32 4294901760, %v5796_v11 }
  0x50   : > { %4722 = vmatprep.mubr.f32.mxu1 %v5714_v26  ;;  %7580 = vst [vmem:[#allocation43_spill] sm:$0xff] %v5839_v49  ;;  %v789_v26 = vand.u32 4294901760, %v788_v34  ;;  %v7422_v59 = vand.u32 4294901760, %v5820_v33  ;;  %v799_v21 = vand.u32 4294901760, %v798_v0  ;;  %v5854_v10 = vand.u32 4294901760, %v368_v27  ;;  %v232_v34 = vld [vmem:[%s5443_s4 + $0x138] sm:$0xff] }
  0x51   : > { %7577 = vst [vmem:[#allocation40_spill] sm:$0xff] %v5831_v56  ;;  %7579 = vst [vmem:[#allocation42_spill] sm:$0xff] %v5837_v44  ;;  %v808_v35 = vsub.f32 %v5796_v11, %v7581_v23  ;;  %v5862_v23 = vsub.f32 %v365_v54, %v5839_v49  ;;  %v374_v0 = vsel %vm261_vm1, %v230_v1, 0  ;;  %v7588_v11 = vand.u32 4294901760, %v5834_v17 }
  0x52   : > { %4620 = vmatmul.mubr.f32.gmra.mxu0 %v759_v60  ;;  %v371_v60 = vsel %vm261_vm1, %v229_v16, 0  ;;  %7583 = vst [vmem:[#allocation44_spill] sm:$0xff] %v5854_v10  ;;  %v5859_v16 = vsub.f32 %v362_v25, %v5837_v44  ;;  %v5882_v1 = vand.u32 4294901760, %v374_v0 }
  0x53   : > { %4723 = vmatmul.mubr.f32.gmra.mxu1 %v5741_v61  ;;  %4622 = vmatprep.mubr.f32.mxu0 %v769_v18  ;;  %v7582_v61 = vand.u32 4294901760, %v5801_v5  ;;  %7585 = vst [vmem:[#allocation46_spill] sm:$0xff] %v5862_v23  ;;  %v809_v18 = vand.u32 4294901760, %v808_v35  ;;  %v5880_v35 = vsub.f32 %v368_v27, %v5854_v10 }
  0x54   : > { %4725 = vmatprep.mubr.f32.mxu1 %v5743_v9  ;;  %v231_v9 = vld [vmem:[%s5443_s4 + $0x130] sm:$0xff]  ;;  %7584 = vst [vmem:[#allocation45_spill] sm:$0xff] %v5859_v16  ;;  %7590 = vst [vmem:[#allocation49_spill] sm:$0xff] %v5882_v1 }
  0x55   : > { %v818_v22 = vsub.f32 %v5801_v5, %v7582_v61  ;;  %v5864_v61 = vand.u32 4294901760, %v371_v60  ;;  %v377_v25 = vsel %vm261_vm1, %v231_v9, 0  ;;  %v7587_v5 = vand.u32 4294901760, %v5831_v56  ;;  %7589 = vst [vmem:[#allocation48_spill] sm:$0xff] %v5880_v35 }
  0x56   : > { %4623 = vmatmul.mubr.f32.gmra.mxu0 %v779_v39  ;;  %v828_v39 = vsub.f32 %v5820_v33, %v7422_v59  ;;  %v233_v59 = vld [vmem:[%s5443_s4 + $0x140] sm:$0xff]  ;;  %v5893_v27 = vand.u32 4294901760, %v377_v25  ;;  %v5900_v9 = vsub.f32 %v374_v0, %v5882_v1 }
  0x57   : > { %4726 = vmatmul.mubr.f32.gmra.mxu1 %v5758_v40  ;;  %7586 = vst [vmem:[#allocation47_spill] sm:$0xff] %v5864_v61  ;;  %4625 = vmatprep.mubr.f32.mxu0 %v789_v26  ;;  %v819_v40 = vand.u32 4294901760, %v818_v22  ;;  %v838_v54 = vsub.f32 %v5831_v56, %v7587_v5  ;;  %v848_v26 = vsub.f32 %v5834_v17, %v7588_v11  ;;  %v383_v17 = vsel %vm261_vm1, %v233_v59, 0  ;;  %v235_v56 = vld [vmem:[%s5443_s4 + $0x150] sm:$0xff] }
  0x58   : > { %4728 = vmatprep.mubr.f32.mxu1 %v5773_v24  ;;  %v5889_v5 = vsub.f32 %v371_v60, %v5864_v61  ;;  %v380_v24 = vsel %vm261_vm1, %v232_v34, 0  ;;  %v829_v11 = vand.u32 4294901760, %v828_v39  ;;  %7592 = vst [vmem:[#allocation51_spill] sm:$0xff] %v5893_v27  ;;  %7593 = vst [vmem:[#allocation52_spill] sm:$0xff] %v5900_v9  ;;  %v7595_v34 = vand.u32 4294901760, %v5859_v16 }
  0x59   : > { %v5902_v60 = vand.u32 4294901760, %v380_v24  ;;  %v7596_v39 = vand.u32 4294901760, %v5862_v23  ;;  %v5914_v0 = vsub.f32 %v377_v25, %v5893_v27  ;;  %v237_v25 = vld [vmem:[%s5443_s4 + $0x160] sm:$0xff] }
  0x5a   : > { %4626 = vmatmul.mubr.f32.gmra.mxu0 %v799_v21  ;;  %7591 = vst [vmem:[#allocation50_spill] sm:$0xff] %v5889_v5  ;;  %v234_v21 = vld [vmem:[%s5443_s4 + $0x148] sm:$0xff]  ;;  %v858_v59 = vsub.f32 %v5859_v16, %v7595_v34  ;;  %v7599_v34 = vand.u32 4294901760, %v5880_v35 }
  0x5b   : > { %4729 = vmatmul.mubr.f32.gmra.mxu1 %v5777_v45  ;;  %4628 = vmatprep.mubr.f32.mxu0 %v809_v18  ;;  %v839_v45 = vand.u32 4294901760, %v838_v54  ;;  %7594 = vst [vmem:[#allocation53_spill] sm:$0xff] %v5902_v60  ;;  %v849_v18 = vand.u32 4294901760, %v848_v26  ;;  %v868_v54 = vsub.f32 %v5862_v23, %v7596_v39  ;;  %7597 = vst [vmem:[#allocation54_spill] sm:$0xff] %v5914_v0  ;;  %v386_v26 = vsel %vm261_vm1, %v234_v21, 0 }
  0x5c   : > { %4731 = vmatprep.mubr.f32.mxu1 %v5798_v50  ;;  %v236_v50 = vld [vmem:[%s5443_s4 + $0x158] sm:$0xff]  ;;  %v878_v16 = vsub.f32 %v5880_v35, %v7599_v34  ;;  %v859_v22 = vand.u32 4294901760, %v858_v59  ;;  %v5930_v21 = vand.u32 4294901760, %v386_v26  ;;  %v7603_v39 = vand.u32 4294901760, %v5889_v5  ;;  %v238_v59 = vld [vmem:[%s5443_s4 + $0x168] sm:$0xff] }
  0x5d   : > { %v869_v34 = vand.u32 4294901760, %v868_v54  ;;  %v7453_v35 = vand.u32 4294901760, %v5914_v0  ;;  %v395_v23 = vsel %vm261_vm1, %v237_v25, 0 }
  0x5e   : > { %4629 = vmatmul.mubr.f32.gmra.mxu0 %v819_v40  ;;  %v5916_v40 = vand.u32 4294901760, %v383_v17  ;;  %7601 = vst [vmem:[#allocation57_spill] sm:$0xff] %v5930_v21  ;;  %v879_v33 = vand.u32 4294901760, %v878_v16  ;;  %v398_v16 = vsel %vm261_vm1, %v238_v59, 0 }
  0x5f   : > { %4732 = vmatmul.mubr.f32.gmra.mxu1 %v5806_v19  ;;  %4631 = vmatprep.mubr.f32.mxu0 %v829_v11  ;;  %v389_v19 = vsel %vm261_vm1, %v235_v56, 0  ;;  %v5926_v11 = vsub.f32 %v380_v24, %v5902_v60  ;;  %v888_v24 = vsub.f32 %v5889_v5, %v7603_v39  ;;  %v5972_v59 = vand.u32 4294901760, %v398_v16 }
  0x60   : > { %4734 = vmatprep.mubr.f32.mxu1 %v5808_v2  ;;  %7598 = vst [vmem:[#allocation55_spill] sm:$0xff] %v5916_v40  ;;  %v5932_v56 = vand.u32 4294901760, %v389_v19  ;;  %v392_v2 = vsel %vm261_vm1, %v236_v50, 0  ;;  %v7605_v50 = vand.u32 4294901760, %v5900_v9 }
  0x61   : > { %7600 = vst [vmem:[#allocation56_spill] sm:$0xff] %v5926_v11  ;;  %7611 = vst [vmem:[#allocation65_spill] sm:$0xff] %v5972_v59 }
  0x62   : > { %4632 = vmatmul.mubr.f32.gmra.mxu0 %v839_v45  ;;  %7602 = vst [vmem:[#allocation58_spill] sm:$0xff] %v5932_v56  ;;  %v5941_v45 = vsub.f32 %v383_v17, %v5916_v40  ;;  %v5954_v17 = vsub.f32 %v386_v26, %v5930_v21  ;;  %v5957_v39 = vsub.f32 %v389_v19, %v5932_v56  ;;  %v240_v26 = vld [vmem:[%s5443_s4 + $0x178] sm:$0xff] }
  0x63   : > { %4735 = vmatmul.mubr.f32.gmra.mxu1 %v5837_v44  ;;  %4634 = vmatprep.mubr.f32.mxu0 %v849_v18  ;;  %v239_v44 = vld [vmem:[%s5443_s4 + $0x170] sm:$0xff]  ;;  %v898_v18 = vsub.f32 %v5900_v9, %v7605_v50  ;;  %v889_v50 = vand.u32 4294901760, %v888_v24  ;;  %v7613_v24 = vand.u32 4294901760, %v5926_v11 }
  0x64   : > { %4737 = vmatprep.mubr.f32.mxu1 %v5839_v49  ;;  %7604 = vst [vmem:[#allocation59_spill] sm:$0xff] %v5941_v45  ;;  %v5950_v49 = vand.u32 4294901760, %v392_v2  ;;  %7607 = vst [vmem:[#allocation61_spill] sm:$0xff] %v5954_v17  ;;  %v401_v25 = vsel %vm261_vm1, %v239_v44, 0  ;;  %v7620_v54 = vand.u32 4294901760, %v5957_v39 }
  0x65   : > { %7608 = vst [vmem:[#allocation62_spill] sm:$0xff] %v5957_v39  ;;  %v899_v9 = vand.u32 4294901760, %v898_v18  ;;  %v5974_v44 = vand.u32 4294901760, %v401_v25  ;;  %v5995_v18 = vsub.f32 %v398_v16, %v5972_v59 }
  0x66   : > { %7606 = vst [vmem:[#allocation60_spill] sm:$0xff] %v5950_v49  ;;  %4635 = vmatmul.mubr.f32.gmra.mxu0 %v859_v22  ;;  %v908_v22 = vsub.f32 %v5914_v0, %v7453_v35  ;;  %v5970_v19 = vsub.f32 %v392_v2, %v5950_v49  ;;  %v918_v35 = vsub.f32 %v5926_v11, %v7613_v24  ;;  %v404_v2 = vsel %vm261_vm1, %v240_v26, 0  ;;  %v242_v24 = vld [vmem:[%s5443_s4 + $0x188] sm:$0xff]  ;;  %v243_v26 = vld [vmem:[%s5443_s4 + $0x190] sm:$0xff] }
  0x67   : > { %4738 = vmatmul.mubr.f32.gmra.mxu1 %v5854_v10  ;;  %4637 = vmatprep.mubr.f32.mxu0 %v869_v34  ;;  %v5966_v10 = vand.u32 4294901760, %v395_v23  ;;  %7612 = vst [vmem:[#allocation66_spill] sm:$0xff] %v5974_v44  ;;  %v241_v34 = vld [vmem:[%s5443_s4 + $0x180] sm:$0xff]  ;;  %v7614_v0 = vand.u32 4294901760, %v5941_v45  ;;  %7616 = vst [vmem:[#allocation68_spill] sm:$0xff] %v5995_v18  ;;  %v948_v16 = vsub.f32 %v5957_v39, %v7620_v54 }
  0x68   : > { %4740 = vmatprep.mubr.f32.mxu1 %v5864_v61  ;;  %7610 = vst [vmem:[#allocation64_spill] sm:$0xff] %v5970_v19  ;;  %v909_v61 = vand.u32 4294901760, %v908_v22  ;;  %v407_v5 = vsel %vm261_vm1, %v241_v34, 0  ;;  %v6000_v22 = vand.u32 4294901760, %v404_v2  ;;  %v7622_v11 = vand.u32 4294901760, %v5970_v19 }
  0x69   : > { %7609 = vst [vmem:[#allocation63_spill] sm:$0xff] %v5966_v10 }
  0x6a   : > { %4638 = vmatmul.mubr.f32.gmra.mxu0 %v879_v33  ;;  %v928_v33 = vsub.f32 %v5941_v45, %v7614_v0  ;;  %7618 = vst [vmem:[#allocation70_spill] sm:$0xff] %v6000_v22  ;;  %v919_v0 = vand.u32 4294901760, %v918_v35  ;;  %v6012_v45 = vand.u32 4294901760, %v407_v5  ;;  %v410_v35 = vsel %vm261_vm1, %v242_v24, 0 }
  0x6b   : > { %4741 = vmatmul.mubr.f32.gmra.mxu1 %v5882_v1  ;;  %4640 = vmatprep.mubr.f32.mxu0 %v889_v50  ;;  %v5989_v1 = vsub.f32 %v395_v23, %v5966_v10  ;;  %v5998_v50 = vsub.f32 %v401_v25, %v5974_v44  ;;  %v7619_v23 = vand.u32 4294901760, %v5954_v17  ;;  %v245_v25 = vld [vmem:[%s5443_s4 + $0x1a0] sm:$0xff]  ;;  %v949_v24 = vand.u32 4294901760, %v948_v16 }
  0x6c   : > { %4743 = vmatprep.mubr.f32.mxu1 %v5893_v27  ;;  %v929_v27 = vand.u32 4294901760, %v928_v33  ;;  %7621 = vst [vmem:[#allocation71_spill] sm:$0xff] %v6012_v45  ;;  %v6023_v33 = vsub.f32 %v404_v2, %v6000_v22  ;;  %v419_v16 = vsel %vm261_vm1, %v245_v25, 0 }
  0x6d   : > { %7615 = vst [vmem:[#allocation67_spill] sm:$0xff] %v5989_v1  ;;  %7617 = vst [vmem:[#allocation69_spill] sm:$0xff] %v5998_v50  ;;  %v938_v34 = vsub.f32 %v5954_v17, %v7619_v23  ;;  %v958_v23 = vsub.f32 %v5970_v19, %v7622_v11  ;;  %v7625_v11 = vand.u32 4294901760, %v5989_v1  ;;  %v247_v19 = vld [vmem:[%s5443_s4 + $0x1b0] sm:$0xff]  ;;  %v7629_v39 = vand.u32 4294901760, %v5998_v50 }
  0x6e   : > { %4641 = vmatmul.mubr.f32.gmra.mxu0 %v899_v9  ;;  %v413_v9 = vsel %vm261_vm1, %v243_v26, 0  ;;  %7623 = vst [vmem:[#allocation72_spill] sm:$0xff] %v6023_v33  ;;  %v6027_v26 = vand.u32 4294901760, %v410_v35 }
  0x6f   : > { %4744 = vmatmul.mubr.f32.gmra.mxu1 %v5902_v60  ;;  %4643 = vmatprep.mubr.f32.mxu0 %v909_v61  ;;  %v244_v60 = vld [vmem:[%s5443_s4 + $0x198] sm:$0xff]  ;;  %v968_v54 = vsub.f32 %v5989_v1, %v7625_v11  ;;  %v6034_v61 = vsub.f32 %v407_v5, %v6012_v45  ;;  %v6036_v2 = vand.u32 4294901760, %v413_v9  ;;  %v988_v5 = vsub.f32 %v5998_v50, %v7629_v39 }
  0x70   : > { %4746 = vmatprep.mubr.f32.mxu1 %v5916_v40  ;;  %v939_v40 = vand.u32 4294901760, %v938_v34  ;;  %7624 = vst [vmem:[#allocation73_spill] sm:$0xff] %v6027_v26  ;;  %v246_v34 = vld [vmem:[%s5443_s4 + $0x1a8] sm:$0xff]  ;;  %v425_v1 = vsel %vm261_vm1, %v247_v19, 0  ;;  %v7633_v19 = vand.u32 4294901760, %v6023_v33 }
  0x71   : > { %7626 = vst [vmem:[#allocation74_spill] sm:$0xff] %v6034_v61  ;;  %7627 = vst [vmem:[#allocation75_spill] sm:$0xff] %v6036_v2  ;;  %v7494_v39 = vand.u32 4294901760, %v6034_v61  ;;  %v6060_v11 = vsub.f32 %v413_v9, %v6036_v2 }
  0x72   : > { %4644 = vmatmul.mubr.f32.gmra.mxu0 %v919_v0  ;;  %v416_v0 = vsel %vm261_vm1, %v244_v60, 0  ;;  %v6051_v60 = vsub.f32 %v410_v35, %v6027_v26  ;;  %v249_v35 = vld [vmem:[%s5443_s4 + $0x1c0] sm:$0xff]  ;;  %v998_v9 = vsub.f32 %v6023_v33, %v7633_v19  ;;  %v252_v33 = vld [vmem:[%s5443_s4 + $0x1d8] sm:$0xff] }
  0x73   : > { %4747 = vmatmul.mubr.f32.gmra.mxu1 %v5930_v21  ;;  %4646 = vmatprep.mubr.f32.mxu0 %v929_v27  ;;  %v959_v21 = vand.u32 4294901760, %v958_v23  ;;  %v7628_v27 = vand.u32 4294901760, %v5995_v18  ;;  %v6053_v25 = vand.u32 4294901760, %v416_v0  ;;  %v422_v23 = vsel %vm261_vm1, %v246_v34, 0  ;;  %7631 = vst [vmem:[#allocation77_spill] sm:$0xff] %v6060_v11 }
  0x74   : > { %4749 = vmatprep.mubr.f32.mxu1 %v5932_v56  ;;  %v6066_v17 = vand.u32 4294901760, %v422_v23  ;;  %v6068_v34 = vand.u32 4294901760, %v425_v1  ;;  %v431_v19 = vsel %vm261_vm1, %v249_v35, 0 }
  0x75   : > { %v978_v56 = vsub.f32 %v5995_v18, %v7628_v27  ;;  %7630 = vst [vmem:[#allocation76_spill] sm:$0xff] %v6053_v25  ;;  %v969_v27 = vand.u32 4294901760, %v968_v54  ;;  %v989_v18 = vand.u32 4294901760, %v988_v5  ;;  %v250_v54 = vld [vmem:[%s5443_s4 + $0x1c8] sm:$0xff] }
  0x76   : > { %4647 = vmatmul.mubr.f32.gmra.mxu0 %v939_v40  ;;  %v6062_v40 = vand.u32 4294901760, %v419_v16  ;;  %7632 = vst [vmem:[#allocation78_spill] sm:$0xff] %v6068_v34 }
  0x77   : > { %4750 = vmatmul.mubr.f32.gmra.mxu1 %v5950_v49  ;;  %4649 = vmatprep.mubr.f32.mxu0 %v949_v24  ;;  %v248_v49 = vld [vmem:[%s5443_s4 + $0x1b8] sm:$0xff]  ;;  %v979_v50 = vand.u32 4294901760, %v978_v56  ;;  %v6076_v24 = vsub.f32 %v416_v0, %v6053_v25  ;;  %v6090_v0 = vsub.f32 %v422_v23, %v6066_v17  ;;  %v6103_v23 = vand.u32 4294901760, %v431_v19 }
  0x78   : > { %4752 = vmatprep.mubr.f32.mxu1 %v5966_v10  ;;  %v428_v56 = vsel %vm261_vm1, %v248_v49, 0  ;;  %v6093_v49 = vsub.f32 %v425_v1, %v6068_v34  ;;  %v7640_v10 = vand.u32 4294901760, %v6060_v11 }
  0x79   : > { %7634 = vst [vmem:[#allocation79_spill] sm:$0xff] %v6076_v24  ;;  %7636 = vst [vmem:[#allocation81_spill] sm:$0xff] %v6090_v0 }
  0x7a   : > { %4650 = vmatmul.mubr.f32.gmra.mxu0 %v959_v21  ;;  %v1008_v21 = vsub.f32 %v6034_v61, %v7494_v39  ;;  %7637 = vst [vmem:[#allocation82_spill] sm:$0xff] %v6093_v49  ;;  %v999_v39 = vand.u32 4294901760, %v998_v9 }
  0x7b   : > { %4753 = vmatmul.mubr.f32.gmra.mxu1 %v5972_v59  ;;  %4652 = vmatprep.mubr.f32.mxu0 %v969_v27  ;;  %v6085_v59 = vsub.f32 %v419_v16, %v6062_v40  ;;  %v6095_v27 = vand.u32 4294901760, %v428_v56  ;;  %v7639_v16 = vand.u32 4294901760, %v6051_v60 }
  0x7c   : > { %4755 = vmatprep.mubr.f32.mxu1 %v5974_v44  ;;  %v251_v44 = vld [vmem:[%s5443_s4 + $0x1d0] sm:$0xff]  ;;  %v1009_v1 = vand.u32 4294901760, %v1008_v21  ;;  %v253_v21 = vld [vmem:[%s5443_s4 + $0x1e0] sm:$0xff] }
  0x7d   : > { %7635 = vst [vmem:[#allocation80_spill] sm:$0xff] %v6085_v59  ;;  %7638 = vst [vmem:[#allocation83_spill] sm:$0xff] %v6095_v27  ;;  %v1018_v35 = vsub.f32 %v6051_v60, %v7639_v16  ;;  %v7513_v9 = vand.u32 4294901760, %v6085_v59  ;;  %v437_v61 = vsel %vm261_vm1, %v251_v44, 0  ;;  %v6124_v44 = vsub.f32 %v431_v19, %v6103_v23 }
  0x7e   : > { %4653 = vmatmul.mubr.f32.gmra.mxu0 %v979_v50  ;;  %v1028_v50 = vsub.f32 %v6060_v11, %v7640_v10  ;;  %v7641_v10 = vand.u32 4294901760, %v6076_v24  ;;  %v7642_v19 = vand.u32 4294901760, %v6090_v0  ;;  %v255_v11 = vld [vmem:[%s5443_s4 + $0x1f0] sm:$0xff] }
  0x7f   : > { %4756 = vmatmul.mubr.f32.gmra.mxu1 %v6000_v22  ;;  %4655 = vmatprep.mubr.f32.mxu0 %v989_v18  ;;  %v434_v22 = vsel %vm261_vm1, %v250_v54, 0  ;;  %v6116_v18 = vsub.f32 %v428_v56, %v6095_v27  ;;  %v6132_v56 = vand.u32 4294901760, %v437_v61 }
  0x80   : > { %4758 = vmatprep.mubr.f32.mxu1 %v6012_v45  ;;  %v1019_v45 = vand.u32 4294901760, %v1018_v35  ;;  %v1038_v54 = vsub.f32 %v6076_v24, %v7641_v10  ;;  %v6126_v16 = vand.u32 4294901760, %v434_v22  ;;  %v1029_v5 = vand.u32 4294901760, %v1028_v50  ;;  %v254_v10 = vld [vmem:[%s5443_s4 + $0x1e8] sm:$0xff] }
  0x81   : > { %v440_v35 = vsel %vm261_vm1, %v252_v33, 0  ;;  %v1058_v24 = vsub.f32 %v6090_v0, %v7642_v19 }
  0x82   : > { %4656 = vmatmul.mubr.f32.gmra.mxu0 %v999_v39  ;;  %v1048_v39 = vsub.f32 %v6085_v59, %v7513_v9  ;;  %v1039_v9 = vand.u32 4294901760, %v1038_v54  ;;  %v6150_v59 = vand.u32 4294901760, %v440_v35  ;;  %v449_v54 = vsel %vm261_vm1, %v255_v11, 0 }
  0x83   : > { %4759 = vmatmul.mubr.f32.gmra.mxu1 %v6027_v26  ;;  %4658 = vmatprep.mubr.f32.mxu0 %v1009_v1  ;;  %v443_v26 = vsel %vm261_vm1, %v253_v21, 0  ;;  %v7643_v1 = vand.u32 4294901760, %v6093_v49  ;;  %v6148_v21 = vsub.f32 %v434_v22, %v6126_v16  ;;  %v1059_v33 = vand.u32 4294901760, %v1058_v24 }
  0x84   : > { %4761 = vmatprep.mubr.f32.mxu1 %v6036_v2  ;;  %v1049_v19 = vand.u32 4294901760, %v1048_v39  ;;  %v6156_v2 = vand.u32 4294901760, %v443_v26  ;;  %v7644_v22 = vand.u32 4294901760, %v6116_v18 }
  0x85   : > { %v1068_v50 = vsub.f32 %v6093_v49, %v7643_v1  ;;  %v6154_v1 = vsub.f32 %v437_v61, %v6132_v56  ;;  %v7526_v39 = vand.u32 4294901760, %v6148_v21 }
  0x86   : > { %4659 = vmatmul.mubr.f32.gmra.mxu0 %v1019_v45  ;;  %v446_v45 = vsel %vm261_vm1, %v254_v10, 0  ;;  %v1078_v0 = vsub.f32 %v6116_v18, %v7644_v22  ;;  %v6170_v10 = vsub.f32 %v440_v35, %v6150_v59 }
  0x87   : > { %4762 = vmatmul.mubr.f32.gmra.mxu1 %v6053_v25  ;;  %4661 = vmatprep.mubr.f32.mxu0 %v1029_v5  ;;  %v256_v25 = vld [vmem:[%s5443_s4 + $0x1f8] sm:$0xff]  ;;  %v1069_v49 = vand.u32 4294901760, %v1068_v50  ;;  %v7645_v5 = vand.u32 4294901760, %v6124_v44  ;;  %v6172_v11 = vand.u32 4294901760, %v446_v45  ;;  %v6179_v50 = vand.u32 4294901760, %v449_v54 }
  0x88   : > { %4764 = vmatprep.mubr.f32.mxu1 %v6062_v40  ;;  %v452_v22 = vsel %vm261_vm1, %v256_v25, 0  ;;  %v1098_v35 = vsub.f32 %v6148_v21, %v7526_v39  ;;  %v7646_v25 = vand.u32 4294901760, %v6154_v1 }
  0x89   : > { %v1088_v61 = vsub.f32 %v6124_v44, %v7645_v5  ;;  %v1079_v5 = vand.u32 4294901760, %v1078_v0  ;;  %v6190_v24 = vand.u32 4294901760, %v452_v22 }
  0x8a   : > { %4662 = vmatmul.mubr.f32.gmra.mxu0 %v1039_v9  ;;  %v6177_v9 = vsub.f32 %v443_v26, %v6156_v2  ;;  %v1108_v0 = vsub.f32 %v6154_v1, %v7646_v25  ;;  %v1099_v39 = vand.u32 4294901760, %v1098_v35 }
  0x8b   : > { %4765 = vmatmul.mubr.f32.gmra.mxu1 %v6066_v17  ;;  %4664 = vmatprep.mubr.f32.mxu0 %v1049_v19  ;;  %v7527_v19 = vand.u32 4294901760, %v6170_v10  ;;  %v1089_v26 = vand.u32 4294901760, %v1088_v61  ;;  %v6206_v61 = vsub.f32 %v452_v22, %v6190_v24 }
  0x8c   : > { %4767 = vmatprep.mubr.f32.mxu1 %v6068_v34  ;;  %v6188_v34 = vsub.f32 %v446_v45, %v6172_v11  ;;  %v1109_v25 = vand.u32 4294901760, %v1108_v0 }
  0x8d   : > { %v1157_v22 = vand.u32 4294901760, %v6206_v61 }
  0x8e   : > { %4665 = vmatmul.mubr.f32.gmra.mxu0 %v1059_v33  ;;  %v7528_v33 = vand.u32 4294901760, %v6177_v9  ;;  %v1137_v45 = vand.u32 4294901760, %v6188_v34 }
  0x8f   : > { %4768 = vmatmul.mubr.f32.gmra.mxu1 %v6095_v27  ;;  %4667 = vmatprep.mubr.f32.mxu0 %v1069_v49  ;;  %v6198_v27 = vsub.f32 %v449_v54, %v6179_v50  ;;  %v1118_v49 = vsub.f32 %v6170_v10, %v7527_v19 }
  0x90   : > { %4770 = vmatprep.mubr.f32.mxu1 %v6103_v23  ;;  %v1128_v54 = vsub.f32 %v6177_v9, %v7528_v33  ;;  %v1138_v19 = vsub.f32 %v6188_v34, %v1137_v45 }
  0x91   : > { %v1119_v35 = vand.u32 4294901760, %v1118_v49 }
  0x92   : > { %4668 = vmatmul.mubr.f32.gmra.mxu0 %v1079_v5  ;;  %v1147_v5 = vand.u32 4294901760, %v6198_v27  ;;  %v1139_v33 = vand.u32 4294901760, %v1138_v19  ;;  %v7648_v19 = vand.u32 4294901760, %v5476_v31 }
  0x93   : > { %4771 = vmatmul.mubr.f32.gmra.mxu1 %v6126_v16  ;;  %4670 = vmatprep.mubr.f32.mxu0 %v1089_v26  ;;  %v1129_v26 = vand.u32 4294901760, %v1128_v54  ;;  %v7647_v54 = vand.u32 4294901760, %v5472_v30 }
  0x94   : > { %4773 = vmatprep.mubr.f32.mxu1 %v6132_v56  ;;  %v1148_v0 = vsub.f32 %v6198_v27, %v1147_v5 }
  0x96   : > { %4671 = vmatmul.mubr.f32.gmra.mxu0 %v1099_v39  ;;  %v1158_v39 = vsub.f32 %v6206_v61, %v1157_v22  ;;  %v1149_v49 = vand.u32 4294901760, %v1148_v0 }
  0x97   : > { %4774 = vmatmul.mubr.f32.gmra.mxu1 %v6150_v59  ;;  %4673 = vmatprep.mubr.f32.mxu0 %v1109_v25 }
  0x98   : > { %4776 = vmatprep.mubr.f32.mxu1 %v6156_v2  ;;  %v1159_v25 = vand.u32 4294901760, %v1158_v39 }
  0x9a   : > { %4674 = vmatmul.mubr.f32.gmra.mxu0 %v1119_v35  ;;  %v7649_v35 = vand.u32 4294901760, %v5479_v32 }
  0x9b   : > { %4777 = vmatmul.mubr.f32.gmra.mxu1 %v6172_v11  ;;  %4676 = vmatprep.mubr.f32.mxu0 %v1129_v26 }
  0x9c   : > { %4779 = vmatprep.mubr.f32.mxu1 %v6179_v50 }
  0x9e   : > { %4677 = vmatmul.mubr.f32.gmra.mxu0 %v1139_v33  ;;  %v7650_v33 = vand.u32 4294901760, %v5493_v41 }
  0x9f   : > { %4780 = vmatmul.mubr.f32.gmra.mxu1 %v6190_v24  ;;  %4679 = vmatprep.mubr.f32.mxu0 %v1149_v49  ;;  %v7685_v49 = vld [vmem:[#allocation45_spill] sm:$0xff] }
  0xa0   : > { %4886 = vmatprep.mubr.f32.mxu1 %v7647_v54  ;;  %v7687_v54 = vld [vmem:[#allocation46_spill] sm:$0xff] }
  0xa2   : > { %4680 = vmatmul.mubr.f32.gmra.mxu0 %v1159_v25  ;;  %v7686_v25 = vand.u32 4294901760, %v7685_v49 }
  0xa3   : > { %4887 = vmatmul.mubr.f32.vlgmr.msra.gmra.mxu1 %v7648_v19  ;;  %4786 = vmatprep.mubr.f32.mxu0 %v5472_v30  ;;  %v7651_v30 = vand.u32 4294901760, %v5496_v42  ;;  %v7688_v19 = vand.u32 4294901760, %v7687_v54 }
  0xa4   : > { %5083 = vmatpush3.msra.mxu1 %v5422_v4  ;;  %4889 = vmatprep.mubr.f32.mxu1 %v7649_v35  ;;  %v7653_v4 = vand.u32 4294901760, %v5520_v52  ;;  %v6337_v35 = vstv %s259_s5 }
  0xa5   : > { %5084 = vmatprep.subr.mxu1 %v5419_v3 }
  0xa6   : > { %5085 = vmatpush3.msra.mxu1 %v5419_v3  ;;  %4787 = vmatmul.mubr.f32.vlgmr.msra.gmra.mxu0 %v5476_v31  ;;  %v7652_v3 = vand.u32 4294901760, %v5499_v43  ;;  %v7655_v31 = vand.u32 4294901760, %v5572_v29 }
  0xa7   : > { %4890 = vmatmul.mubr.f32.gmra.mxu1 %v7650_v33  ;;  %4983 = vmatpush3.msra.mxu0 %v5437_v8  ;;  %v7654_v8 = vand.u32 4294901760, %v5523_v53 }
  0xa8   : > { %4789 = vmatprep.mubr.f32.mxu0 %v5479_v32  ;;  %4892 = vmatprep.mubr.f32.mxu1 %v7651_v30  ;;  %v7657_v32 = vand.u32 4294901760, %v5578_v37 }
  0xa9   : > { %4984 = vmatprep.subr.mxu0 %v5434_v7 }
  0xaa   : > { %4985 = vmatpush3.msra.mxu0 %v5434_v7  ;;  %v7656_v7 = vand.u32 4294901760, %v5575_v36 }
  0xab   : > { %4790 = vmatmul.mubr.f32.gmra.mxu0 %v5493_v41  ;;  %4893 = vmatmul.mubr.f32.gmra.mxu1 %v7652_v3  ;;  %v7658_v41 = vand.u32 4294901760, %v5586_v47 }
  0xac   : > { %4792 = vmatprep.mubr.f32.mxu0 %v5496_v42  ;;  %4895 = vmatprep.mubr.f32.mxu1 %v7653_v4  ;;  %v7659_v42 = vand.u32 4294901760, %v5596_v58  ;;  %v7689_v4 = vld [vmem:[#allocation48_spill] sm:$0xff] }
  0xaf   : > { %4793 = vmatmul.mubr.f32.gmra.mxu0 %v5499_v43  ;;  %4896 = vmatmul.mubr.f32.gmra.mxu1 %v7654_v8  ;;  %v7660_v43 = vand.u32 4294901760, %v5619_v13  ;;  %v7690_v8 = vand.u32 4294901760, %v7689_v4 }
  0xb0   : > { %4795 = vmatprep.mubr.f32.mxu0 %v5520_v52  ;;  %4898 = vmatprep.mubr.f32.mxu1 %v7655_v31  ;;  %v7661_v52 = vand.u32 4294901760, %v5626_v14 }
  0xb3   : > { %4796 = vmatmul.mubr.f32.gmra.mxu0 %v5523_v53  ;;  %4899 = vmatmul.mubr.f32.gmra.mxu1 %v7656_v7  ;;  %v7662_v53 = vand.u32 4294901760, %v5634_v48  ;;  %v7691_v7 = vld [vmem:[#allocation50_spill] sm:$0xff] }
  0xb4   : > { %4798 = vmatprep.mubr.f32.mxu0 %v5572_v29  ;;  %4901 = vmatprep.mubr.f32.mxu1 %v7657_v32  ;;  %v7663_v29 = vand.u32 4294901760, %v5650_v20  ;;  %v7692_v32 = vand.u32 4294901760, %v7691_v7 }
  0xb7   : > { %4799 = vmatmul.mubr.f32.gmra.mxu0 %v5575_v36  ;;  %4902 = vmatmul.mubr.f32.gmra.mxu1 %v7658_v41  ;;  %v7664_v36 = vand.u32 4294901760, %v5662_v63 }
  0xb8   : > { %4801 = vmatprep.mubr.f32.mxu0 %v5578_v37  ;;  %4904 = vmatprep.mubr.f32.mxu1 %v7659_v42  ;;  %v7665_v37 = vand.u32 4294901760, %v5668_v57 }
  0xbb   : > { %4802 = vmatmul.mubr.f32.gmra.mxu0 %v5586_v47  ;;  %4905 = vmatmul.mubr.f32.gmra.mxu1 %v7660_v43  ;;  %v7666_v47 = vand.u32 4294901760, %v5694_v15 }
  0xbc   : > { %4804 = vmatprep.mubr.f32.mxu0 %v5596_v58  ;;  %4907 = vmatprep.mubr.f32.mxu1 %v7661_v52  ;;  %v7667_v58 = vand.u32 4294901760, %v5699_v12 }
  0xbf   : > { %4805 = vmatmul.mubr.f32.gmra.mxu0 %v5619_v13  ;;  %4908 = vmatmul.mubr.f32.gmra.mxu1 %v7662_v53  ;;  %v7668_v13 = vand.u32 4294901760, %v5705_v6 }
  0xc0   : > { %4807 = vmatprep.mubr.f32.mxu0 %v5626_v14  ;;  %4910 = vmatprep.mubr.f32.mxu1 %v7663_v29  ;;  %v7669_v14 = vand.u32 4294901760, %v5724_v28 }
  0xc3   : > { %4808 = vmatmul.mubr.f32.gmra.mxu0 %v5634_v48  ;;  %4911 = vmatmul.mubr.f32.gmra.mxu1 %v7664_v36  ;;  %v7671_v48 = vand.u32 4294901760, %v5734_v38  ;;  %v7693_v36 = vld [vmem:[#allocation52_spill] sm:$0xff] }
  0xc4   : > { %4810 = vmatprep.mubr.f32.mxu0 %v5650_v20  ;;  %4913 = vmatprep.mubr.f32.mxu1 %v7665_v37  ;;  %v7672_v20 = vand.u32 4294901760, %v5764_v55  ;;  %v7694_v37 = vand.u32 4294901760, %v7693_v36 }
  0xc7   : > { %4811 = vmatmul.mubr.f32.gmra.mxu0 %v5662_v63  ;;  %4914 = vmatmul.mubr.f32.gmra.mxu1 %v7666_v47  ;;  %v7670_v63 = vand.u32 4294901760, %v5731_v51 }
  0xc8   : > { %4813 = vmatprep.mubr.f32.mxu0 %v5668_v57  ;;  %4916 = vmatprep.mubr.f32.mxu1 %v7667_v58 }
  0xcb   : > { %4814 = vmatmul.mubr.f32.gmra.mxu0 %v5694_v15  ;;  %4917 = vmatmul.mubr.f32.gmra.mxu1 %v7668_v13  ;;  %v7677_v15 = vld [vmem:[#allocation36_spill] sm:$0xff]  ;;  %v7695_v13 = vld [vmem:[#allocation54_spill] sm:$0xff] }
  0xcc   : > { %4816 = vmatprep.mubr.f32.mxu0 %v5699_v12  ;;  %4919 = vmatprep.mubr.f32.mxu1 %v7669_v14  ;;  %v7673_v12 = vand.u32 4294901760, %v5767_v46  ;;  %v7696_v14 = vand.u32 4294901760, %v7695_v13 }
  0xcf   : > { %4817 = vmatmul.mubr.f32.gmra.mxu0 %v5705_v6  ;;  %4920 = vmatmul.mubr.f32.gmra.mxu1 %v7670_v63  ;;  %v7674_v6 = vand.u32 4294901760, %v5787_v62 }
  0xd0   : > { %4819 = vmatprep.mubr.f32.mxu0 %v5724_v28  ;;  %4922 = vmatprep.mubr.f32.mxu1 %v7671_v48  ;;  %v7675_v28 = vld [vmem:[#allocation34_spill] sm:$0xff] }
  0xd1   : > { %v7676_v57 = vand.u32 4294901760, %v7675_v28 }
  0xd3   : > { %4820 = vmatmul.mubr.f32.gmra.mxu0 %v5731_v51  ;;  %4923 = vmatmul.mubr.f32.gmra.mxu1 %v7672_v20  ;;  %v7678_v51 = vand.u32 4294901760, %v7677_v15 }
  0xd4   : > { %4822 = vmatprep.mubr.f32.mxu0 %v5734_v38  ;;  %4925 = vmatprep.mubr.f32.mxu1 %v7673_v12  ;;  %v7679_v38 = vld [vmem:[#allocation39_spill] sm:$0xff] }
  0xd5   : > { %v7680_v26 = vand.u32 4294901760, %v7679_v38 }
  0xd7   : > { %4823 = vmatmul.mubr.f32.gmra.mxu0 %v5764_v55  ;;  %4926 = vmatmul.mubr.f32.gmra.mxu1 %v7674_v6  ;;  %v7681_v55 = vld [vmem:[#allocation40_spill] sm:$0xff] }
  0xd8   : > { %4825 = vmatprep.mubr.f32.mxu0 %v5767_v46  ;;  %4928 = vmatprep.mubr.f32.mxu1 %v7676_v57  ;;  %v7682_v0 = vand.u32 4294901760, %v7681_v55  ;;  %v7683_v46 = vld [vmem:[#allocation41_spill] sm:$0xff]  ;;  %v7697_v57 = vld [vmem:[#allocation56_spill] sm:$0xff] }
  0xd9   : > { %v7684_v39 = vand.u32 4294901760, %v7683_v46 }
  0xdb   : > { %4826 = vmatmul.mubr.f32.gmra.mxu0 %v5787_v62  ;;  %4929 = vmatmul.mubr.f32.gmra.mxu1 %v7678_v51 }
  0xdc   : > { %4828 = vmatprep.mubr.f32.mxu0 %v7675_v28  ;;  %4931 = vmatprep.mubr.f32.mxu1 %v7680_v26  ;;  %v7699_v26 = vld [vmem:[#allocation59_spill] sm:$0xff] }
  0xdf   : > { %4829 = vmatmul.mubr.f32.gmra.mxu0 %v7677_v15  ;;  %4932 = vmatmul.mubr.f32.gmra.mxu1 %v7682_v0  ;;  %v7698_v15 = vand.u32 4294901760, %v7697_v57 }
  0xe0   : > { %4831 = vmatprep.mubr.f32.mxu0 %v7679_v38  ;;  %4934 = vmatprep.mubr.f32.mxu1 %v7684_v39 }
  0xe2   : > { %v4688_v62 = vpop.f32.mrf.mxu1 }
  0xe3   : > { %4832 = vmatmul.mubr.f32.gmra.mxu0 %v7681_v55  ;;  %4935 = vmatmul.mubr.f32.gmra.mxu1 %v7686_v25  ;;  %v7700_v55 = vand.u32 4294901760, %v7699_v26 }
  0xe4   : > { %4834 = vmatprep.mubr.f32.mxu0 %v7683_v46  ;;  %4937 = vmatprep.mubr.f32.mxu1 %v7688_v19  ;;  %v1242_v33 = vpop.f32.mrf.mxu1 }
  0xe6   : > { %v4588_v30 = vpop.f32.mrf.mxu0  ;;  %v4691_v3 = vpop.f32.mrf.mxu1 }
  0xe7   : > { %4835 = vmatmul.mubr.f32.gmra.mxu0 %v7685_v49  ;;  %4938 = vmatmul.mubr.f32.gmra.mxu1 %v7690_v8  ;;  %v542_v31 = vadd.f32 %v4588_v30, %v6337_v35 }
  0xe8   : > { %4837 = vmatprep.mubr.f32.mxu0 %v7687_v54  ;;  %4940 = vmatprep.mubr.f32.mxu1 %v7692_v32  ;;  %v531_v41 = vpop.f32.mrf.mxu0  ;;  %v1254_v42 = vpop.f32.mrf.mxu1  ;;  %v7701_v54 = vld [vmem:[#allocation61_spill] sm:$0xff] }
  0xe9   : > { %v6346_v43 = vadd.f32 %v4688_v62, %v542_v31  ;;  %v532_v52 = vadd.f32 %v531_v41, %v6337_v35  ;;  %v7702_v19 = vand.u32 4294901760, %v7701_v54 }
  0xea   : > { %v4591_v53 = vpop.f32.mrf.mxu0 }
  0xeb   : > { %4838 = vmatmul.mubr.f32.gmra.mxu0 %v7689_v4  ;;  %v4694_v29 = vpop.f32.mrf.mxu1  ;;  %4941 = vmatmul.mubr.f32.gmra.mxu1 %v7694_v37  ;;  %v6352_v47 = vadd.f32 %v1242_v33, %v532_v52  ;;  %v562_v58 = vadd.f32 %v4591_v53, %v6337_v35  ;;  %v7705_v52 = vld [vmem:[#allocation64_spill] sm:$0xff]  ;;  %v7707_v37 = vld [vmem:[#allocation67_spill] sm:$0xff] }
  0xec   : > { %4840 = vmatprep.mubr.f32.mxu0 %v7691_v7  ;;  %4943 = vmatprep.mubr.f32.mxu1 %v7696_v14  ;;  %v551_v63 = vpop.f32.mrf.mxu0  ;;  %v7706_v53 = vand.u32 4294901760, %v7705_v52 }
  0xed   : > { %v1266_v48 = vpop.f32.mrf.mxu1  ;;  %v6358_v20 = vadd.f32 %v4691_v3, %v562_v58  ;;  %v552_v12 = vadd.f32 %v551_v63, %v6337_v35  ;;  %v7703_v3 = vld [vmem:[#allocation62_spill] sm:$0xff]  ;;  %v7708_v58 = vand.u32 4294901760, %v7707_v37 }
  0xee   : > { %v4594_v6 = vpop.f32.mrf.mxu0  ;;  %v7704_v4 = vand.u32 4294901760, %v7703_v3 }
  0xef   : > { %4841 = vmatmul.mubr.f32.gmra.mxu0 %v7693_v36  ;;  %v4697_v28 = vpop.f32.mrf.mxu1  ;;  %4944 = vmatmul.mubr.f32.gmra.mxu1 %v7698_v15  ;;  %v6364_v51 = vadd.f32 %v1254_v42, %v552_v12  ;;  %v582_v38 = vadd.f32 %v4594_v6, %v6337_v35 }
  0xf0   : > { %4843 = vmatprep.mubr.f32.mxu0 %v7695_v13  ;;  %4946 = vmatprep.mubr.f32.mxu1 %v7700_v55  ;;  %v571_v0 = vpop.f32.mrf.mxu0 }
  0xf1   : > { %v1278_v46 = vpop.f32.mrf.mxu1  ;;  %v6370_v39 = vadd.f32 %v4694_v29, %v582_v38  ;;  %v572_v62 = vadd.f32 %v571_v0, %v6337_v35 }
  0xf2   : > { %v4597_v49 = vpop.f32.mrf.mxu0 }
  0xf3   : > { %4844 = vmatmul.mubr.f32.gmra.mxu0 %v7697_v57  ;;  %v4700_v25 = vpop.f32.mrf.mxu1  ;;  %4947 = vmatmul.mubr.f32.gmra.mxu1 %v7702_v19  ;;  %v6376_v33 = vadd.f32 %v1266_v48, %v572_v62  ;;  %v602_v30 = vadd.f32 %v4597_v49, %v6337_v35  ;;  %v7713_v19 = vld [vmem:[#allocation72_spill] sm:$0xff] }
  0xf4   : > { %4846 = vmatprep.mubr.f32.mxu0 %v7699_v26  ;;  %4949 = vmatprep.mubr.f32.mxu1 %v7704_v4  ;;  %v591_v8 = vpop.f32.mrf.mxu0  ;;  %v7711_v26 = vld [vmem:[#allocation69_spill] sm:$0xff] }
  0xf5   : > { %v1290_v31 = vpop.f32.mrf.mxu1  ;;  %v6382_v7 = vadd.f32 %v4697_v28, %v602_v30  ;;  %v592_v32 = vadd.f32 %v591_v8, %v6337_v35  ;;  %v7709_v28 = vld [vmem:[#allocation68_spill] sm:$0xff]  ;;  %v7712_v55 = vand.u32 4294901760, %v7711_v26  ;;  %v7714_v30 = vand.u32 4294901760, %v7713_v19  ;;  %v7715_v8 = vld [vmem:[#allocation74_spill] sm:$0xff] }
  0xf6   : > { %v4600_v41 = vpop.f32.mrf.mxu0  ;;  %v7710_v57 = vand.u32 4294901760, %v7709_v28 }
  0xf7   : > { %4847 = vmatmul.mubr.f32.gmra.mxu0 %v7701_v54  ;;  %v4703_v42 = vpop.f32.mrf.mxu1  ;;  %4950 = vmatmul.mubr.f32.gmra.mxu1 %v7706_v53  ;;  %v6388_v29 = vadd.f32 %v1278_v46, %v592_v32  ;;  %v622_v36 = vadd.f32 %v4600_v41, %v6337_v35 }
  0xf8   : > { %4849 = vmatprep.mubr.f32.mxu0 %v7703_v3  ;;  %4952 = vmatprep.mubr.f32.mxu1 %v7708_v58  ;;  %v611_v13 = vpop.f32.mrf.mxu0 }
  0xf9   : > { %v1302_v14 = vpop.f32.mrf.mxu1  ;;  %v6394_v63 = vadd.f32 %v4700_v25, %v622_v36  ;;  %v612_v48 = vadd.f32 %v611_v13, %v6337_v35 }
  0xfa   : > { %v4603_v12 = vpop.f32.mrf.mxu0 }
  0xfb   : > { %4850 = vmatmul.mubr.f32.gmra.mxu0 %v7705_v52  ;;  %v4706_v6 = vpop.f32.mrf.mxu1  ;;  %4953 = vmatmul.mubr.f32.gmra.mxu1 %v7710_v57  ;;  %v6400_v15 = vadd.f32 %v1290_v31, %v612_v48  ;;  %v642_v38 = vadd.f32 %v4603_v12, %v6337_v35  ;;  %v7716_v31 = vand.u32 4294901760, %v7715_v8 }
  0xfc   : > { %4852 = vmatprep.mubr.f32.mxu0 %v7707_v37  ;;  %4955 = vmatprep.mubr.f32.mxu1 %v7712_v55  ;;  %v631_v0 = vpop.f32.mrf.mxu0  ;;  %v7717_v37 = vand.u32 4294901760, %v6051_v60  ;;  %v7720_v55 = vld [vmem:[#allocation79_spill] sm:$0xff] }
  0xfd   : > { %v1314_v46 = vpop.f32.mrf.mxu1  ;;  %v6406_v62 = vadd.f32 %v4703_v42, %v642_v38  ;;  %v632_v49 = vadd.f32 %v631_v0, %v6337_v35  ;;  %v7721_v0 = vand.u32 4294901760, %v7720_v55 }
  0xfe   : > { %v4606_v25 = vpop.f32.mrf.mxu0 }
  0xff   : > { %4853 = vmatmul.mubr.f32.gmra.mxu0 %v7709_v28  ;;  %v4709_v54 = vpop.f32.mrf.mxu1  ;;  %4956 = vmatmul.mubr.f32.gmra.mxu1 %v7714_v30  ;;  %v6412_v3 = vadd.f32 %v1302_v14, %v632_v49  ;;  %v662_v4 = vadd.f32 %v4606_v25, %v6337_v35  ;;  %v7718_v14 = vld [vmem:[#allocation77_spill] sm:$0xff]  ;;  %v7722_v25 = vld [vmem:[#allocation80_spill] sm:$0xff] }
 0x100   : > { %4855 = vmatprep.mubr.f32.mxu0 %v7711_v26  ;;  %4958 = vmatprep.mubr.f32.mxu1 %v7716_v31  ;;  %v651_v32 = vpop.f32.mrf.mxu0  ;;  %v7719_v48 = vand.u32 4294901760, %v7718_v14 }
 0x101   : > { %v1326_v41 = vpop.f32.mrf.mxu1  ;;  %v6418_v42 = vadd.f32 %v4706_v6, %v662_v4  ;;  %v652_v52 = vadd.f32 %v651_v32, %v6337_v35  ;;  %v7724_v32 = vld [vmem:[#allocation81_spill] sm:$0xff] }
 0x102   : > { %v4609_v53 = vpop.f32.mrf.mxu0 }
 0x103   : > { %4856 = vmatmul.mubr.f32.gmra.mxu0 %v7713_v19  ;;  %v4712_v36 = vpop.f32.mrf.mxu1  ;;  %4959 = vmatmul.mubr.f32.gmra.mxu1 %v7717_v37  ;;  %v6424_v58 = vadd.f32 %v1314_v46, %v652_v52  ;;  %v682_v13 = vadd.f32 %v4609_v53, %v6337_v35  ;;  %v7723_v19 = vand.u32 4294901760, %v7722_v25  ;;  %v7726_v37 = vld [vmem:[#allocation82_spill] sm:$0xff] }
 0x104   : > { %4858 = vmatprep.mubr.f32.mxu0 %v7715_v8  ;;  %4961 = vmatprep.mubr.f32.mxu1 %v7719_v48  ;;  %v671_v12 = vpop.f32.mrf.mxu0 }
 0x105   : > { %v1338_v6 = vpop.f32.mrf.mxu1  ;;  %v6430_v28 = vadd.f32 %v4709_v54, %v682_v13  ;;  %v672_v57 = vadd.f32 %v671_v12, %v6337_v35  ;;  %v7727_v13 = vand.u32 4294901760, %v7726_v37 }
 0x106   : > { %v4612_v38 = vpop.f32.mrf.mxu0 }
 0x107   : > { %4859 = vmatmul.mubr.f32.gmra.mxu0 %v6051_v60  ;;  %v4715_v26 = vpop.f32.mrf.mxu1  ;;  %4962 = vmatmul.mubr.f32.gmra.mxu1 %v7721_v0  ;;  %v6436_v46 = vadd.f32 %v1326_v41, %v672_v57  ;;  %v702_v49 = vadd.f32 %v4612_v38, %v6337_v35  ;;  %v7725_v41 = vand.u32 4294901760, %v7724_v32 }
 0x108   : > { %4861 = vmatprep.mubr.f32.mxu0 %v7718_v14  ;;  %4964 = vmatprep.mubr.f32.mxu1 %v7723_v19  ;;  %v691_v54 = vpop.f32.mrf.mxu0 }
 0x109   : > { %v1350_v30 = vpop.f32.mrf.mxu1  ;;  %v6442_v4 = vadd.f32 %v4712_v36, %v702_v49  ;;  %v692_v8 = vadd.f32 %v691_v54, %v6337_v35  ;;  %v7729_v49 = vand.u32 4294901760, %v6124_v44 }
 0x10a   : > { %v4615_v60 = vpop.f32.mrf.mxu0 }
 0x10b   : > { %4862 = vmatmul.mubr.f32.gmra.mxu0 %v7720_v55  ;;  %v4718_v31 = vpop.f32.mrf.mxu1  ;;  %4965 = vmatmul.mubr.f32.gmra.mxu1 %v7725_v41  ;;  %v6448_v52 = vadd.f32 %v1338_v6, %v692_v8  ;;  %v722_v53 = vadd.f32 %v4615_v60, %v6337_v35  ;;  %v7728_v6 = vand.u32 4294901760, %v6116_v18 }
 0x10c   : > { %4864 = vmatprep.mubr.f32.mxu0 %v7722_v25  ;;  %4967 = vmatprep.mubr.f32.mxu1 %v7727_v13  ;;  %v711_v36 = vpop.f32.mrf.mxu0 }
 0x10d   : > { %v1362_v14 = vpop.f32.mrf.mxu1  ;;  %v6454_v48 = vadd.f32 %v4715_v26, %v722_v53  ;;  %v712_v12 = vadd.f32 %v711_v36, %v6337_v35  ;;  %v7731_v53 = vand.u32 4294901760, %v6154_v1 }
 0x10e   : > { %v4618_v57 = vpop.f32.mrf.mxu0 }
 0x10f   : > { %4865 = vmatmul.mubr.f32.gmra.mxu0 %v7724_v32  ;;  %v4721_v38 = vpop.f32.mrf.mxu1  ;;  %4968 = vmatmul.mubr.f32.gmra.mxu1 %v7728_v6  ;;  %v6460_v55 = vadd.f32 %v1350_v30, %v712_v12  ;;  %v742_v0 = vadd.f32 %v4618_v57, %v6337_v35  ;;  %v7730_v30 = vand.u32 4294901760, %v6148_v21  ;;  %v7733_v6 = vand.u32 4294901760, %v6177_v9 }
 0x110   : > { %4867 = vmatprep.mubr.f32.mxu0 %v7726_v37  ;;  %4970 = vmatprep.mubr.f32.mxu1 %v7729_v49  ;;  %v731_v26 = vpop.f32.mrf.mxu0 }
 0x111   : > { %v1374_v25 = vpop.f32.mrf.mxu1  ;;  %v6466_v19 = vadd.f32 %v4718_v31, %v742_v0  ;;  %v732_v54 = vadd.f32 %v731_v26, %v6337_v35 }
 0x112   : > { %v4621_v8 = vpop.f32.mrf.mxu0 }
 0x113   : > { %4868 = vmatmul.mubr.f32.gmra.mxu0 %v6116_v18  ;;  %v4724_v60 = vpop.f32.mrf.mxu1  ;;  %4971 = vmatmul.mubr.f32.gmra.mxu1 %v7730_v30  ;;  %v6472_v32 = vadd.f32 %v1362_v14, %v732_v54  ;;  %v762_v41 = vadd.f32 %v4621_v8, %v6337_v35  ;;  %v7732_v14 = vand.u32 4294901760, %v6170_v10 }
 0x114   : > { %4870 = vmatprep.mubr.f32.mxu0 %v6124_v44  ;;  %4973 = vmatprep.mubr.f32.mxu1 %v7731_v53  ;;  %v751_v31 = vpop.f32.mrf.mxu0 }
 0x115   : > { %v1386_v37 = vpop.f32.mrf.mxu1  ;;  %v6478_v13 = vadd.f32 %v4721_v38, %v762_v41  ;;  %v752_v36 = vadd.f32 %v751_v31, %v6337_v35 }
 0x116   : > { %v4624_v18 = vpop.f32.mrf.mxu0 }
 0x117   : > { %4871 = vmatmul.mubr.f32.gmra.mxu0 %v6148_v21  ;;  %v4727_v12 = vpop.f32.mrf.mxu1  ;;  %4974 = vmatmul.mubr.f32.gmra.mxu1 %v7732_v14  ;;  %v6484_v57 = vadd.f32 %v1374_v25, %v752_v36  ;;  %v782_v44 = vadd.f32 %v4624_v18, %v6337_v35  ;;  %v7735_v14 = vld [vmem:[#allocation5_spill] sm:$0xff] }
 0x118   : > { %4873 = vmatprep.mubr.f32.mxu0 %v6154_v1  ;;  %4976 = vmatprep.mubr.f32.mxu1 %v7733_v6  ;;  %v771_v38 = vpop.f32.mrf.mxu0 }
 0x119   : > { %v1398_v0 = vpop.f32.mrf.mxu1  ;;  %v6490_v49 = vadd.f32 %v4724_v60, %v782_v44  ;;  %v772_v26 = vadd.f32 %v771_v38, %v6337_v35 }
 0x11a   : > { %v4627_v21 = vpop.f32.mrf.mxu0 }
 0x11b   : > { %4874 = vmatmul.mubr.f32.gmra.mxu0 %v6170_v10  ;;  %v4730_v54 = vpop.f32.mrf.mxu1  ;;  %4977 = vmatmul.mubr.f32.gmra.mxu1 %v1137_v45  ;;  %v6496_v25 = vadd.f32 %v1386_v37, %v772_v26  ;;  %v802_v1 = vadd.f32 %v4627_v21, %v6337_v35 }
 0x11c   : > { %4876 = vmatprep.mubr.f32.mxu0 %v6177_v9  ;;  %4979 = vmatprep.mubr.f32.mxu1 %v1147_v5  ;;  %v791_v8 = vpop.f32.mrf.mxu0  ;;  %v7734_v5 = vld [vmem:[#allocation4_spill] sm:$0xff] }
 0x11d   : > { %v1410_v60 = vpop.f32.mrf.mxu1  ;;  %v6502_v30 = vadd.f32 %v4727_v12, %v802_v1  ;;  %v792_v41 = vadd.f32 %v791_v8, %v6337_v35 }
 0x11e   : > { %v4630_v10 = vpop.f32.mrf.mxu0 }
 0x11f   : > { %4877 = vmatmul.mubr.f32.gmra.mxu0 %v6188_v34  ;;  %v4733_v53 = vpop.f32.mrf.mxu1  ;;  %4980 = vmatmul.mubr.f32.gmra.mxu1 %v1157_v22  ;;  %v6508_v45 = vadd.f32 %v1398_v0, %v792_v41  ;;  %v822_v9 = vadd.f32 %v4630_v10, %v6337_v35 }
 0x120   : > { %4879 = vmatprep.mubr.f32.mxu0 %v6198_v27  ;;  %5086 = vmatprep.mubr.f32.mxu1 %v7734_v5  ;;  %v811_v31 = vpop.f32.mrf.mxu0  ;;  %v7736_v27 = vld [vmem:[#allocation6_spill] sm:$0xff] }
 0x121   : > { %v1422_v37 = vpop.f32.mrf.mxu1  ;;  %v6513_v36 = vadd.f32 %v4730_v54, %v822_v9  ;;  %v812_v18 = vadd.f32 %v811_v31, %v6337_v35  ;;  %v7737_v54 = vld [vmem:[#allocation7_spill] sm:$0xff] }
 0x122   : > { %v4633_v12 = vpop.f32.mrf.mxu0 }
 0x123   : > { %4880 = vmatmul.mubr.f32.gmra.mxu0 %v6206_v61  ;;  %v4736_v34 = vpop.f32.mrf.mxu1  ;;  %5087 = vmatmul.mubr.f32.vlgmr.msra.gmra.mxu1 %v7735_v14  ;;  %v6518_v22 = vadd.f32 %v1410_v60, %v812_v18  ;;  %v842_v44 = vadd.f32 %v4633_v12, %v6337_v35  ;;  %v7738_v60 = vld [vmem:[#allocation8_spill] sm:$0xff]  ;;  %v7739_v18 = vld [vmem:[#allocation9_spill] sm:$0xff] }
 0x124   : > { %4986 = vmatprep.mubr.f32.mxu0 %v7734_v5  ;;  %5089 = vmatprep.mubr.f32.mxu1 %v7736_v27  ;;  %v831_v6 = vpop.f32.mrf.mxu0 }
 0x125   : > { %v1434_v38 = vpop.f32.mrf.mxu1  ;;  %v6523_v0 = vadd.f32 %v4733_v53, %v842_v44  ;;  %v832_v26 = vadd.f32 %v831_v6, %v6337_v35 }
 0x126   : > { %v4636_v21 = vpop.f32.mrf.mxu0 }
 0x127   : > { %4987 = vmatmul.mubr.f32.vlgmr.msra.gmra.mxu0 %v7735_v14  ;;  %v4739_v61 = vpop.f32.mrf.mxu1  ;;  %5090 = vmatmul.mubr.f32.gmra.mxu1 %v7737_v54  ;;  %v6528_v1 = vadd.f32 %v1422_v37, %v832_v26  ;;  %v862_v8 = vadd.f32 %v4636_v21, %v6337_v35  ;;  %v7740_v14 = vld [vmem:[#allocation10_spill] sm:$0xff] }
 0x128   : > { %4989 = vmatprep.mubr.f32.mxu0 %v7736_v27  ;;  %5092 = vmatprep.mubr.f32.mxu1 %v7738_v60  ;;  %v851_v41 = vpop.f32.mrf.mxu0 }
 0x129   : > { %v1446_v10 = vpop.f32.mrf.mxu1  ;;  %v6533_v53 = vadd.f32 %v4736_v34, %v862_v8  ;;  %v852_v9 = vadd.f32 %v851_v41, %v6337_v35 }
 0x12a   : > { %v4639_v5 = vpop.f32.mrf.mxu0 }
 0x12b   : > { %4990 = vmatmul.mubr.f32.gmra.mxu0 %v7737_v54  ;;  %v4742_v31 = vpop.f32.mrf.mxu1  ;;  %5093 = vmatmul.mubr.f32.gmra.mxu1 %v7739_v18  ;;  %v6538_v37 = vadd.f32 %v1434_v38, %v852_v9  ;;  %v882_v12 = vadd.f32 %v4639_v5, %v6337_v35  ;;  %v7741_v54 = vld [vmem:[#allocation11_spill] sm:$0xff] }
 0x12c   : > { %4992 = vmatprep.mubr.f32.mxu0 %v7738_v60  ;;  %5095 = vmatprep.mubr.f32.mxu1 %v7740_v14  ;;  %v871_v44 = vpop.f32.mrf.mxu0  ;;  %v7743_v60 = vld [vmem:[#allocation12_spill] sm:$0xff] }
 0x12d   : > { %v1458_v27 = vpop.f32.mrf.mxu1  ;;  %v6543_v34 = vadd.f32 %v4739_v61, %v882_v12  ;;  %v872_v6 = vadd.f32 %v871_v44, %v6337_v35  ;;  %v7745_v44 = vld [vmem:[#allocation13_spill] sm:$0xff] }
 0x12e   : > { %v4642_v26 = vpop.f32.mrf.mxu0 }
 0x12f   : > { %4993 = vmatmul.mubr.f32.gmra.mxu0 %v7739_v18  ;;  %v4745_v21 = vpop.f32.mrf.mxu1  ;;  %5096 = vmatmul.mubr.f32.gmra.mxu1 %v7741_v54  ;;  %v6548_v38 = vadd.f32 %v1446_v10, %v872_v6  ;;  %v902_v8 = vadd.f32 %v4642_v26, %v6337_v35 }
 0x130   : > { %4995 = vmatprep.mubr.f32.mxu0 %v7740_v14  ;;  %5098 = vmatprep.mubr.f32.mxu1 %v7743_v60  ;;  %v891_v41 = vpop.f32.mrf.mxu0  ;;  %v7747_v14 = vld [vmem:[#allocation14_spill] sm:$0xff] }
 0x131   : > { %7742 = vst [vmem:[#allocation34_spill] sm:$0xff] %v6548_v38  ;;  %v1470_v9 = vpop.f32.mrf.mxu1  ;;  %v6553_v61 = vadd.f32 %v4742_v31, %v902_v8  ;;  %v892_v5 = vadd.f32 %v891_v41, %v6337_v35 }
 0x132   : > { %v4645_v12 = vpop.f32.mrf.mxu0 }
 0x133   : > { %7744 = vst [vmem:[#allocation36_spill] sm:$0xff] %v6553_v61  ;;  %4996 = vmatmul.mubr.f32.gmra.mxu0 %v7741_v54  ;;  %v4748_v18 = vpop.f32.mrf.mxu1  ;;  %5099 = vmatmul.mubr.f32.gmra.mxu1 %v7745_v44  ;;  %v6558_v10 = vadd.f32 %v1458_v27, %v892_v5  ;;  %v922_v6 = vadd.f32 %v4645_v12, %v6337_v35  ;;  %v7749_v61 = vld [vmem:[#allocation15_spill] sm:$0xff] }
 0x134   : > { %4998 = vmatprep.mubr.f32.mxu0 %v7743_v60  ;;  %5101 = vmatprep.mubr.f32.mxu1 %v7747_v14  ;;  %v911_v26 = vpop.f32.mrf.mxu0  ;;  %v7751_v60 = vld [vmem:[#allocation16_spill] sm:$0xff] }
 0x135   : > { %7746 = vst [vmem:[#allocation39_spill] sm:$0xff] %v6558_v10  ;;  %v1482_v38 = vpop.f32.mrf.mxu1  ;;  %v6563_v31 = vadd.f32 %v4745_v21, %v922_v6  ;;  %v912_v8 = vadd.f32 %v911_v26, %v6337_v35 }
 0x136   : > { %v4648_v41 = vpop.f32.mrf.mxu0 }
 0x137   : > { %7748 = vst [vmem:[#allocation40_spill] sm:$0xff] %v6563_v31  ;;  %4999 = vmatmul.mubr.f32.gmra.mxu0 %v7745_v44  ;;  %v4751_v54 = vpop.f32.mrf.mxu1  ;;  %5102 = vmatmul.mubr.f32.gmra.mxu1 %v7749_v61  ;;  %v6568_v27 = vadd.f32 %v1470_v9, %v912_v8  ;;  %v942_v5 = vadd.f32 %v4648_v41, %v6337_v35  ;;  %v7753_v31 = vld [vmem:[#allocation17_spill] sm:$0xff] }
 0x138   : > { %5001 = vmatprep.mubr.f32.mxu0 %v7747_v14  ;;  %5104 = vmatprep.mubr.f32.mxu1 %v7751_v60  ;;  %v931_v12 = vpop.f32.mrf.mxu0  ;;  %v7755_v14 = vld [vmem:[#allocation18_spill] sm:$0xff] }
 0x139   : > { %7750 = vst [vmem:[#allocation41_spill] sm:$0xff] %v6568_v27  ;;  %v1494_v10 = vpop.f32.mrf.mxu1  ;;  %v6573_v21 = vadd.f32 %v4748_v18, %v942_v5  ;;  %v932_v6 = vadd.f32 %v931_v12, %v6337_v35 }
 0x13a   : > { %v4651_v26 = vpop.f32.mrf.mxu0 }
 0x13b   : > { %7752 = vst [vmem:[#allocation45_spill] sm:$0xff] %v6573_v21  ;;  %5002 = vmatmul.mubr.f32.gmra.mxu0 %v7749_v61  ;;  %v4754_v44 = vpop.f32.mrf.mxu1  ;;  %5105 = vmatmul.mubr.f32.gmra.mxu1 %v7753_v31  ;;  %v6578_v9 = vadd.f32 %v1482_v38, %v932_v6  ;;  %v962_v8 = vadd.f32 %v4651_v26, %v6337_v35  ;;  %v7757_v21 = vld [vmem:[#allocation19_spill] sm:$0xff] }
 0x13c   : > { %5004 = vmatprep.mubr.f32.mxu0 %v7751_v60  ;;  %5107 = vmatprep.mubr.f32.mxu1 %v7755_v14  ;;  %v951_v41 = vpop.f32.mrf.mxu0  ;;  %v7759_v60 = vld [vmem:[#allocation20_spill] sm:$0xff] }
 0x13d   : > { %7754 = vst [vmem:[#allocation46_spill] sm:$0xff] %v6578_v9  ;;  %v1506_v27 = vpop.f32.mrf.mxu1  ;;  %v6583_v18 = vadd.f32 %v4751_v54, %v962_v8  ;;  %v952_v5 = vadd.f32 %v951_v41, %v6337_v35 }
 0x13e   : > { %v4654_v12 = vpop.f32.mrf.mxu0 }
 0x13f   : > { %7756 = vst [vmem:[#allocation48_spill] sm:$0xff] %v6583_v18  ;;  %5005 = vmatmul.mubr.f32.gmra.mxu0 %v7753_v31  ;;  %v4757_v61 = vpop.f32.mrf.mxu1  ;;  %5108 = vmatmul.mubr.f32.gmra.mxu1 %v7757_v21  ;;  %v6588_v38 = vadd.f32 %v1494_v10, %v952_v5  ;;  %v982_v6 = vadd.f32 %v4654_v12, %v6337_v35  ;;  %v7761_v18 = vld [vmem:[#allocation21_spill] sm:$0xff] }
 0x140   : > { %5007 = vmatprep.mubr.f32.mxu0 %v7755_v14  ;;  %5110 = vmatprep.mubr.f32.mxu1 %v7759_v60  ;;  %v971_v26 = vpop.f32.mrf.mxu0  ;;  %v7763_v14 = vld [vmem:[#allocation22_spill] sm:$0xff] }
 0x141   : > { %7758 = vst [vmem:[#allocation50_spill] sm:$0xff] %v6588_v38  ;;  %v1518_v9 = vpop.f32.mrf.mxu1  ;;  %v6593_v54 = vadd.f32 %v4754_v44, %v982_v6  ;;  %v972_v8 = vadd.f32 %v971_v26, %v6337_v35 }
 0x142   : > { %v4657_v41 = vpop.f32.mrf.mxu0 }
 0x143   : > { %7760 = vst [vmem:[#allocation52_spill] sm:$0xff] %v6593_v54  ;;  %5008 = vmatmul.mubr.f32.gmra.mxu0 %v7757_v21  ;;  %v4760_v31 = vpop.f32.mrf.mxu1  ;;  %5111 = vmatmul.mubr.f32.gmra.mxu1 %v7761_v18  ;;  %v6598_v10 = vadd.f32 %v1506_v27, %v972_v8  ;;  %v1002_v5 = vadd.f32 %v4657_v41, %v6337_v35  ;;  %v7765_v54 = vld [vmem:[#allocation23_spill] sm:$0xff] }
 0x144   : > { %5010 = vmatprep.mubr.f32.mxu0 %v7759_v60  ;;  %5113 = vmatprep.mubr.f32.mxu1 %v7763_v14  ;;  %v991_v12 = vpop.f32.mrf.mxu0  ;;  %v7767_v60 = vld [vmem:[#allocation24_spill] sm:$0xff] }
 0x145   : > { %7762 = vst [vmem:[#allocation54_spill] sm:$0xff] %v6598_v10  ;;  %v1530_v38 = vpop.f32.mrf.mxu1  ;;  %v6603_v44 = vadd.f32 %v4757_v61, %v1002_v5  ;;  %v992_v6 = vadd.f32 %v991_v12, %v6337_v35 }
 0x146   : > { %v4660_v26 = vpop.f32.mrf.mxu0 }
 0x147   : > { %7764 = vst [vmem:[#allocation56_spill] sm:$0xff] %v6603_v44  ;;  %5011 = vmatmul.mubr.f32.gmra.mxu0 %v7761_v18  ;;  %v4763_v21 = vpop.f32.mrf.mxu1  ;;  %5114 = vmatmul.mubr.f32.gmra.mxu1 %v7765_v54  ;;  %v6608_v27 = vadd.f32 %v1518_v9, %v992_v6  ;;  %v1022_v8 = vadd.f32 %v4660_v26, %v6337_v35  ;;  %v7769_v44 = vld [vmem:[#allocation25_spill] sm:$0xff] }
 0x148   : > { %5013 = vmatprep.mubr.f32.mxu0 %v7763_v14  ;;  %5116 = vmatprep.mubr.f32.mxu1 %v7767_v60  ;;  %v1011_v41 = vpop.f32.mrf.mxu0  ;;  %v7771_v14 = vld [vmem:[#allocation26_spill] sm:$0xff] }
 0x149   : > { %7766 = vst [vmem:[#allocation59_spill] sm:$0xff] %v6608_v27  ;;  %v1542_v10 = vpop.f32.mrf.mxu1  ;;  %v6613_v61 = vadd.f32 %v4760_v31, %v1022_v8  ;;  %v1012_v5 = vadd.f32 %v1011_v41, %v6337_v35 }
 0x14a   : > { %v4663_v12 = vpop.f32.mrf.mxu0 }
 0x14b   : > { %7768 = vst [vmem:[#allocation61_spill] sm:$0xff] %v6613_v61  ;;  %5014 = vmatmul.mubr.f32.gmra.mxu0 %v7765_v54  ;;  %v4766_v18 = vpop.f32.mrf.mxu1  ;;  %5117 = vmatmul.mubr.f32.gmra.mxu1 %v7769_v44  ;;  %v6618_v9 = vadd.f32 %v1530_v38, %v1012_v5  ;;  %v1042_v6 = vadd.f32 %v4663_v12, %v6337_v35  ;;  %v7773_v61 = vld [vmem:[#allocation27_spill] sm:$0xff] }
 0x14c   : > { %5016 = vmatprep.mubr.f32.mxu0 %v7767_v60  ;;  %5119 = vmatprep.mubr.f32.mxu1 %v7771_v14  ;;  %v1031_v26 = vpop.f32.mrf.mxu0  ;;  %v7775_v60 = vld [vmem:[#allocation28_spill] sm:$0xff] }
 0x14d   : > { %7770 = vst [vmem:[#allocation62_spill] sm:$0xff] %v6618_v9  ;;  %v1554_v27 = vpop.f32.mrf.mxu1  ;;  %v6623_v31 = vadd.f32 %v4763_v21, %v1042_v6  ;;  %v1032_v8 = vadd.f32 %v1031_v26, %v6337_v35 }
 0x14e   : > { %v4666_v41 = vpop.f32.mrf.mxu0 }
 0x14f   : > { %7772 = vst [vmem:[#allocation64_spill] sm:$0xff] %v6623_v31  ;;  %5017 = vmatmul.mubr.f32.gmra.mxu0 %v7769_v44  ;;  %v4769_v54 = vpop.f32.mrf.mxu1  ;;  %5120 = vmatmul.mubr.f32.gmra.mxu1 %v7773_v61  ;;  %v6628_v38 = vadd.f32 %v1542_v10, %v1032_v8  ;;  %v1062_v5 = vadd.f32 %v4666_v41, %v6337_v35  ;;  %v7777_v31 = vld [vmem:[#allocation29_spill] sm:$0xff] }
 0x150   : > { %5019 = vmatprep.mubr.f32.mxu0 %v7771_v14  ;;  %5122 = vmatprep.mubr.f32.mxu1 %v7775_v60  ;;  %v1051_v12 = vpop.f32.mrf.mxu0  ;;  %v7779_v14 = vld [vmem:[#allocation30_spill] sm:$0xff] }
 0x151   : > { %7774 = vst [vmem:[#allocation67_spill] sm:$0xff] %v6628_v38  ;;  %v1566_v9 = vpop.f32.mrf.mxu1  ;;  %v6633_v21 = vadd.f32 %v4766_v18, %v1062_v5  ;;  %v1052_v6 = vadd.f32 %v1051_v12, %v6337_v35 }
 0x152   : > { %v4669_v26 = vpop.f32.mrf.mxu0 }
 0x153   : > { %7776 = vst [vmem:[#allocation68_spill] sm:$0xff] %v6633_v21  ;;  %5020 = vmatmul.mubr.f32.gmra.mxu0 %v7773_v61  ;;  %v4772_v44 = vpop.f32.mrf.mxu1  ;;  %5123 = vmatmul.mubr.f32.gmra.mxu1 %v7777_v31  ;;  %v6638_v10 = vadd.f32 %v1554_v27, %v1052_v6  ;;  %v1082_v8 = vadd.f32 %v4669_v26, %v6337_v35  ;;  %v7781_v21 = vld [vmem:[#allocation31_spill] sm:$0xff] }
 0x154   : > { %5022 = vmatprep.mubr.f32.mxu0 %v7775_v60  ;;  %5125 = vmatprep.mubr.f32.mxu1 %v7779_v14  ;;  %v1071_v41 = vpop.f32.mrf.mxu0  ;;  %v7783_v60 = vld [vmem:[#allocation32_spill] sm:$0xff] }
 0x155   : > { %7778 = vst [vmem:[#allocation69_spill] sm:$0xff] %v6638_v10  ;;  %v1578_v38 = vpop.f32.mrf.mxu1  ;;  %v6643_v18 = vadd.f32 %v4769_v54, %v1082_v8  ;;  %v1072_v5 = vadd.f32 %v1071_v41, %v6337_v35 }
 0x156   : > { %v4672_v12 = vpop.f32.mrf.mxu0 }
 0x157   : > { %7780 = vst [vmem:[#allocation72_spill] sm:$0xff] %v6643_v18  ;;  %5023 = vmatmul.mubr.f32.gmra.mxu0 %v7777_v31  ;;  %v4775_v61 = vpop.f32.mrf.mxu1  ;;  %5126 = vmatmul.mubr.f32.gmra.mxu1 %v7781_v21  ;;  %v6648_v27 = vadd.f32 %v1566_v9, %v1072_v5  ;;  %v1102_v6 = vadd.f32 %v4672_v12, %v6337_v35  ;;  %v7785_v18 = vld [vmem:[#allocation33_spill] sm:$0xff] }
 0x158   : > { %5025 = vmatprep.mubr.f32.mxu0 %v7779_v14  ;;  %5128 = vmatprep.mubr.f32.mxu1 %v7783_v60  ;;  %v1091_v26 = vpop.f32.mrf.mxu0  ;;  %v7787_v14 = vld [vmem:[#allocation35_spill] sm:$0xff] }
 0x159   : > { %7782 = vst [vmem:[#allocation74_spill] sm:$0xff] %v6648_v27  ;;  %v1590_v10 = vpop.f32.mrf.mxu1  ;;  %v6653_v54 = vadd.f32 %v4772_v44, %v1102_v6  ;;  %v1092_v8 = vadd.f32 %v1091_v26, %v6337_v35 }
 0x15a   : > { %v4675_v41 = vpop.f32.mrf.mxu0 }
 0x15b   : > { %7784 = vst [vmem:[#allocation77_spill] sm:$0xff] %v6653_v54  ;;  %5026 = vmatmul.mubr.f32.gmra.mxu0 %v7781_v21  ;;  %v4778_v31 = vpop.f32.mrf.mxu1  ;;  %5129 = vmatmul.mubr.f32.gmra.mxu1 %v7785_v18  ;;  %v6658_v9 = vadd.f32 %v1578_v38, %v1092_v8  ;;  %v1122_v5 = vadd.f32 %v4675_v41, %v6337_v35  ;;  %v7789_v54 = vld [vmem:[#allocation37_spill] sm:$0xff] }
 0x15c   : > { %5028 = vmatprep.mubr.f32.mxu0 %v7783_v60  ;;  %5131 = vmatprep.mubr.f32.mxu1 %v7787_v14  ;;  %v1111_v12 = vpop.f32.mrf.mxu0  ;;  %v7791_v60 = vld [vmem:[#allocation38_spill] sm:$0xff] }
 0x15d   : > { %7786 = vst [vmem:[#allocation79_spill] sm:$0xff] %v6658_v9  ;;  %v1602_v27 = vpop.f32.mrf.mxu1  ;;  %v6663_v44 = vadd.f32 %v4775_v61, %v1122_v5  ;;  %v1112_v6 = vadd.f32 %v1111_v12, %v6337_v35 }
 0x15e   : > { %v4678_v26 = vpop.f32.mrf.mxu0 }
 0x15f   : > { %7788 = vst [vmem:[#allocation80_spill] sm:$0xff] %v6663_v44  ;;  %5029 = vmatmul.mubr.f32.gmra.mxu0 %v7785_v18  ;;  %v4781_v21 = vpop.f32.mrf.mxu1  ;;  %5132 = vmatmul.mubr.f32.gmra.mxu1 %v7789_v54  ;;  %v6668_v38 = vadd.f32 %v1590_v10, %v1112_v6  ;;  %v1142_v8 = vadd.f32 %v4678_v26, %v6337_v35  ;;  %v7793_v44 = vld [vmem:[#allocation42_spill] sm:$0xff] }
 0x160   : > { %5031 = vmatprep.mubr.f32.mxu0 %v7787_v14  ;;  %5134 = vmatprep.mubr.f32.mxu1 %v7791_v60  ;;  %v1131_v41 = vpop.f32.mrf.mxu0  ;;  %v7795_v14 = vld [vmem:[#allocation43_spill] sm:$0xff] }
 0x161   : > { %7790 = vst [vmem:[#allocation81_spill] sm:$0xff] %v6668_v38  ;;  %v1614_v9 = vpop.f32.mrf.mxu1  ;;  %v6673_v61 = vadd.f32 %v4778_v31, %v1142_v8  ;;  %v1132_v5 = vadd.f32 %v1131_v41, %v6337_v35 }
 0x162   : > { %v4681_v12 = vpop.f32.mrf.mxu0 }
 0x163   : > { %7792 = vst [vmem:[#allocation82_spill] sm:$0xff] %v6673_v61  ;;  %5032 = vmatmul.mubr.f32.gmra.mxu0 %v7789_v54  ;;  %v4888_v18 = vpop.f32.mrf.mxu1  ;;  %5135 = vmatmul.mubr.f32.gmra.mxu1 %v7793_v44  ;;  %v6678_v10 = vadd.f32 %v1602_v27, %v1132_v5  ;;  %v1162_v6 = vadd.f32 %v4681_v12, %v6337_v35  ;;  %v7796_v61 = vld [vmem:[#allocation44_spill] sm:$0xff] }
 0x164   : > { %5034 = vmatprep.mubr.f32.mxu0 %v7791_v60  ;;  %5137 = vmatprep.mubr.f32.mxu1 %v7795_v14  ;;  %v1151_v26 = vpop.f32.mrf.mxu0  ;;  %v7797_v60 = vld [vmem:[#allocation47_spill] sm:$0xff] }
 0x165   : > { %7794 = vst [vmem:[#allocation4_spill] sm:$0xff] %v6678_v10  ;;  %v2212_v38 = vpop.f32.mrf.mxu1  ;;  %v6683_v31 = vadd.f32 %v4781_v21, %v1162_v6  ;;  %v1152_v8 = vadd.f32 %v1151_v26, %v6337_v35  ;;  %v7798_v26 = vld [vmem:[#allocation49_spill] sm:$0xff] }
 0x166   : > { %v4788_v41 = vpop.f32.mrf.mxu0 }
 0x167   : > { %5035 = vmatmul.mubr.f32.gmra.mxu0 %v7793_v44  ;;  %v4891_v54 = vpop.f32.mrf.mxu1  ;;  %5138 = vmatmul.mubr.f32.gmra.mxu1 %v7796_v61  ;;  %v6688_v27 = vadd.f32 %v1614_v9, %v1152_v8  ;;  %v1704_v5 = vadd.f32 %v4788_v41, %v6346_v43 }
 0x168   : > { %5037 = vmatprep.mubr.f32.mxu0 %v7795_v14  ;;  %5140 = vmatprep.mubr.f32.mxu1 %v7797_v60  ;;  %v1696_v12 = vpop.f32.mrf.mxu0  ;;  %v7799_v14 = vld [vmem:[#allocation51_spill] sm:$0xff] }
 0x169   : > { %v2228_v10 = vpop.f32.mrf.mxu1  ;;  %v6693_v21 = vadd.f32 %v4888_v18, %v1704_v5  ;;  %v1697_v35 = vadd.f32 %v1696_v12, %v6352_v47  ;;  %v7800_v12 = vld [vmem:[#allocation53_spill] sm:$0xff] }
 0x16b   : > { %v4791_v6 = vpop.f32.mrf.mxu0  ;;  %5038 = vmatmul.mubr.f32.gmra.mxu0 %v7796_v61  ;;  %v4894_v44 = vpop.f32.mrf.mxu1  ;;  %5141 = vmatmul.mubr.f32.gmra.mxu1 %v7798_v26  ;;  %v6698_v9 = vadd.f32 %v2212_v38, %v1697_v35 }
 0x16c   : > { %v1718_v43 = vadd.f32 %v4791_v6, %v6358_v20  ;;  %5040 = vmatprep.mubr.f32.mxu0 %v7797_v60  ;;  %5143 = vmatprep.mubr.f32.mxu1 %v7799_v14  ;;  %v7801_v60 = vld [vmem:[#allocation55_spill] sm:$0xff] }
 0x16d   : > { %v1710_v8 = vpop.f32.mrf.mxu0  ;;  %v2244_v41 = vpop.f32.mrf.mxu1 }
 0x16e   : > { %v6703_v18 = vadd.f32 %v4891_v54, %v1718_v43  ;;  %v1711_v47 = vadd.f32 %v1710_v8, %v6364_v51  ;;  %v7802_v8 = vld [vmem:[#allocation57_spill] sm:$0xff] }
 0x16f   : > { %v4794_v5 = vpop.f32.mrf.mxu0  ;;  %5041 = vmatmul.mubr.f32.gmra.mxu0 %v7798_v26  ;;  %v4897_v61 = vpop.f32.mrf.mxu1  ;;  %5144 = vmatmul.mubr.f32.gmra.mxu1 %v7800_v12 }
 0x170   : > { %v6708_v38 = vadd.f32 %v2228_v10, %v1711_v47  ;;  %v1732_v20 = vadd.f32 %v4794_v5, %v6370_v39  ;;  %5043 = vmatprep.mubr.f32.mxu0 %v7799_v14  ;;  %5146 = vmatprep.mubr.f32.mxu1 %v7801_v60  ;;  %v7803_v14 = vld [vmem:[#allocation58_spill] sm:$0xff] }
 0x171   : > { %v1724_v35 = vpop.f32.mrf.mxu0  ;;  %v2260_v6 = vpop.f32.mrf.mxu1 }
 0x172   : > { %v6713_v54 = vadd.f32 %v4894_v44, %v1732_v20  ;;  %v1725_v51 = vadd.f32 %v1724_v35, %v6376_v33  ;;  %v7804_v35 = vld [vmem:[#allocation60_spill] sm:$0xff] }
 0x173   : > { %v4797_v43 = vpop.f32.mrf.mxu0  ;;  %5044 = vmatmul.mubr.f32.gmra.mxu0 %v7800_v12  ;;  %v4900_v26 = vpop.f32.mrf.mxu1  ;;  %5147 = vmatmul.mubr.f32.gmra.mxu1 %v7802_v8 }
 0x174   : > { %v6718_v10 = vadd.f32 %v2244_v41, %v1725_v51  ;;  %v1746_v39 = vadd.f32 %v4797_v43, %v6382_v7  ;;  %5046 = vmatprep.mubr.f32.mxu0 %v7801_v60  ;;  %5149 = vmatprep.mubr.f32.mxu1 %v7803_v14  ;;  %v7805_v60 = vld [vmem:[#allocation63_spill] sm:$0xff] }
 0x175   : > { %v1738_v47 = vpop.f32.mrf.mxu0  ;;  %v2276_v5 = vpop.f32.mrf.mxu1 }
 0x176   : > { %v6723_v44 = vadd.f32 %v4897_v61, %v1746_v39  ;;  %v1739_v33 = vadd.f32 %v1738_v47, %v6388_v29  ;;  %v7806_v47 = vld [vmem:[#allocation65_spill] sm:$0xff] }
 0x177   : > { %v4800_v20 = vpop.f32.mrf.mxu0  ;;  %5047 = vmatmul.mubr.f32.gmra.mxu0 %v7802_v8  ;;  %v4903_v12 = vpop.f32.mrf.mxu1  ;;  %5150 = vmatmul.mubr.f32.gmra.mxu1 %v7804_v35 }
 0x178   : > { %v6728_v41 = vadd.f32 %v2260_v6, %v1739_v33  ;;  %v1760_v7 = vadd.f32 %v4800_v20, %v6394_v63  ;;  %5049 = vmatprep.mubr.f32.mxu0 %v7803_v14  ;;  %5152 = vmatprep.mubr.f32.mxu1 %v7805_v60  ;;  %v7807_v14 = vld [vmem:[#allocation66_spill] sm:$0xff] }
 0x179   : > { %v1752_v51 = vpop.f32.mrf.mxu0  ;;  %v2292_v43 = vpop.f32.mrf.mxu1 }
 0x17a   : > { %v6733_v61 = vadd.f32 %v4900_v26, %v1760_v7  ;;  %v1753_v29 = vadd.f32 %v1752_v51, %v6400_v15  ;;  %v7808_v51 = vld [vmem:[#allocation70_spill] sm:$0xff] }
 0x17b   : > { %v4803_v39 = vpop.f32.mrf.mxu0  ;;  %5050 = vmatmul.mubr.f32.gmra.mxu0 %v7804_v35  ;;  %v4906_v8 = vpop.f32.mrf.mxu1  ;;  %5153 = vmatmul.mubr.f32.gmra.mxu1 %v7806_v47 }
 0x17c   : > { %v6738_v6 = vadd.f32 %v2276_v5, %v1753_v29  ;;  %v1774_v63 = vadd.f32 %v4803_v39, %v6406_v62  ;;  %5052 = vmatprep.mubr.f32.mxu0 %v7805_v60  ;;  %5155 = vmatprep.mubr.f32.mxu1 %v7807_v14  ;;  %v7809_v60 = vld [vmem:[#allocation71_spill] sm:$0xff] }
 0x17d   : > { %v1766_v33 = vpop.f32.mrf.mxu0  ;;  %v2308_v20 = vpop.f32.mrf.mxu1 }
 0x17e   : > { %v6743_v26 = vadd.f32 %v4903_v12, %v1774_v63  ;;  %v1767_v15 = vadd.f32 %v1766_v33, %v6412_v3  ;;  %v7810_v33 = vld [vmem:[#allocation73_spill] sm:$0xff] }
 0x17f   : > { %v4806_v7 = vpop.f32.mrf.mxu0  ;;  %5053 = vmatmul.mubr.f32.gmra.mxu0 %v7806_v47  ;;  %v4909_v35 = vpop.f32.mrf.mxu1  ;;  %5156 = vmatmul.mubr.f32.gmra.mxu1 %v7808_v51 }
 0x180   : > { %v6748_v5 = vadd.f32 %v2292_v43, %v1767_v15  ;;  %v1788_v62 = vadd.f32 %v4806_v7, %v6418_v42  ;;  %5055 = vmatprep.mubr.f32.mxu0 %v7807_v14  ;;  %5158 = vmatprep.mubr.f32.mxu1 %v7809_v60  ;;  %v7811_v14 = vld [vmem:[#allocation75_spill] sm:$0xff] }
 0x181   : > { %v1780_v29 = vpop.f32.mrf.mxu0  ;;  %v2324_v39 = vpop.f32.mrf.mxu1 }
 0x182   : > { %v6753_v12 = vadd.f32 %v4906_v8, %v1788_v62  ;;  %v1781_v3 = vadd.f32 %v1780_v29, %v6424_v58  ;;  %v7812_v29 = vld [vmem:[#allocation76_spill] sm:$0xff] }
 0x183   : > { %v4809_v63 = vpop.f32.mrf.mxu0  ;;  %5056 = vmatmul.mubr.f32.gmra.mxu0 %v7808_v51  ;;  %v4912_v47 = vpop.f32.mrf.mxu1  ;;  %5159 = vmatmul.mubr.f32.gmra.mxu1 %v7810_v33 }
 0x184   : > { %v6758_v43 = vadd.f32 %v2308_v20, %v1781_v3  ;;  %v1802_v42 = vadd.f32 %v4809_v63, %v6430_v28  ;;  %5058 = vmatprep.mubr.f32.mxu0 %v7809_v60  ;;  %5161 = vmatprep.mubr.f32.mxu1 %v7811_v14 }
 0x185   : > { %v1794_v15 = vpop.f32.mrf.mxu0  ;;  %v2340_v7 = vpop.f32.mrf.mxu1 }
 0x186   : > { %v6763_v8 = vadd.f32 %v4909_v35, %v1802_v42  ;;  %v1795_v58 = vadd.f32 %v1794_v15, %v6436_v46  ;;  %v7813_v42 = vld [vmem:[#allocation78_spill] sm:$0xff] }
 0x187   : > { %v4812_v62 = vpop.f32.mrf.mxu0  ;;  %5059 = vmatmul.mubr.f32.gmra.mxu0 %v7810_v33  ;;  %v4915_v51 = vpop.f32.mrf.mxu1  ;;  %5162 = vmatmul.mubr.f32.gmra.mxu1 %v7812_v29 }
 0x188   : > { %v6768_v20 = vadd.f32 %v2324_v39, %v1795_v58  ;;  %v1816_v28 = vadd.f32 %v4812_v62, %v6442_v4  ;;  %5061 = vmatprep.mubr.f32.mxu0 %v7811_v14  ;;  %5164 = vmatprep.mubr.f32.mxu1 %v6062_v40 }
 0x189   : > { %v1808_v60 = vpop.f32.mrf.mxu0  ;;  %v2356_v3 = vpop.f32.mrf.mxu1 }
 0x18a   : > { %v6773_v35 = vadd.f32 %v4912_v47, %v1816_v28  ;;  %v1809_v46 = vadd.f32 %v1808_v60, %v6448_v52 }
 0x18b   : > { %v4815_v63 = vpop.f32.mrf.mxu0  ;;  %5062 = vmatmul.mubr.f32.gmra.mxu0 %v7812_v29  ;;  %v4918_v33 = vpop.f32.mrf.mxu1  ;;  %5165 = vmatmul.mubr.f32.gmra.mxu1 %v6066_v17  ;;  %v7814_v29 = vld [vmem:[#allocation83_spill] sm:$0xff] }
 0x18c   : > { %v6778_v39 = vadd.f32 %v2340_v7, %v1809_v46  ;;  %v1830_v4 = vadd.f32 %v4815_v63, %v6454_v48  ;;  %5064 = vmatprep.mubr.f32.mxu0 %v6062_v40  ;;  %5167 = vmatprep.mubr.f32.mxu1 %v7813_v42 }
 0x18d   : > { %v1822_v14 = vpop.f32.mrf.mxu0  ;;  %v2372_v15 = vpop.f32.mrf.mxu1 }
 0x18e   : > { %v6783_v47 = vadd.f32 %v4915_v51, %v1830_v4  ;;  %v1823_v52 = vadd.f32 %v1822_v14, %v6460_v55 }
 0x18f   : > { %v4818_v58 = vpop.f32.mrf.mxu0  ;;  %5065 = vmatmul.mubr.f32.gmra.mxu0 %v6066_v17  ;;  %v4921_v62 = vpop.f32.mrf.mxu1  ;;  %5168 = vmatmul.mubr.f32.gmra.mxu1 %v7814_v29 }
 0x190   : > { %v6788_v7 = vadd.f32 %v2356_v3, %v1823_v52  ;;  %v1844_v48 = vadd.f32 %v4818_v58, %v6466_v19  ;;  %5067 = vmatprep.mubr.f32.mxu0 %v7813_v42  ;;  %5170 = vmatprep.mubr.f32.mxu1 %v6103_v23 }
 0x191   : > { %v1836_v40 = vpop.f32.mrf.mxu0  ;;  %v2388_v28 = vpop.f32.mrf.mxu1 }
 0x192   : > { %v6793_v51 = vadd.f32 %v4918_v33, %v1844_v48  ;;  %v1837_v55 = vadd.f32 %v1836_v40, %v6472_v32 }
 0x193   : > { %v4821_v60 = vpop.f32.mrf.mxu0  ;;  %5068 = vmatmul.mubr.f32.gmra.mxu0 %v7814_v29  ;;  %v4924_v17 = vpop.f32.mrf.mxu1  ;;  %5171 = vmatmul.mubr.f32.gmra.mxu1 %v6126_v16 }
 0x194   : > { %v6798_v3 = vadd.f32 %v2372_v15, %v1837_v55  ;;  %v1858_v19 = vadd.f32 %v4821_v60, %v6478_v13  ;;  %5070 = vmatprep.mubr.f32.mxu0 %v6103_v23  ;;  %5173 = vmatprep.mubr.f32.mxu1 %v6132_v56 }
 0x195   : > { %v1850_v46 = vpop.f32.mrf.mxu0  ;;  %v2404_v63 = vpop.f32.mrf.mxu1 }
 0x196   : > { %v6803_v33 = vadd.f32 %v4921_v62, %v1858_v19  ;;  %v1851_v32 = vadd.f32 %v1850_v46, %v6484_v57 }
 0x197   : > { %v4824_v4 = vpop.f32.mrf.mxu0  ;;  %5071 = vmatmul.mubr.f32.gmra.mxu0 %v6126_v16  ;;  %v4927_v42 = vpop.f32.mrf.mxu1  ;;  %5174 = vmatmul.mubr.f32.gmra.mxu1 %v6150_v59 }
 0x198   : > { %v6808_v14 = vadd.f32 %v2388_v28, %v1851_v32  ;;  %v1872_v13 = vadd.f32 %v4824_v4, %v6490_v49  ;;  %5073 = vmatprep.mubr.f32.mxu0 %v6132_v56  ;;  %5176 = vmatprep.mubr.f32.mxu1 %v6156_v2 }
 0x199   : > { %v1864_v23 = vpop.f32.mrf.mxu0  ;;  %v2420_v15 = vpop.f32.mrf.mxu1 }
 0x19a   : > { %v6813_v52 = vadd.f32 %v4924_v17, %v1872_v13  ;;  %v1865_v57 = vadd.f32 %v1864_v23, %v6496_v25 }
 0x19b   : > { %v4827_v58 = vpop.f32.mrf.mxu0  ;;  %5074 = vmatmul.mubr.f32.gmra.mxu0 %v6150_v59  ;;  %v4930_v16 = vpop.f32.mrf.mxu1  ;;  %5177 = vmatmul.mubr.f32.gmra.mxu1 %v6172_v11 }
 0x19c   : > { %v6818_v62 = vadd.f32 %v2404_v63, %v1865_v57  ;;  %v1886_v49 = vadd.f32 %v4827_v58, %v6502_v30  ;;  %5076 = vmatprep.mubr.f32.mxu0 %v6156_v2  ;;  %5179 = vmatprep.mubr.f32.mxu1 %v6179_v50 }
 0x19d   : > { %v1878_v56 = vpop.f32.mrf.mxu0  ;;  %v2436_v29 = vpop.f32.mrf.mxu1 }
 0x19e   : > { %v6823_v48 = vadd.f32 %v4927_v42, %v1886_v49  ;;  %v1879_v25 = vadd.f32 %v1878_v56, %v6508_v45 }
 0x19f   : > { %v4830_v40 = vpop.f32.mrf.mxu0  ;;  %5077 = vmatmul.mubr.f32.gmra.mxu0 %v6172_v11  ;;  %v4933_v59 = vpop.f32.mrf.mxu1  ;;  %5180 = vmatmul.mubr.f32.gmra.mxu1 %v6190_v24 }
 0x1a0   : > { %v6828_v28 = vadd.f32 %v2420_v15, %v1879_v25  ;;  %v1900_v30 = vadd.f32 %v4830_v40, %v6513_v36  ;;  %5079 = vmatprep.mubr.f32.mxu0 %v6179_v50  ;;  %v7815_v25 = vld [vmem:[#allocation34_spill] sm:$0xff] }
 0x1a1   : > { %v1892_v2 = vpop.f32.mrf.mxu0  ;;  %v2452_v55 = vpop.f32.mrf.mxu1 }
 0x1a2   : > { %v6832_v60 = vadd.f32 %v4930_v16, %v1900_v30  ;;  %v1893_v17 = vadd.f32 %v1892_v2, %v6518_v22  ;;  %v7816_v2 = vld [vmem:[#allocation36_spill] sm:$0xff] }
 0x1a3   : > { %v4833_v19 = vpop.f32.mrf.mxu0  ;;  %5080 = vmatmul.mubr.f32.gmra.mxu0 %v6190_v24  ;;  %v4936_v45 = vpop.f32.mrf.mxu1 }
 0x1a4   : > { %v6836_v11 = vadd.f32 %v2436_v29, %v1893_v17  ;;  %v1914_v46 = vadd.f32 %v4833_v19, %v6523_v0 }
 0x1a5   : > { %v1906_v63 = vpop.f32.mrf.mxu0  ;;  %v2468_v32 = vpop.f32.mrf.mxu1 }
 0x1a6   : > { %v6839_v4 = vadd.f32 %v4933_v59, %v1914_v46  ;;  %v1907_v50 = vadd.f32 %v1906_v63, %v6528_v1 }
 0x1a7   : > { %v4836_v36 = vpop.f32.mrf.mxu0  ;;  %v4939_v42 = vpop.f32.mrf.mxu1 }
 0x1a8   : > { %v6842_v13 = vadd.f32 %v2452_v55, %v1907_v50  ;;  %v1928_v22 = vadd.f32 %v4836_v36, %v6533_v53  ;;  %v7818_v50 = vld [vmem:[#allocation40_spill] sm:$0xff] }
 0x1a9   : > { %v1920_v23 = vpop.f32.mrf.mxu0  ;;  %v2484_v15 = vpop.f32.mrf.mxu1 }
 0x1aa   : > { %v6845_v24 = vadd.f32 %v4936_v45, %v1928_v22  ;;  %v1921_v57 = vadd.f32 %v1920_v23, %v6538_v37  ;;  %v7817_v45 = vld [vmem:[#allocation39_spill] sm:$0xff] }
 0x1ab   : > { %v4839_v58 = vpop.f32.mrf.mxu0  ;;  %v4942_v0 = vpop.f32.mrf.mxu1 }
 0x1ac   : > { %v6848_v16 = vadd.f32 %v2468_v32, %v1921_v57  ;;  %v1942_v49 = vadd.f32 %v4839_v58, %v6543_v34 }
 0x1ad   : > { %v1934_v56 = vpop.f32.mrf.mxu0  ;;  %v2500_v1 = vpop.f32.mrf.mxu1 }
 0x1ae   : > { %v6851_v29 = vadd.f32 %v4939_v42, %v1942_v49  ;;  %v1935_v40 = vadd.f32 %v1934_v56, %v7815_v25 }
 0x1af   : > { %v4842_v59 = vpop.f32.mrf.mxu0  ;;  %v4945_v53 = vpop.f32.mrf.mxu1 }
 0x1b0   : > { %v6854_v30 = vadd.f32 %v2484_v15, %v1935_v40  ;;  %v1956_v55 = vadd.f32 %v4842_v59, %v7816_v2  ;;  %v7819_v15 = vld [vmem:[#allocation41_spill] sm:$0xff] }
 0x1b1   : > { %v1948_v17 = vpop.f32.mrf.mxu0  ;;  %v2516_v37 = vpop.f32.mrf.mxu1 }
 0x1b2   : > { %v6857_v19 = vadd.f32 %v4942_v0, %v1956_v55  ;;  %v1949_v46 = vadd.f32 %v1948_v17, %v7817_v45  ;;  %v7820_v0 = vld [vmem:[#allocation45_spill] sm:$0xff] }
 0x1b3   : > { %v4845_v63 = vpop.f32.mrf.mxu0  ;;  %v4948_v34 = vpop.f32.mrf.mxu1 }
 0x1b4   : > { %v6860_v32 = vadd.f32 %v2500_v1, %v1949_v46  ;;  %v1970_v36 = vadd.f32 %v4845_v63, %v7818_v50  ;;  %v7822_v1 = vld [vmem:[#allocation46_spill] sm:$0xff] }
 0x1b5   : > { %v1962_v42 = vpop.f32.mrf.mxu0  ;;  %v2532_v22 = vpop.f32.mrf.mxu1 }
 0x1b6   : > { %v6863_v23 = vadd.f32 %v4945_v53, %v1970_v36  ;;  %v1963_v57 = vadd.f32 %v1962_v42, %v7819_v15  ;;  %v7824_v53 = vld [vmem:[#allocation48_spill] sm:$0xff] }
 0x1b7   : > { %v4848_v58 = vpop.f32.mrf.mxu0  ;;  %v4951_v49 = vpop.f32.mrf.mxu1 }
 0x1b8   : > { %v6866_v56 = vadd.f32 %v2516_v37, %v1963_v57  ;;  %v1984_v25 = vadd.f32 %v4848_v58, %v7820_v0  ;;  %v7826_v37 = vld [vmem:[#allocation50_spill] sm:$0xff] }
 0x1b9   : > { %v1976_v40 = vpop.f32.mrf.mxu0  ;;  %v2548_v59 = vpop.f32.mrf.mxu1 }
 0x1ba   : > { %v6869_v2 = vadd.f32 %v4948_v34, %v1984_v25  ;;  %v1977_v55 = vadd.f32 %v1976_v40, %v7822_v1  ;;  %v7828_v34 = vld [vmem:[#allocation52_spill] sm:$0xff] }
 0x1bb   : > { %v4851_v17 = vpop.f32.mrf.mxu0  ;;  %v4954_v45 = vpop.f32.mrf.mxu1 }
 0x1bc   : > { %7821 = vst [vmem:[#allocation5_spill] sm:$0xff] %v6869_v2  ;;  %v6872_v46 = vadd.f32 %v2532_v22, %v1977_v55  ;;  %v1998_v63 = vadd.f32 %v4851_v17, %v7824_v53  ;;  %v7830_v22 = vld [vmem:[#allocation54_spill] sm:$0xff] }
 0x1bd   : > { %v1990_v50 = vpop.f32.mrf.mxu0  ;;  %v2564_v36 = vpop.f32.mrf.mxu1 }
 0x1be   : > { %7823 = vst [vmem:[#allocation6_spill] sm:$0xff] %v6872_v46  ;;  %v6875_v42 = vadd.f32 %v4951_v49, %v1998_v63  ;;  %v1991_v15 = vadd.f32 %v1990_v50, %v7826_v37  ;;  %v7832_v49 = vld [vmem:[#allocation56_spill] sm:$0xff] }
 0x1bf   : > { %v4854_v57 = vpop.f32.mrf.mxu0  ;;  %v4957_v58 = vpop.f32.mrf.mxu1 }
 0x1c0   : > { %7825 = vst [vmem:[#allocation7_spill] sm:$0xff] %v6875_v42  ;;  %v6878_v0 = vadd.f32 %v2548_v59, %v1991_v15  ;;  %v2012_v25 = vadd.f32 %v4854_v57, %v7828_v34  ;;  %v7834_v59 = vld [vmem:[#allocation59_spill] sm:$0xff] }
 0x1c1   : > { %v2004_v2 = vpop.f32.mrf.mxu0  ;;  %v2580_v40 = vpop.f32.mrf.mxu1 }
 0x1c2   : > { %7827 = vst [vmem:[#allocation8_spill] sm:$0xff] %v6878_v0  ;;  %v6881_v1 = vadd.f32 %v4954_v45, %v2012_v25  ;;  %v2005_v55 = vadd.f32 %v2004_v2, %v7830_v22  ;;  %v7836_v45 = vld [vmem:[#allocation61_spill] sm:$0xff] }
 0x1c3   : > { %v4857_v46 = vpop.f32.mrf.mxu0  ;;  %v4960_v17 = vpop.f32.mrf.mxu1 }
 0x1c4   : > { %7829 = vst [vmem:[#allocation9_spill] sm:$0xff] %v6881_v1  ;;  %v6884_v53 = vadd.f32 %v2564_v36, %v2005_v55  ;;  %v2026_v63 = vadd.f32 %v4857_v46, %v7832_v49  ;;  %v7838_v36 = vld [vmem:[#allocation62_spill] sm:$0xff] }
 0x1c5   : > { %v2018_v42 = vpop.f32.mrf.mxu0  ;;  %v2596_v50 = vpop.f32.mrf.mxu1 }
 0x1c6   : > { %7831 = vst [vmem:[#allocation10_spill] sm:$0xff] %v6884_v53  ;;  %v6887_v37 = vadd.f32 %v4957_v58, %v2026_v63  ;;  %v2019_v15 = vadd.f32 %v2018_v42, %v7834_v59  ;;  %v7840_v58 = vld [vmem:[#allocation64_spill] sm:$0xff] }
 0x1c7   : > { %v4860_v0 = vpop.f32.mrf.mxu0  ;;  %v4963_v57 = vpop.f32.mrf.mxu1 }
 0x1c8   : > { %7833 = vst [vmem:[#allocation11_spill] sm:$0xff] %v6887_v37  ;;  %v6890_v34 = vadd.f32 %v2580_v40, %v2019_v15  ;;  %v2040_v25 = vadd.f32 %v4860_v0, %v7836_v45  ;;  %v7842_v40 = vld [vmem:[#allocation67_spill] sm:$0xff] }
 0x1c9   : > { %v2032_v1 = vpop.f32.mrf.mxu0  ;;  %v2612_v2 = vpop.f32.mrf.mxu1 }
 0x1ca   : > { %7835 = vst [vmem:[#allocation12_spill] sm:$0xff] %v6890_v34  ;;  %v6893_v22 = vadd.f32 %v4960_v17, %v2040_v25  ;;  %v2033_v55 = vadd.f32 %v2032_v1, %v7838_v36  ;;  %v7844_v17 = vld [vmem:[#allocation68_spill] sm:$0xff] }
 0x1cb   : > { %v4863_v53 = vpop.f32.mrf.mxu0  ;;  %v4966_v46 = vpop.f32.mrf.mxu1 }
 0x1cc   : > { %7837 = vst [vmem:[#allocation13_spill] sm:$0xff] %v6893_v22  ;;  %v6896_v49 = vadd.f32 %v2596_v50, %v2033_v55  ;;  %v2054_v63 = vadd.f32 %v4863_v53, %v7840_v58  ;;  %v7846_v50 = vld [vmem:[#allocation69_spill] sm:$0xff] }
 0x1cd   : > { %v2046_v37 = vpop.f32.mrf.mxu0  ;;  %v2628_v42 = vpop.f32.mrf.mxu1 }
 0x1ce   : > { %7839 = vst [vmem:[#allocation14_spill] sm:$0xff] %v6896_v49  ;;  %v6899_v59 = vadd.f32 %v4963_v57, %v2054_v63  ;;  %v2047_v15 = vadd.f32 %v2046_v37, %v7842_v40  ;;  %v7848_v57 = vld [vmem:[#allocation72_spill] sm:$0xff] }
 0x1cf   : > { %v4866_v34 = vpop.f32.mrf.mxu0  ;;  %v4969_v0 = vpop.f32.mrf.mxu1 }
 0x1d0   : > { %7841 = vst [vmem:[#allocation15_spill] sm:$0xff] %v6899_v59  ;;  %v6902_v45 = vadd.f32 %v2612_v2, %v2047_v15  ;;  %v2068_v25 = vadd.f32 %v4866_v34, %v7844_v17  ;;  %v7850_v2 = vld [vmem:[#allocation74_spill] sm:$0xff] }
 0x1d1   : > { %v2060_v22 = vpop.f32.mrf.mxu0  ;;  %v2644_v1 = vpop.f32.mrf.mxu1 }
 0x1d2   : > { %7843 = vst [vmem:[#allocation16_spill] sm:$0xff] %v6902_v45  ;;  %v6905_v36 = vadd.f32 %v4966_v46, %v2068_v25  ;;  %v2061_v55 = vadd.f32 %v2060_v22, %v7846_v50  ;;  %v7852_v46 = vld [vmem:[#allocation77_spill] sm:$0xff] }
 0x1d3   : > { %v4869_v49 = vpop.f32.mrf.mxu0  ;;  %v4972_v53 = vpop.f32.mrf.mxu1 }
 0x1d4   : > { %7845 = vst [vmem:[#allocation17_spill] sm:$0xff] %v6905_v36  ;;  %v6908_v58 = vadd.f32 %v2628_v42, %v2061_v55  ;;  %v2082_v63 = vadd.f32 %v4869_v49, %v7848_v57  ;;  %v7854_v42 = vld [vmem:[#allocation79_spill] sm:$0xff] }
 0x1d5   : > { %v2074_v59 = vpop.f32.mrf.mxu0  ;;  %v2660_v37 = vpop.f32.mrf.mxu1 }
 0x1d6   : > { %7847 = vst [vmem:[#allocation18_spill] sm:$0xff] %v6908_v58  ;;  %v6911_v40 = vadd.f32 %v4969_v0, %v2082_v63  ;;  %v2075_v15 = vadd.f32 %v2074_v59, %v7850_v2  ;;  %v7856_v0 = vld [vmem:[#allocation80_spill] sm:$0xff] }
 0x1d7   : > { %v4872_v45 = vpop.f32.mrf.mxu0  ;;  %v4975_v34 = vpop.f32.mrf.mxu1 }
 0x1d8   : > { %7849 = vst [vmem:[#allocation19_spill] sm:$0xff] %v6911_v40  ;;  %v6914_v17 = vadd.f32 %v2644_v1, %v2075_v15  ;;  %v2096_v25 = vadd.f32 %v4872_v45, %v7852_v46  ;;  %v7857_v1 = vld [vmem:[#allocation81_spill] sm:$0xff] }
 0x1d9   : > { %v2088_v36 = vpop.f32.mrf.mxu0  ;;  %v2676_v22 = vpop.f32.mrf.mxu1 }
 0x1da   : > { %7851 = vst [vmem:[#allocation20_spill] sm:$0xff] %v6914_v17  ;;  %v6917_v50 = vadd.f32 %v4972_v53, %v2096_v25  ;;  %v2089_v55 = vadd.f32 %v2088_v36, %v7854_v42  ;;  %v7858_v53 = vld [vmem:[#allocation82_spill] sm:$0xff] }
 0x1db   : > { %v4875_v58 = vpop.f32.mrf.mxu0  ;;  %v4978_v49 = vpop.f32.mrf.mxu1 }
 0x1dc   : > { %7853 = vst [vmem:[#allocation21_spill] sm:$0xff] %v6917_v50  ;;  %v6920_v57 = vadd.f32 %v2660_v37, %v2089_v55  ;;  %v2110_v63 = vadd.f32 %v4875_v58, %v7856_v0  ;;  %v7859_v37 = vld [vmem:[#allocation4_spill] sm:$0xff] }
 0x1dd   : > { %v2102_v59 = vpop.f32.mrf.mxu0  ;;  %v2692_v2 = vpop.f32.mrf.mxu1 }
 0x1de   : > { %7855 = vst [vmem:[#allocation22_spill] sm:$0xff] %v6920_v57  ;;  %v6923_v40 = vadd.f32 %v4975_v34, %v2110_v63  ;;  %v2103_v15 = vadd.f32 %v2102_v59, %v7857_v1 }
 0x1df   : > { %v4878_v45 = vpop.f32.mrf.mxu0  ;;  %v4981_v46 = vpop.f32.mrf.mxu1 }
 0x1e0   : > { %v6926_v17 = vadd.f32 %v2676_v22, %v2103_v15  ;;  %v2124_v25 = vadd.f32 %v4878_v45, %v7858_v53 }
 0x1e1   : > { %v2116_v36 = vpop.f32.mrf.mxu0  ;;  %v2708_v42 = vpop.f32.mrf.mxu1 }
 0x1e2   : > { %v6929_v50 = vadd.f32 %v4978_v49, %v2124_v25  ;;  %v2117_v55 = vadd.f32 %v2116_v36, %v7859_v37 }
 0x1e3   : > { %v4881_v57 = vpop.f32.mrf.mxu0  ;;  %v5088_v58 = vpop.f32.mrf.mxu1 }
 0x1e4   : > { %v6933_v0 = vadd.f32 %v2692_v2, %v2117_v55  ;;  %v2138_v34 = vadd.f32 %v4881_v57, %v6683_v31 }
 0x1e5   : > { %v2130_v63 = vpop.f32.mrf.mxu0  ;;  %v3244_v59 = vpop.f32.mrf.mxu1 }
 0x1e6   : > { %v6936_v1 = vadd.f32 %v4981_v46, %v2138_v34  ;;  %v2131_v22 = vadd.f32 %v2130_v63, %v6688_v27 }
 0x1e7   : > { %v4988_v15 = vpop.f32.mrf.mxu0  ;;  %v5091_v45 = vpop.f32.mrf.mxu1 }
 0x1e8   : > { %v6939_v49 = vadd.f32 %v2708_v42, %v2131_v22  ;;  %v2800_v53 = vadd.f32 %v4988_v15, %v6693_v21 }
 0x1e9   : > { %v2793_v25 = vpop.f32.mrf.mxu0  ;;  %v3256_v36 = vpop.f32.mrf.mxu1 }
 0x1ea   : > { %v3251_v2 = vadd.f32 %v5088_v58, %v2800_v53  ;;  %v2794_v37 = vadd.f32 %v2793_v25, %v6698_v9 }
 0x1eb   : > { %v4991_v31 = vpop.f32.mrf.mxu0  ;;  %v5094_v57 = vpop.f32.mrf.mxu1 }
 0x1ec   : > { %3628 = vst.msk [vmem:[%s6943_s8 + $0x8] sm:$0xff] %vm3626_vm2, %v3251_v2  ;;  %v3245_v27 = vadd.f32 %v3244_v59, %v2794_v37  ;;  %v2812_v46 = vadd.f32 %v4991_v31, %v6703_v18 }
 0x1ed   : > { %v2805_v21 = vpop.f32.mrf.mxu0  ;;  %v3268_v42 = vpop.f32.mrf.mxu1 }
 0x1ee   : > { %3627 = vst.msk [vmem:[%s6943_s8] sm:$0xff] %vm3626_vm2, %v3245_v27  ;;  %v3263_v55 = vadd.f32 %v5091_v45, %v2812_v46  ;;  %v2806_v9 = vadd.f32 %v2805_v21, %v6708_v38 }
 0x1ef   : > { %v4994_v58 = vpop.f32.mrf.mxu0  ;;  %v5097_v34 = vpop.f32.mrf.mxu1 }
 0x1f0   : > { %3630 = vst.msk [vmem:[%s6943_s8 + $0x18] sm:$0xff] %vm3626_vm2, %v3263_v55  ;;  %v3257_v63 = vadd.f32 %v3256_v36, %v2806_v9  ;;  %v2824_v22 = vadd.f32 %v4994_v58, %v6713_v54 }
 0x1f1   : > { %v2817_v15 = vpop.f32.mrf.mxu0  ;;  %v3280_v59 = vpop.f32.mrf.mxu1 }
 0x1f2   : > { %3629 = vst.msk [vmem:[%s6943_s8 + $0x10] sm:$0xff] %vm3626_vm2, %v3257_v63  ;;  %v3275_v18 = vadd.f32 %v5094_v57, %v2824_v22  ;;  %v2818_v53 = vadd.f32 %v2817_v15, %v6718_v10 }
 0x1f3   : > { %v4997_v25 = vpop.f32.mrf.mxu0  ;;  %v5100_v45 = vpop.f32.mrf.mxu1 }
 0x1f4   : > { %3632 = vst.msk [vmem:[%s6943_s8 + $0x28] sm:$0xff] %vm3626_vm2, %v3275_v18  ;;  %v3269_v38 = vadd.f32 %v3268_v42, %v2818_v53  ;;  %v2836_v2 = vadd.f32 %v4997_v25, %v6723_v44 }
 0x1f5   : > { %v2829_v37 = vpop.f32.mrf.mxu0  ;;  %v3292_v36 = vpop.f32.mrf.mxu1 }
 0x1f6   : > { %3631 = vst.msk [vmem:[%s6943_s8 + $0x20] sm:$0xff] %vm3626_vm2, %v3269_v38  ;;  %v3287_v54 = vadd.f32 %v5097_v34, %v2836_v2  ;;  %v2830_v31 = vadd.f32 %v2829_v37, %v6728_v41 }
 0x1f7   : > { %v5000_v27 = vpop.f32.mrf.mxu0  ;;  %v5103_v57 = vpop.f32.mrf.mxu1 }
 0x1f8   : > { %3634 = vst.msk [vmem:[%s6943_s8 + $0x38] sm:$0xff] %vm3626_vm2, %v3287_v54  ;;  %v3281_v10 = vadd.f32 %v3280_v59, %v2830_v31  ;;  %v2848_v46 = vadd.f32 %v5000_v27, %v6733_v61 }
 0x1f9   : > { %v2841_v21 = vpop.f32.mrf.mxu0  ;;  %v3304_v42 = vpop.f32.mrf.mxu1 }
 0x1fa   : > { %3633 = vst.msk [vmem:[%s6943_s8 + $0x30] sm:$0xff] %vm3626_vm2, %v3281_v10  ;;  %v3299_v44 = vadd.f32 %v5100_v45, %v2848_v46  ;;  %v2842_v55 = vadd.f32 %v2841_v21, %v6738_v6 }
 0x1fb   : > { %v5003_v9 = vpop.f32.mrf.mxu0  ;;  %v5106_v58 = vpop.f32.mrf.mxu1 }
 0x1fc   : > { %3636 = vst.msk [vmem:[%s6943_s8 + $0x48] sm:$0xff] %vm3626_vm2, %v3299_v44  ;;  %v3293_v41 = vadd.f32 %v3292_v36, %v2842_v55  ;;  %v2860_v34 = vadd.f32 %v5003_v9, %v6743_v26 }
 0x1fd   : > { %v2853_v63 = vpop.f32.mrf.mxu0  ;;  %v3316_v22 = vpop.f32.mrf.mxu1 }
 0x1fe   : > { %3635 = vst.msk [vmem:[%s6943_s8 + $0x40] sm:$0xff] %vm3626_vm2, %v3293_v41  ;;  %v3311_v61 = vadd.f32 %v5103_v57, %v2860_v34  ;;  %v2854_v15 = vadd.f32 %v2853_v63, %v6748_v5 }
 0x1ff   : > { %v5006_v59 = vpop.f32.mrf.mxu0  ;;  %v5109_v18 = vpop.f32.mrf.mxu1 }
 0x200   : > { %3638 = vst.msk [vmem:[%s6943_s8 + $0x58] sm:$0xff] %vm3626_vm2, %v3311_v61  ;;  %v3305_v6 = vadd.f32 %v3304_v42, %v2854_v15  ;;  %v2872_v53 = vadd.f32 %v5006_v59, %v6753_v12 }
 0x201   : > { %v2865_v25 = vpop.f32.mrf.mxu0  ;;  %v3328_v45 = vpop.f32.mrf.mxu1 }
 0x202   : > { %3637 = vst.msk [vmem:[%s6943_s8 + $0x50] sm:$0xff] %vm3626_vm2, %v3305_v6  ;;  %v3323_v26 = vadd.f32 %v5106_v58, %v2872_v53  ;;  %v2866_v38 = vadd.f32 %v2865_v25, %v6758_v43 }
 0x203   : > { %v5009_v2 = vpop.f32.mrf.mxu0  ;;  %v5112_v37 = vpop.f32.mrf.mxu1 }
 0x204   : > { %3640 = vst.msk [vmem:[%s6943_s8 + $0x68] sm:$0xff] %vm3626_vm2, %v3323_v26  ;;  %v3317_v5 = vadd.f32 %v3316_v22, %v2866_v38  ;;  %v2884_v36 = vadd.f32 %v5009_v2, %v6763_v8 }
 0x205   : > { %v2877_v54 = vpop.f32.mrf.mxu0  ;;  %v3340_v31 = vpop.f32.mrf.mxu1 }
 0x206   : > { %3639 = vst.msk [vmem:[%s6943_s8 + $0x60] sm:$0xff] %vm3626_vm2, %v3317_v5  ;;  %v3335_v12 = vadd.f32 %v5109_v18, %v2884_v36  ;;  %v2878_v27 = vadd.f32 %v2877_v54, %v6768_v20 }
 0x207   : > { %v5012_v57 = vpop.f32.mrf.mxu0  ;;  %v5115_v10 = vpop.f32.mrf.mxu1 }
 0x208   : > { %3642 = vst.msk [vmem:[%s6943_s8 + $0x78] sm:$0xff] %vm3626_vm2, %v3335_v12  ;;  %v3329_v43 = vadd.f32 %v3328_v45, %v2878_v27  ;;  %v2896_v46 = vadd.f32 %v5012_v57, %v6773_v35 }
 0x209   : > { %v2889_v21 = vpop.f32.mrf.mxu0  ;;  %v3352_v42 = vpop.f32.mrf.mxu1 }
 0x20a   : > { %3641 = vst.msk [vmem:[%s6943_s8 + $0x70] sm:$0xff] %vm3626_vm2, %v3329_v43  ;;  %v3347_v8 = vadd.f32 %v5112_v37, %v2896_v46  ;;  %v2890_v44 = vadd.f32 %v2889_v21, %v6778_v39 }
 0x20b   : > { %v5015_v55 = vpop.f32.mrf.mxu0  ;;  %v5118_v9 = vpop.f32.mrf.mxu1 }
 0x20c   : > { %3644 = vst.msk [vmem:[%s6943_s8 + $0x88] sm:$0xff] %vm3626_vm2, %v3347_v8  ;;  %v3341_v20 = vadd.f32 %v3340_v31, %v2890_v44  ;;  %v2908_v58 = vadd.f32 %v5015_v55, %v6783_v47 }
 0x20d   : > { %v2901_v41 = vpop.f32.mrf.mxu0  ;;  %v3364_v34 = vpop.f32.mrf.mxu1 }
 0x20e   : > { %3643 = vst.msk [vmem:[%s6943_s8 + $0x80] sm:$0xff] %vm3626_vm2, %v3341_v20  ;;  %v3359_v35 = vadd.f32 %v5115_v10, %v2908_v58  ;;  %v2902_v63 = vadd.f32 %v2901_v41, %v6788_v7 }
 0x20f   : > { %v5018_v22 = vpop.f32.mrf.mxu0  ;;  %v5121_v61 = vpop.f32.mrf.mxu1 }
 0x210   : > { %3646 = vst.msk [vmem:[%s6943_s8 + $0x98] sm:$0xff] %vm3626_vm2, %v3359_v35  ;;  %v3353_v39 = vadd.f32 %v3352_v42, %v2902_v63  ;;  %v2920_v15 = vadd.f32 %v5018_v22, %v6793_v51 }
 0x211   : > { %v2913_v59 = vpop.f32.mrf.mxu0  ;;  %v3376_v18 = vpop.f32.mrf.mxu1 }
 0x212   : > { %3645 = vst.msk [vmem:[%s6943_s8 + $0x90] sm:$0xff] %vm3626_vm2, %v3353_v39  ;;  %v3371_v47 = vadd.f32 %v5118_v9, %v2920_v15  ;;  %v2914_v6 = vadd.f32 %v2913_v59, %v6798_v3 }
 0x213   : > { %v5021_v53 = vpop.f32.mrf.mxu0  ;;  %v5124_v25 = vpop.f32.mrf.mxu1 }
 0x214   : > { %3648 = vst.msk [vmem:[%s6943_s8 + $0xa8] sm:$0xff] %vm3626_vm2, %v3371_v47  ;;  %v3365_v7 = vadd.f32 %v3364_v34, %v2914_v6  ;;  %v2932_v45 = vadd.f32 %v5021_v53, %v6803_v33 }
 0x215   : > { %v2925_v26 = vpop.f32.mrf.mxu0  ;;  %v3388_v38 = vpop.f32.mrf.mxu1 }
 0x216   : > { %3647 = vst.msk [vmem:[%s6943_s8 + $0xa0] sm:$0xff] %vm3626_vm2, %v3365_v7  ;;  %v3383_v51 = vadd.f32 %v5121_v61, %v2932_v45  ;;  %v2926_v2 = vadd.f32 %v2925_v26, %v6808_v14 }
 0x217   : > { %v5024_v37 = vpop.f32.mrf.mxu0  ;;  %v5127_v5 = vpop.f32.mrf.mxu1 }
 0x218   : > { %3650 = vst.msk [vmem:[%s6943_s8 + $0xb8] sm:$0xff] %vm3626_vm2, %v3383_v51  ;;  %v3377_v3 = vadd.f32 %v3376_v18, %v2926_v2  ;;  %v2944_v36 = vadd.f32 %v5024_v37, %v6813_v52 }
 0x219   : > { %v2937_v54 = vpop.f32.mrf.mxu0  ;;  %v3400_v31 = vpop.f32.mrf.mxu1 }
 0x21a   : > { %3649 = vst.msk [vmem:[%s6943_s8 + $0xb0] sm:$0xff] %vm3626_vm2, %v3377_v3  ;;  %v3395_v33 = vadd.f32 %v5124_v25, %v2944_v36  ;;  %v2938_v12 = vadd.f32 %v2937_v54, %v6818_v62 }
 0x21b   : > { %v5027_v27 = vpop.f32.mrf.mxu0  ;;  %v5130_v57 = vpop.f32.mrf.mxu1 }
 0x21c   : > { %3652 = vst.msk [vmem:[%s6943_s8 + $0xc8] sm:$0xff] %vm3626_vm2, %v3395_v33  ;;  %v3389_v14 = vadd.f32 %v3388_v38, %v2938_v12  ;;  %v2956_v10 = vadd.f32 %v5027_v27, %v6823_v48 }
 0x21d   : > { %v2949_v43 = vpop.f32.mrf.mxu0  ;;  %v3412_v46 = vpop.f32.mrf.mxu1 }
 0x21e   : > { %3651 = vst.msk [vmem:[%s6943_s8 + $0xc0] sm:$0xff] %vm3626_vm2, %v3389_v14  ;;  %v3407_v52 = vadd.f32 %v5127_v5, %v2956_v10  ;;  %v2950_v21 = vadd.f32 %v2949_v43, %v6828_v28  ;;  %v7860_v10 = vld [vmem:[#allocation5_spill] sm:$0xff] }
 0x21f   : > { %v5030_v42 = vpop.f32.mrf.mxu0  ;;  %v5133_v8 = vpop.f32.mrf.mxu1 }
 0x220   : > { %3654 = vst.msk [vmem:[%s6943_s8 + $0xd8] sm:$0xff] %vm3626_vm2, %v3407_v52  ;;  %v3401_v62 = vadd.f32 %v3400_v31, %v2950_v21  ;;  %v2968_v44 = vadd.f32 %v5030_v42, %v6832_v60  ;;  %v7861_v21 = vld [vmem:[#allocation6_spill] sm:$0xff] }
 0x221   : > { %v2961_v55 = vpop.f32.mrf.mxu0  ;;  %v3424_v9 = vpop.f32.mrf.mxu1 }
 0x222   : > { %3653 = vst.msk [vmem:[%s6943_s8 + $0xd0] sm:$0xff] %vm3626_vm2, %v3401_v62  ;;  %v3419_v48 = vadd.f32 %v5130_v57, %v2968_v44  ;;  %v2962_v20 = vadd.f32 %v2961_v55, %v6836_v11  ;;  %v7862_v44 = vld [vmem:[#allocation7_spill] sm:$0xff] }
 0x223   : > { %v5033_v58 = vpop.f32.mrf.mxu0  ;;  %v5136_v41 = vpop.f32.mrf.mxu1 }
 0x224   : > { %3656 = vst.msk [vmem:[%s6943_s8 + $0xe8] sm:$0xff] %vm3626_vm2, %v3419_v48  ;;  %v3413_v28 = vadd.f32 %v3412_v46, %v2962_v20  ;;  %v2980_v34 = vadd.f32 %v5033_v58, %v6839_v4  ;;  %v7863_v58 = vld [vmem:[#allocation8_spill] sm:$0xff] }
 0x225   : > { %v2973_v35 = vpop.f32.mrf.mxu0  ;;  %v3436_v63 = vpop.f32.mrf.mxu1 }
 0x226   : > { %3655 = vst.msk [vmem:[%s6943_s8 + $0xe0] sm:$0xff] %vm3626_vm2, %v3413_v28  ;;  %v3431_v60 = vadd.f32 %v5133_v8, %v2980_v34  ;;  %v2974_v22 = vadd.f32 %v2973_v35, %v6842_v13 }
 0x227   : > { %v5036_v61 = vpop.f32.mrf.mxu0  ;;  %v5139_v39 = vpop.f32.mrf.mxu1 }
 0x228   : > { %3658 = vst.msk [vmem:[%s6943_s8 + $0xf8] sm:$0xff] %vm3626_vm2, %v3431_v60  ;;  %v3425_v11 = vadd.f32 %v3424_v9, %v2974_v22  ;;  %v2992_v15 = vadd.f32 %v5036_v61, %v6845_v24 }
 0x229   : > { %v2985_v59 = vpop.f32.mrf.mxu0  ;;  %v3448_v18 = vpop.f32.mrf.mxu1 }
 0x22a   : > { %3657 = vst.msk [vmem:[%s6943_s8 + $0xf0] sm:$0xff] %vm3626_vm2, %v3425_v11  ;;  %v3443_v4 = vadd.f32 %v5136_v41, %v2992_v15  ;;  %v2986_v47 = vadd.f32 %v2985_v59, %v6848_v16  ;;  %v7865_v11 = vld [vmem:[#allocation10_spill] sm:$0xff] }
 0x22b   : > { %v5039_v6 = vpop.f32.mrf.mxu0  ;;  %v5142_v53 = vpop.f32.mrf.mxu1 }
 0x22c   : > { %3660 = vst.msk [vmem:[%s6943_s8 + $0x108] sm:$0xff] %vm3626_vm2, %v3443_v4  ;;  %v3437_v13 = vadd.f32 %v3436_v63, %v2986_v47  ;;  %v3004_v25 = vadd.f32 %v5039_v6, %v6851_v29  ;;  %v7864_v63 = vld [vmem:[#allocation9_spill] sm:$0xff]  ;;  %v7866_v47 = vld [vmem:[#allocation11_spill] sm:$0xff] }
 0x22d   : > { %v2997_v7 = vpop.f32.mrf.mxu0  ;;  %v3460_v45 = vpop.f32.mrf.mxu1 }
 0x22e   : > { %3659 = vst.msk [vmem:[%s6943_s8 + $0x100] sm:$0xff] %vm3626_vm2, %v3437_v13  ;;  %v3455_v24 = vadd.f32 %v5139_v39, %v3004_v25  ;;  %v2998_v26 = vadd.f32 %v2997_v7, %v6854_v30  ;;  %v7867_v7 = vld [vmem:[#allocation12_spill] sm:$0xff] }
 0x22f   : > { %v5042_v38 = vpop.f32.mrf.mxu0  ;;  %v5145_v51 = vpop.f32.mrf.mxu1 }
 0x230   : > { %3662 = vst.msk [vmem:[%s6943_s8 + $0x118] sm:$0xff] %vm3626_vm2, %v3455_v24  ;;  %v3449_v16 = vadd.f32 %v3448_v18, %v2998_v26  ;;  %v3016_v2 = vadd.f32 %v5042_v38, %v6857_v19 }
 0x231   : > { %v3009_v37 = vpop.f32.mrf.mxu0  ;;  %v3472_v5 = vpop.f32.mrf.mxu1 }
 0x232   : > { %3661 = vst.msk [vmem:[%s6943_s8 + $0x110] sm:$0xff] %vm3626_vm2, %v3449_v16  ;;  %v3467_v29 = vadd.f32 %v5142_v53, %v3016_v2  ;;  %v3010_v3 = vadd.f32 %v3009_v37, %v6860_v32 }
 0x233   : > { %v5045_v36 = vpop.f32.mrf.mxu0  ;;  %v5148_v54 = vpop.f32.mrf.mxu1 }
 0x234   : > { %3664 = vst.msk [vmem:[%s6943_s8 + $0x128] sm:$0xff] %vm3626_vm2, %v3467_v29  ;;  %v3461_v30 = vadd.f32 %v3460_v45, %v3010_v3  ;;  %v3028_v31 = vadd.f32 %v5045_v36, %v6863_v23  ;;  %v7869_v29 = vld [vmem:[#allocation14_spill] sm:$0xff] }
 0x235   : > { %v3021_v33 = vpop.f32.mrf.mxu0  ;;  %v3484_v12 = vpop.f32.mrf.mxu1 }
 0x236   : > { %3663 = vst.msk [vmem:[%s6943_s8 + $0x120] sm:$0xff] %vm3626_vm2, %v3461_v30  ;;  %v3479_v19 = vadd.f32 %v5145_v51, %v3028_v31  ;;  %v3022_v27 = vadd.f32 %v3021_v33, %v6866_v56  ;;  %v7868_v51 = vld [vmem:[#allocation13_spill] sm:$0xff]  ;;  %v7870_v31 = vld [vmem:[#allocation15_spill] sm:$0xff] }
 0x237   : > { %v5048_v57 = vpop.f32.mrf.mxu0  ;;  %v5151_v14 = vpop.f32.mrf.mxu1 }
 0x238   : > { %3666 = vst.msk [vmem:[%s6943_s8 + $0x138] sm:$0xff] %vm3626_vm2, %v3479_v19  ;;  %v3473_v32 = vadd.f32 %v3472_v5, %v3022_v27  ;;  %v3040_v43 = vadd.f32 %v5048_v57, %v7860_v10  ;;  %v7871_v57 = vld [vmem:[#allocation16_spill] sm:$0xff] }
 0x239   : > { %v3033_v46 = vpop.f32.mrf.mxu0  ;;  %v3496_v52 = vpop.f32.mrf.mxu1 }
 0x23a   : > { %3665 = vst.msk [vmem:[%s6943_s8 + $0x130] sm:$0xff] %vm3626_vm2, %v3473_v32  ;;  %v3491_v23 = vadd.f32 %v5148_v54, %v3040_v43  ;;  %v3034_v42 = vadd.f32 %v3033_v46, %v7861_v21  ;;  %v7872_v46 = vld [vmem:[#allocation17_spill] sm:$0xff] }
 0x23b   : > { %v5051_v8 = vpop.f32.mrf.mxu0  ;;  %v5154_v62 = vpop.f32.mrf.mxu1 }
 0x23c   : > { %3668 = vst.msk [vmem:[%s6943_s8 + $0x148] sm:$0xff] %vm3626_vm2, %v3491_v23  ;;  %v3485_v56 = vadd.f32 %v3484_v12, %v3034_v42  ;;  %v3052_v55 = vadd.f32 %v5051_v8, %v7862_v44  ;;  %v7873_v8 = vld [vmem:[#allocation18_spill] sm:$0xff] }
 0x23d   : > { %v3045_v9 = vpop.f32.mrf.mxu0  ;;  %v3508_v48 = vpop.f32.mrf.mxu1 }
 0x23e   : > { %3667 = vst.msk [vmem:[%s6943_s8 + $0x140] sm:$0xff] %vm3626_vm2, %v3485_v56  ;;  %v3503_v20 = vadd.f32 %v5151_v14, %v3052_v55  ;;  %v3046_v41 = vadd.f32 %v3045_v9, %v7863_v58  ;;  %v7874_v9 = vld [vmem:[#allocation19_spill] sm:$0xff] }
 0x23f   : > { %v5054_v28 = vpop.f32.mrf.mxu0  ;;  %v5157_v34 = vpop.f32.mrf.mxu1 }
 0x240   : > { %3670 = vst.msk [vmem:[%s6943_s8 + $0x158] sm:$0xff] %vm3626_vm2, %v3503_v20  ;;  %v3497_v35 = vadd.f32 %v3496_v52, %v3046_v41  ;;  %v3064_v60 = vadd.f32 %v5054_v28, %v7864_v63  ;;  %v7875_v28 = vld [vmem:[#allocation20_spill] sm:$0xff] }
 0x241   : > { %v3057_v22 = vpop.f32.mrf.mxu0  ;;  %v3520_v61 = vpop.f32.mrf.mxu1 }
 0x242   : > { %3669 = vst.msk [vmem:[%s6943_s8 + $0x150] sm:$0xff] %vm3626_vm2, %v3497_v35  ;;  %v3515_v39 = vadd.f32 %v5154_v62, %v3064_v60  ;;  %v3058_v15 = vadd.f32 %v3057_v22, %v7865_v11  ;;  %v7876_v22 = vld [vmem:[#allocation21_spill] sm:$0xff] }
 0x243   : > { %v5057_v59 = vpop.f32.mrf.mxu0  ;;  %v5160_v18 = vpop.f32.mrf.mxu1 }
 0x244   : > { %3672 = vst.msk [vmem:[%s6943_s8 + $0x168] sm:$0xff] %vm3626_vm2, %v3515_v39  ;;  %v3509_v4 = vadd.f32 %v3508_v48, %v3058_v15  ;;  %v3076_v6 = vadd.f32 %v5057_v59, %v7866_v47  ;;  %v7877_v59 = vld [vmem:[#allocation22_spill] sm:$0xff] }
 0x245   : > { %v3069_v53 = vpop.f32.mrf.mxu0  ;;  %v3532_v13 = vpop.f32.mrf.mxu1 }
 0x246   : > { %3671 = vst.msk [vmem:[%s6943_s8 + $0x160] sm:$0xff] %vm3626_vm2, %v3509_v4  ;;  %v3527_v25 = vadd.f32 %v5157_v34, %v3076_v6  ;;  %v3070_v45 = vadd.f32 %v3069_v53, %v7867_v7 }
 0x247   : > { %v5060_v24 = vpop.f32.mrf.mxu0  ;;  %v5163_v26 = vpop.f32.mrf.mxu1 }
 0x248   : > { %3674 = vst.msk [vmem:[%s6943_s8 + $0x178] sm:$0xff] %vm3626_vm2, %v3527_v25  ;;  %v3521_v38 = vadd.f32 %v3520_v61, %v3070_v45  ;;  %v3088_v16 = vadd.f32 %v5060_v24, %v7868_v51 }
 0x249   : > { %v3081_v2 = vpop.f32.mrf.mxu0  ;;  %v3544_v37 = vpop.f32.mrf.mxu1 }
 0x24a   : > { %3673 = vst.msk [vmem:[%s6943_s8 + $0x170] sm:$0xff] %vm3626_vm2, %v3521_v38  ;;  %v3539_v5 = vadd.f32 %v5160_v18, %v3088_v16  ;;  %v3082_v3 = vadd.f32 %v3081_v2, %v7869_v29 }
 0x24b   : > { %v5063_v36 = vpop.f32.mrf.mxu0  ;;  %v5166_v54 = vpop.f32.mrf.mxu1 }
 0x24c   : > { %3676 = vst.msk [vmem:[%s6943_s8 + $0x188] sm:$0xff] %vm3626_vm2, %v3539_v5  ;;  %v3533_v30 = vadd.f32 %v3532_v13, %v3082_v3  ;;  %v3100_v33 = vadd.f32 %v5063_v36, %v7870_v31 }
 0x24d   : > { %v3093_v12 = vpop.f32.mrf.mxu0  ;;  %v3556_v19 = vpop.f32.mrf.mxu1 }
 0x24e   : > { %3675 = vst.msk [vmem:[%s6943_s8 + $0x180] sm:$0xff] %vm3626_vm2, %v3533_v30  ;;  %v3551_v27 = vadd.f32 %v5163_v26, %v3100_v33  ;;  %v3094_v14 = vadd.f32 %v3093_v12, %v7871_v57 }
 0x24f   : > { %v5066_v32 = vpop.f32.mrf.mxu0  ;;  %v5169_v10 = vpop.f32.mrf.mxu1 }
 0x250   : > { %3678 = vst.msk [vmem:[%s6943_s8 + $0x198] sm:$0xff] %vm3626_vm2, %v3551_v27  ;;  %v3545_v43 = vadd.f32 %v3544_v37, %v3094_v14  ;;  %v3112_v52 = vadd.f32 %v5066_v32, %v7872_v46 }
 0x251   : > { %v3105_v23 = vpop.f32.mrf.mxu0  ;;  %v3568_v21 = vpop.f32.mrf.mxu1 }
 0x252   : > { %3677 = vst.msk [vmem:[%s6943_s8 + $0x190] sm:$0xff] %vm3626_vm2, %v3545_v43  ;;  %v3563_v42 = vadd.f32 %v5166_v54, %v3112_v52  ;;  %v3106_v62 = vadd.f32 %v3105_v23, %v7873_v8 }
 0x253   : > { %v5069_v56 = vpop.f32.mrf.mxu0  ;;  %v5172_v44 = vpop.f32.mrf.mxu1 }
 0x254   : > { %3680 = vst.msk [vmem:[%s6943_s8 + $0x1a8] sm:$0xff] %vm3626_vm2, %v3563_v42  ;;  %v3557_v55 = vadd.f32 %v3556_v19, %v3106_v62  ;;  %v3124_v48 = vadd.f32 %v5069_v56, %v7874_v9 }
 0x255   : > { %v3117_v20 = vpop.f32.mrf.mxu0  ;;  %v3580_v58 = vpop.f32.mrf.mxu1 }
 0x256   : > { %3679 = vst.msk [vmem:[%s6943_s8 + $0x1a0] sm:$0xff] %vm3626_vm2, %v3557_v55  ;;  %v3575_v41 = vadd.f32 %v5169_v10, %v3124_v48  ;;  %v3118_v34 = vadd.f32 %v3117_v20, %v7875_v28 }
 0x257   : > { %v5072_v35 = vpop.f32.mrf.mxu0  ;;  %v5175_v63 = vpop.f32.mrf.mxu1 }
 0x258   : > { %3682 = vst.msk [vmem:[%s6943_s8 + $0x1b8] sm:$0xff] %vm3626_vm2, %v3575_v41  ;;  %v3569_v60 = vadd.f32 %v3568_v21, %v3118_v34  ;;  %v3136_v61 = vadd.f32 %v5072_v35, %v7876_v22 }
 0x259   : > { %v3129_v39 = vpop.f32.mrf.mxu0  ;;  %v3592_v11 = vpop.f32.mrf.mxu1 }
 0x25a   : > { %3681 = vst.msk [vmem:[%s6943_s8 + $0x1b0] sm:$0xff] %vm3626_vm2, %v3569_v60  ;;  %v3587_v15 = vadd.f32 %v5172_v44, %v3136_v61  ;;  %v3130_v18 = vadd.f32 %v3129_v39, %v7877_v59 }
 0x25b   : > { %v5075_v4 = vpop.f32.mrf.mxu0  ;;  %v5178_v47 = vpop.f32.mrf.mxu1 }
 0x25c   : > { %3684 = vst.msk [vmem:[%s6943_s8 + $0x1c8] sm:$0xff] %vm3626_vm2, %v3587_v15  ;;  %v3581_v6 = vadd.f32 %v3580_v58, %v3130_v18  ;;  %v3148_v53 = vadd.f32 %v5075_v4, %v6923_v40 }
 0x25d   : > { %v3141_v13 = vpop.f32.mrf.mxu0  ;;  %v3604_v24 = vpop.f32.mrf.mxu1 }
 0x25e   : > { %3683 = vst.msk [vmem:[%s6943_s8 + $0x1c0] sm:$0xff] %vm3626_vm2, %v3581_v6  ;;  %v3599_v25 = vadd.f32 %v5175_v63, %v3148_v53  ;;  %v3142_v7 = vadd.f32 %v3141_v13, %v6926_v17 }
 0x25f   : > { %v5078_v45 = vpop.f32.mrf.mxu0  ;;  %v5181_v37 = vpop.f32.mrf.mxu1 }
 0x260   : > { %3686 = vst.msk [vmem:[%s6943_s8 + $0x1d8] sm:$0xff] %vm3626_vm2, %v3599_v25  ;;  %v3593_v26 = vadd.f32 %v3592_v11, %v3142_v7  ;;  %v3160_v38 = vadd.f32 %v5078_v45, %v6929_v50 }
 0x261   : > { %v3153_v51 = vpop.f32.mrf.mxu0  ;;  %v3616_v36 = vpop.f32.mrf.mxu1 }
 0x262   : > { %3685 = vst.msk [vmem:[%s6943_s8 + $0x1d0] sm:$0xff] %vm3626_vm2, %v3593_v26  ;;  %v3611_v40 = vadd.f32 %v5178_v47, %v3160_v38  ;;  %v3154_v16 = vadd.f32 %v3153_v51, %v6933_v0 }
 0x263   : > { %v5081_v2 = vpop.f32.mrf.mxu0 }
 0x264   : > { %3688 = vst.msk [vmem:[%s6943_s8 + $0x1e8] sm:$0xff] %vm3626_vm2, %v3611_v40  ;;  %v3605_v17 = vadd.f32 %v3604_v24, %v3154_v16  ;;  %v3172_v5 = vadd.f32 %v5081_v2, %v6936_v1 }
 0x265   : > { %v3165_v29 = vpop.f32.mrf.mxu0 }
 0x266   : > { %3687 = vst.msk [vmem:[%s6943_s8 + $0x1e0] sm:$0xff] %vm3626_vm2, %v3605_v17  ;;  %v3623_v3 = vadd.f32 %v5181_v37, %v3172_v5  ;;  %v3166_v50 = vadd.f32 %v3165_v29, %v6939_v49  ;;  %3697 = sbr.rel (!%p5406_p4) target bundleno = 683 (0x2ab), region = 36 }
 0x268   : > { %3690 = vst.msk [vmem:[%s6943_s8 + $0x1f8] sm:$0xff] %vm3626_vm2, %v3623_v3  ;;  %v3617_v54 = vadd.f32 %v3616_v36, %v3166_v50 }
 0x26a   : > { %3689 = vst.msk [vmem:[%s6943_s8 + $0x1f0] sm:$0xff] %vm3626_vm2, %v3617_v54 }
 0x26b   : > { %s7887_s9 = smov (!%p3700_p8, %s3699_s9), 64 }
 0x26c   : > { %s4168_s14 = sshll.u32 %s7887_s9, 7 }
 0x26d   : > { %p4171_p9 = scmp.eq.s32.totalorder %s4168_s14, 0 }
 0x26e   : > { %s7148_s16 = sshrl.u32 (!%p4171_p9), %s7887_s9, 6 }
 0x26f   : > { %3708 = sbr.rel (%p4171_p9) target bundleno = 683 (0x2ab), region = 40  ;;  %p4172_p10 = scmp.le.s32.totalorder (!%p4171_p9), %s7148_s16, 0 }
 0x274   : > { %4115 = sbr.rel (%p4172_p10) target bundleno = 666 (0x29a), region = 116  ;;  %s7878_s2 = smov (!%p4172_p10), %s7142_s13 }
 0x275   : > { %s7879_s18 = smov (!%p4172_p10), %s6943_s8  ;;  %s7157_s19 = smov (!%p4172_p10), 0  }
 0x276   : > { %s7159_s21 = smov (!%p4172_p10), 0  }
 0x279 LB: >> { %v3897_v0 = vld [vmem:[%s5332_s18] sm:$0xff]  ;;  %v3899_v1 = vld [vmem:[%s5332_s18 + $0x8] sm:$0xff]  ;;  %v3901_v49 = vld [vmem:[%s5332_s18 + $0x10] sm:$0xff]  ;;  %s4025_s22 = sadd.s32 1, %s5336_s19  ;;  %s3891_s21 = sadd.s32 1, %s5340_s21   ;;  %s5340_s21 = sphi %s7159_s21, %s3891_s21   ;;  %s5336_s19 = sphi %s7157_s19, %s7882_s19   ;;  %s5332_s18 = sphi %s7879_s18, %s7881_s18   ;;  %s5328_s2 = sphi %s7878_s2, %s7880_s2  }
 0x27a   : >> { %3898 = vst [vmem:[%s5328_s2] sm:$0xff] %v3897_v0  ;;  %3900 = vst [vmem:[%s5328_s2 + $0x8] sm:$0xff] %v3899_v1  ;;  %v3903_v30 = vld [vmem:[%s5332_s18 + $0x18] sm:$0xff]  ;;  %v3905_v31 = vld [vmem:[%s5332_s18 + $0x20] sm:$0xff]  ;;  %p4026_p11 = scmp.ge.s32.totalorder %s4025_s22, %s7148_s16  ;;  %p3890_p12 = scmp.ge.s32.totalorder %s3891_s21, %s7148_s16 }
 0x27b   : >> { %3902 = vst [vmem:[%s5328_s2 + $0x10] sm:$0xff] %v3901_v49  ;;  %v3907_v33 = vld [vmem:[%s5332_s18 + $0x28] sm:$0xff]  ;;  %3904 = vst [vmem:[%s5328_s2 + $0x18] sm:$0xff] %v3903_v30  ;;  %v3909_v12 = vld [vmem:[%s5332_s18 + $0x30] sm:$0xff] }
 0x27c   : >> { %3906 = vst [vmem:[%s5328_s2 + $0x20] sm:$0xff] %v3905_v31  ;;  %3908 = vst [vmem:[%s5328_s2 + $0x28] sm:$0xff] %v3907_v33  ;;  %v3911_v19 = vld [vmem:[%s5332_s18 + $0x38] sm:$0xff]  ;;  %v3913_v27 = vld [vmem:[%s5332_s18 + $0x40] sm:$0xff]  ;;  %s7889_s22 = smov (%p4026_p11, %s4025_s22), 0 }
 0x27d   : >> { %3910 = vst [vmem:[%s5328_s2 + $0x30] sm:$0xff] %v3909_v12  ;;  %3912 = vst [vmem:[%s5328_s2 + $0x38] sm:$0xff] %v3911_v19  ;;  %v3915_v57 = vld [vmem:[%s5332_s18 + $0x48] sm:$0xff]  ;;  %v3917_v14 = vld [vmem:[%s5332_s18 + $0x50] sm:$0xff]  ;;  %s4173_s23 = sshll.u32 %s7889_s22, 9  ;;  %s7882_s19 = smov %s7889_s22 }
 0x27e   : >> { %3914 = vst [vmem:[%s5328_s2 + $0x40] sm:$0xff] %v3913_v27  ;;  %v3919_v32 = vld [vmem:[%s5332_s18 + $0x58] sm:$0xff]  ;;  %3916 = vst [vmem:[%s5328_s2 + $0x48] sm:$0xff] %v3915_v57  ;;  %v3921_v10 = vld [vmem:[%s5332_s18 + $0x60] sm:$0xff]  ;;  %s7215_s24 = scalar_lea.vmem %s6943_s8, %s4173_s23 [#allocation3]   ;;  %s7218_s25 = scalar_lea.vmem %s7142_s13, %s4173_s23  }
 0x27f   : >> { %3918 = vst [vmem:[%s5328_s2 + $0x50] sm:$0xff] %v3917_v14  ;;  %3920 = vst [vmem:[%s5328_s2 + $0x58] sm:$0xff] %v3919_v32  ;;  %v3923_v43 = vld [vmem:[%s5332_s18 + $0x68] sm:$0xff]  ;;  %v3925_v46 = vld [vmem:[%s5332_s18 + $0x70] sm:$0xff] }
 0x280   : >> { %3922 = vst [vmem:[%s5328_s2 + $0x60] sm:$0xff] %v3921_v10  ;;  %3924 = vst [vmem:[%s5328_s2 + $0x68] sm:$0xff] %v3923_v43  ;;  %v3927_v52 = vld [vmem:[%s5332_s18 + $0x78] sm:$0xff]  ;;  %v3929_v23 = vld [vmem:[%s5332_s18 + $0x80] sm:$0xff] }
 0x281   : >> { %3926 = vst [vmem:[%s5328_s2 + $0x70] sm:$0xff] %v3925_v46  ;;  %v3931_v21 = vld [vmem:[%s5332_s18 + $0x88] sm:$0xff]  ;;  %3928 = vst [vmem:[%s5328_s2 + $0x78] sm:$0xff] %v3927_v52  ;;  %v3933_v42 = vld [vmem:[%s5332_s18 + $0x90] sm:$0xff] }
 0x282   : >> { %3930 = vst [vmem:[%s5328_s2 + $0x80] sm:$0xff] %v3929_v23  ;;  %3932 = vst [vmem:[%s5328_s2 + $0x88] sm:$0xff] %v3931_v21  ;;  %v3935_v8 = vld [vmem:[%s5332_s18 + $0x98] sm:$0xff]  ;;  %v3937_v62 = vld [vmem:[%s5332_s18 + $0xa0] sm:$0xff] }
 0x283   : >> { %3934 = vst [vmem:[%s5328_s2 + $0x90] sm:$0xff] %v3933_v42  ;;  %3936 = vst [vmem:[%s5328_s2 + $0x98] sm:$0xff] %v3935_v8  ;;  %v3939_v56 = vld [vmem:[%s5332_s18 + $0xa8] sm:$0xff]  ;;  %v3941_v44 = vld [vmem:[%s5332_s18 + $0xb0] sm:$0xff] }
 0x284   : >> { %3938 = vst [vmem:[%s5328_s2 + $0xa0] sm:$0xff] %v3937_v62  ;;  %v3943_v55 = vld [vmem:[%s5332_s18 + $0xb8] sm:$0xff]  ;;  %3940 = vst [vmem:[%s5328_s2 + $0xa8] sm:$0xff] %v3939_v56  ;;  %v3945_v9 = vld [vmem:[%s5332_s18 + $0xc0] sm:$0xff] }
 0x285   : >> { %3942 = vst [vmem:[%s5328_s2 + $0xb0] sm:$0xff] %v3941_v44  ;;  %3944 = vst [vmem:[%s5328_s2 + $0xb8] sm:$0xff] %v3943_v55  ;;  %v3947_v48 = vld [vmem:[%s5332_s18 + $0xc8] sm:$0xff]  ;;  %v3949_v20 = vld [vmem:[%s5332_s18 + $0xd0] sm:$0xff] }
 0x286   : >> { %3946 = vst [vmem:[%s5328_s2 + $0xc0] sm:$0xff] %v3945_v9  ;;  %3948 = vst [vmem:[%s5328_s2 + $0xc8] sm:$0xff] %v3947_v48  ;;  %v3951_v58 = vld [vmem:[%s5332_s18 + $0xd8] sm:$0xff]  ;;  %v3953_v41 = vld [vmem:[%s5332_s18 + $0xe0] sm:$0xff] }
 0x287   : >> { %3950 = vst [vmem:[%s5328_s2 + $0xd0] sm:$0xff] %v3949_v20  ;;  %v3955_v28 = vld [vmem:[%s5332_s18 + $0xe8] sm:$0xff]  ;;  %3952 = vst [vmem:[%s5328_s2 + $0xd8] sm:$0xff] %v3951_v58  ;;  %v3957_v34 = vld [vmem:[%s5332_s18 + $0xf0] sm:$0xff] }
 0x288   : >> { %3954 = vst [vmem:[%s5328_s2 + $0xe0] sm:$0xff] %v3953_v41  ;;  %3956 = vst [vmem:[%s5328_s2 + $0xe8] sm:$0xff] %v3955_v28  ;;  %v3959_v35 = vld [vmem:[%s5332_s18 + $0xf8] sm:$0xff]  ;;  %v3961_v63 = vld [vmem:[%s5332_s18 + $0x100] sm:$0xff] }
 0x289   : >> { %3958 = vst [vmem:[%s5328_s2 + $0xf0] sm:$0xff] %v3957_v34  ;;  %3960 = vst [vmem:[%s5328_s2 + $0xf8] sm:$0xff] %v3959_v35  ;;  %v3963_v60 = vld [vmem:[%s5332_s18 + $0x108] sm:$0xff]  ;;  %v3965_v22 = vld [vmem:[%s5332_s18 + $0x110] sm:$0xff] }
 0x28a   : >> { %3962 = vst [vmem:[%s5328_s2 + $0x100] sm:$0xff] %v3961_v63  ;;  %v3967_v61 = vld [vmem:[%s5332_s18 + $0x118] sm:$0xff]  ;;  %3964 = vst [vmem:[%s5328_s2 + $0x108] sm:$0xff] %v3963_v60  ;;  %v3969_v39 = vld [vmem:[%s5332_s18 + $0x120] sm:$0xff] }
 0x28b   : >> { %3966 = vst [vmem:[%s5328_s2 + $0x110] sm:$0xff] %v3965_v22  ;;  %3968 = vst [vmem:[%s5328_s2 + $0x118] sm:$0xff] %v3967_v61  ;;  %v3971_v11 = vld [vmem:[%s5332_s18 + $0x128] sm:$0xff]  ;;  %v3973_v15 = vld [vmem:[%s5332_s18 + $0x130] sm:$0xff] }
 0x28c   : >> { %3970 = vst [vmem:[%s5328_s2 + $0x120] sm:$0xff] %v3969_v39  ;;  %3972 = vst [vmem:[%s5328_s2 + $0x128] sm:$0xff] %v3971_v11  ;;  %v3975_v59 = vld [vmem:[%s5332_s18 + $0x138] sm:$0xff]  ;;  %v3977_v18 = vld [vmem:[%s5332_s18 + $0x140] sm:$0xff] }
 0x28d   : >> { %3974 = vst [vmem:[%s5328_s2 + $0x130] sm:$0xff] %v3973_v15  ;;  %v3979_v4 = vld [vmem:[%s5332_s18 + $0x148] sm:$0xff]  ;;  %3976 = vst [vmem:[%s5328_s2 + $0x138] sm:$0xff] %v3975_v59  ;;  %v3981_v47 = vld [vmem:[%s5332_s18 + $0x150] sm:$0xff] }
 0x28e   : >> { %3978 = vst [vmem:[%s5328_s2 + $0x140] sm:$0xff] %v3977_v18  ;;  %3980 = vst [vmem:[%s5328_s2 + $0x148] sm:$0xff] %v3979_v4  ;;  %v3983_v6 = vld [vmem:[%s5332_s18 + $0x158] sm:$0xff]  ;;  %v3985_v53 = vld [vmem:[%s5332_s18 + $0x160] sm:$0xff] }
 0x28f   : >> { %3982 = vst [vmem:[%s5328_s2 + $0x150] sm:$0xff] %v3981_v47  ;;  %3984 = vst [vmem:[%s5328_s2 + $0x158] sm:$0xff] %v3983_v6  ;;  %v3987_v13 = vld [vmem:[%s5332_s18 + $0x168] sm:$0xff]  ;;  %v3989_v25 = vld [vmem:[%s5332_s18 + $0x170] sm:$0xff] }
 0x290   : >> { %3986 = vst [vmem:[%s5328_s2 + $0x160] sm:$0xff] %v3985_v53  ;;  %v3991_v7 = vld [vmem:[%s5332_s18 + $0x178] sm:$0xff]  ;;  %3988 = vst [vmem:[%s5328_s2 + $0x168] sm:$0xff] %v3987_v13  ;;  %v3993_v45 = vld [vmem:[%s5332_s18 + $0x180] sm:$0xff] }
 0x291   : >> { %3990 = vst [vmem:[%s5328_s2 + $0x170] sm:$0xff] %v3989_v25  ;;  %3992 = vst [vmem:[%s5328_s2 + $0x178] sm:$0xff] %v3991_v7  ;;  %v3995_v24 = vld [vmem:[%s5332_s18 + $0x188] sm:$0xff]  ;;  %v3997_v26 = vld [vmem:[%s5332_s18 + $0x190] sm:$0xff] }
 0x292   : >> { %3994 = vst [vmem:[%s5328_s2 + $0x180] sm:$0xff] %v3993_v45  ;;  %3996 = vst [vmem:[%s5328_s2 + $0x188] sm:$0xff] %v3995_v24  ;;  %v3999_v38 = vld [vmem:[%s5332_s18 + $0x198] sm:$0xff]  ;;  %v4001_v51 = vld [vmem:[%s5332_s18 + $0x1a0] sm:$0xff] }
 0x293   : >> { %3998 = vst [vmem:[%s5328_s2 + $0x190] sm:$0xff] %v3997_v26  ;;  %v4003_v40 = vld [vmem:[%s5332_s18 + $0x1a8] sm:$0xff]  ;;  %4000 = vst [vmem:[%s5328_s2 + $0x198] sm:$0xff] %v3999_v38  ;;  %v4005_v16 = vld [vmem:[%s5332_s18 + $0x1b0] sm:$0xff] }
 0x294   : >> { %4002 = vst [vmem:[%s5328_s2 + $0x1a0] sm:$0xff] %v4001_v51  ;;  %4004 = vst [vmem:[%s5328_s2 + $0x1a8] sm:$0xff] %v4003_v40  ;;  %v4007_v2 = vld [vmem:[%s5332_s18 + $0x1b8] sm:$0xff]  ;;  %v4009_v37 = vld [vmem:[%s5332_s18 + $0x1c0] sm:$0xff] }
 0x295   : >> { %4006 = vst [vmem:[%s5328_s2 + $0x1b0] sm:$0xff] %v4005_v16  ;;  %4008 = vst [vmem:[%s5328_s2 + $0x1b8] sm:$0xff] %v4007_v2  ;;  %v4011_v17 = vld [vmem:[%s5332_s18 + $0x1c8] sm:$0xff]  ;;  %v4013_v5 = vld [vmem:[%s5332_s18 + $0x1d0] sm:$0xff]  ;;  %3893 = sbr.rel (!%p3890_p12) target bundleno = 633 (0x279), region = 122 }
 0x296   : >> { %4010 = vst [vmem:[%s5328_s2 + $0x1c0] sm:$0xff] %v4009_v37  ;;  %v4015_v29 = vld [vmem:[%s5332_s18 + $0x1d8] sm:$0xff]  ;;  %4012 = vst [vmem:[%s5328_s2 + $0x1c8] sm:$0xff] %v4011_v17  ;;  %v4017_v3 = vld [vmem:[%s5332_s18 + $0x1e0] sm:$0xff] }
 0x297   : >> { %4014 = vst [vmem:[%s5328_s2 + $0x1d0] sm:$0xff] %v4013_v5  ;;  %4016 = vst [vmem:[%s5328_s2 + $0x1d8] sm:$0xff] %v4015_v29  ;;  %v4019_v50 = vld [vmem:[%s5332_s18 + $0x1e8] sm:$0xff]  ;;  %v4021_v36 = vld [vmem:[%s5332_s18 + $0x1f0] sm:$0xff] }
 0x298   : >> { %4018 = vst [vmem:[%s5328_s2 + $0x1e0] sm:$0xff] %v4017_v3  ;;  %4020 = vst [vmem:[%s5328_s2 + $0x1e8] sm:$0xff] %v4019_v50  ;;  %v4023_v54 = vld [vmem:[%s5332_s18 + $0x1f8] sm:$0xff]  ;;  %s7881_s18 = smov %s7215_s24 }
 0x299   : >> { %4022 = vst [vmem:[%s5328_s2 + $0x1f0] sm:$0xff] %v4021_v36  ;;  %4024 = vst [vmem:[%s5328_s2 + $0x1f8] sm:$0xff] %v4023_v54  ;;  %s7880_s2 = smov %s7218_s25 }
 0x29a PF: > { %s7323_s26 = sand.u32 63, %s7887_s9   ;;  %s4184_s27 = sshll.u32 %s7148_s16, 9 }
 0x29b   : > { %s4036_s28 = scalar_lea.vmem %s6943_s8, %s4184_s27 [#allocation3]   ;;  %s4038_s29 = scalar_lea.vmem %s7142_s13, %s4184_s27  }
 0x29c   : > { %p4178_p13 = scmp.le.s32.totalorder %s7323_s26, 0 }
 0x29d   : > { %s5342_s30 = smov (!%p4178_p13), %s4038_s29   ;;  %s5346_s4 = smov (!%p4178_p13), %s4036_s28  }
 0x29e   : > { %4129 = sbr.rel (%p4178_p13) target bundleno = 683 (0x2ab), region = 127  ;;  %s5350_s5 = smov (!%p4178_p13), 0  }
 0x29f   : > { %s5354_s6 = smov (!%p4178_p13), 0  }
 0x2a3 LB: >> { %v4048_v0 = vld [vmem:[%s5348_s4] sm:$0xff]  ;;  %s4050_s7 = sadd.s32 1, %s5352_s5  ;;  %s4042_s6 = sadd.s32 1, %s5356_s6   ;;  %s5356_s6 = sphi %s5354_s6, %s4042_s6   ;;  %s5352_s5 = sphi %s5350_s5, %s5351_s5   ;;  %s5348_s4 = sphi %s5346_s4, %s4055_s4   ;;  %s5344_s30 = sphi %s5342_s30, %s4056_s30  }
 0x2a4   : >> { %4049 = vst [vmem:[%s5344_s30] sm:$0xff] %v4048_v0  ;;  %p4051_p0 = scmp.ge.s32.totalorder %s4050_s7, %s7323_s26  ;;  %p4041_p1 = scmp.ge.s32.totalorder %s4042_s6, %s7323_s26 }
 0x2a6   : >> { %s7891_s7 = smov (%p4051_p0, %s4050_s7), 0  ;;  %4044 = sbr.rel (!%p4041_p1) target bundleno = 675 (0x2a3), region = 133 }
 0x2a7   : >> { %s4179_s8 = sshll.u32 %s7891_s7, 3  ;;  %s5351_s5 = smov %s7891_s7  }
 0x2a8   : >> { %s4055_s4 = scalar_lea.vmem %s4036_s28, %s4179_s8 [#allocation3]   ;;  %s4056_s30 = scalar_lea.vmem %s4038_s29, %s4179_s8  }
 0x2ab PF: > { %p11_p2 = scmp.ge.s32.totalorder %s5396_s17, 6   ;;  %s7883_s14 = smov %s5320_s15 }
 0x2ac   : > { %s7884_s15 = smov %s5404_s20  ;;  %s7885_s16 = smov %s5396_s17 }
 0x2ad   :  { %13 = sbr.rel (!%p11_p2) target bundleno = 4 (0x4), region = 144 }

</bundles_post_ra>
